<compile_context>
chip_gen: v7x
topology: tpu7x:2x2x1
jax: 0.10.0
libtpu: 0.0.40
codegen_flags: <defaults>
</compile_context>

<pallas_src>
import functools

import jax
import jax.numpy as jnp
from jax.experimental import pallas as pl
from jax.experimental.pallas import tpu as pltpu


# ------------------------------ fused Pallas kernel ------------------------------

def _gcn_h_4layer_kernel(*refs, bt, n_pad, has_mask):
    if has_mask:
        (x_ref, adj_ref, mask_ref,
         w1_ref, b1_ref, w2_ref, b2_ref, w3_ref, b3_ref, w4_ref, b4_ref,
         fcw_ref, fcb_ref, out_ref) = refs
    else:
        (x_ref, adj_ref,
         w1_ref, b1_ref, w2_ref, b2_ref, w3_ref, b3_ref, w4_ref, b4_ref,
         fcw_ref, fcb_ref, out_ref) = refs
        mask_ref = None

    # x_ref:    (1, nfeat, bt*n_pad)  bf16  transposed node features, node axis on lanes
    # adj_ref:  (bt, n_pad, n_pad)    bf16  adj^T per graph (zero padded)
    # mask_ref: (bt, 1, n_pad)        f32   optional mask over the flattened gc4 output
    # w*_ref:   (Fout, Fin) bf16, b*_ref: (Fout, 1) f32
    # fcw_ref:  (n_pad, C)  f32 (zero rows for padded nodes), fcb_ref: (1, C) f32
    # out_ref:  (1, bt, C)  f32

    def gc_layer(h_bf16, w_ref, b_ref, adj_view, relu):
        # Kipf GraphConvolution in transposed layout: out^T = (W^T @ h^T) @ adj^T + b.
        # bf16 MXU operands, f32 accumulation; bias/ReLU epilogue stays f32.
        s = jnp.dot(w_ref[...], h_bf16, preferred_element_type=jnp.float32)
        o = jnp.dot(s.astype(jnp.bfloat16), adj_view[...],
                    preferred_element_type=jnp.float32) + b_ref[...]
        return jnp.maximum(o, 0.0) if relu else o

    h4_rows = []
    for g in range(bt):                       # static unroll over the Bt graphs of this step
        adj_g = adj_ref.at[g]                 # ref view only; read again at every dot site
        h = x_ref[0, :, pl.ds(g * n_pad, n_pad)]                     # (nfeat, n_pad) bf16
        h = gc_layer(h, w1_ref, b1_ref, adj_g, True)                  # (nh1, n_pad) f32
        h = gc_layer(h.astype(jnp.bfloat16), w2_ref, b2_ref, adj_g, True)   # (nh2, n_pad)
        h = gc_layer(h.astype(jnp.bfloat16), w3_ref, b3_ref, adj_g, True)   # (nh3, n_pad)
        h = gc_layer(h.astype(jnp.bfloat16), w4_ref, b4_ref, adj_g, False)  # (1,  n_pad)
        if has_mask:
            h = h * mask_ref[g]               # mask of the flattened gc4 output (nclass == 1)
        h4_rows.append(h)

    h4 = jnp.concatenate(h4_rows, axis=0)     # (bt, n_pad) f32
    # fc over the flattened gc4 output; zero-padded fc rows kill padded-node contamination.
    logits = jnp.dot(h4, fcw_ref[...], preferred_element_type=jnp.float32) + fcb_ref[...]
    m = jnp.max(logits, axis=-1, keepdims=True)
    e = jnp.exp(logits - m)
    probs = e / jnp.sum(e, axis=-1, keepdims=True)
    out_ref[0] = probs.astype(out_ref.dtype)


def gcn_h_4layer_fused(x, adj, mask, params, *, block_b=8):
    """x: (B, N, nfeat) f32, adj: (B, N, N) f32, mask: (B, N) f32 or None -> (B, 2) f32."""
    B, N, nfeat = x.shape
    nh1 = params["gc1_w"].shape[1]
    nh2 = params["gc2_w"].shape[1]
    nh3 = params["gc3_w"].shape[1]
    ncls = params["gc4_w"].shape[1]
    C = params["fc_w"].shape[1]
    assert ncls == 1 and N * ncls == params["fc_w"].shape[0]

    n_pad = ((N + 127) // 128) * 128          # 227 -> 256: aligned DMAs, dense lane tiles
    bt = max(1, min(block_b, pl.cdiv(B, 2)))  # keep grid length >= 2 for v7x megacore
    nb = pl.cdiv(B, bt)
    b_pad = nb * bt

    # --- transpose + zero-pad inputs (trace-time XLA; x/adj shipped bf16 for the MXU) ---
    x_p = jnp.pad(x, ((0, b_pad - B), (0, n_pad - N), (0, 0)))
    x_t = jnp.transpose(x_p, (0, 2, 1))                       # (b_pad, nfeat, n_pad)
    x_t = (x_t.reshape(nb, bt, nfeat, n_pad)
              .transpose(0, 2, 1, 3)
              .reshape(nb, nfeat, bt * n_pad)
              .astype(jnp.bfloat16))
    adj_t = jnp.transpose(                                    # adj^T: row-normalized adj is
        jnp.pad(adj, ((0, b_pad - B), (0, n_pad - N), (0, n_pad - N))),   # not symmetric
        (0, 2, 1)).astype(jnp.bfloat16)

    # --- transposed bf16 weights / f32 epilogue params ---
    w1_t = params["gc1_w"].T.astype(jnp.bfloat16)
    w2_t = params["gc2_w"].T.astype(jnp.bfloat16)
    w3_t = params["gc3_w"].T.astype(jnp.bfloat16)
    w4_t = params["gc4_w"].T.astype(jnp.bfloat16)
    b1_t = params["gc1_b"].reshape(-1, 1).astype(jnp.float32)
    b2_t = params["gc2_b"].reshape(-1, 1).astype(jnp.float32)
    b3_t = params["gc3_b"].reshape(-1, 1).astype(jnp.float32)
    b4_t = params["gc4_b"].reshape(-1, 1).astype(jnp.float32)
    fcw_p = jnp.pad(params["fc_w"].astype(jnp.float32), ((0, n_pad - N * ncls), (0, 0)))
    fcb = params["fc_b"].reshape(1, -1).astype(jnp.float32)

    has_mask = mask is not None
    blk = lambda i: (i, 0, 0)
    const = lambda i: (0, 0)

    operands = [x_t, adj_t]
    in_specs = [
        pl.BlockSpec((1, nfeat, bt * n_pad), blk),            # x^T block of bt graphs
        # For v5e: if the adj DMA becomes exposed after bf16+transpose, deepen its pipeline:
        #   pl.BlockSpec((bt, n_pad, n_pad), blk, pipeline_mode=pl.Buffered(3))
        pl.BlockSpec((bt, n_pad, n_pad), blk),                # adj^T
    ]
    if has_mask:
        mask_t = jnp.pad(mask.astype(jnp.float32),
                         ((0, b_pad - B), (0, n_pad - N))).reshape(b_pad, 1, n_pad)
        operands.append(mask_t)
        in_specs.append(pl.BlockSpec((bt, 1, n_pad), blk))
    operands += [w1_t, b1_t, w2_t, b2_t, w3_t, b3_t, w4_t, b4_t, fcw_p, fcb]
    in_specs += [
        pl.BlockSpec((nh1, nfeat), const), pl.BlockSpec((nh1, 1), const),   # gc1 (pinned)
        pl.BlockSpec((nh2, nh1), const), pl.BlockSpec((nh2, 1), const),     # gc2
        pl.BlockSpec((nh3, nh2), const), pl.BlockSpec((nh3, 1), const),     # gc3
        pl.BlockSpec((ncls, nh3), const), pl.BlockSpec((ncls, 1), const),   # gc4
        pl.BlockSpec((n_pad, C), const), pl.BlockSpec((1, C), const),       # fc
    ]

    kernel = functools.partial(_gcn_h_4layer_kernel, bt=bt, n_pad=n_pad, has_mask=has_mask)
    out = pl.pallas_call(
        kernel,
        out_shape=jax.ShapeDtypeStruct((nb, bt, C), jnp.float32),
        grid=(nb,),
        in_specs=in_specs,
        out_specs=pl.BlockSpec((1, bt, C), blk),
        compiler_params=pltpu.CompilerParams(
            dimension_semantics=("parallel",),                # shard batch blocks across TCs
        ),
    )(*operands)
    return out.reshape(b_pad, C)[:B]


# --------------------------------- model wrapper ---------------------------------

def init_params(key, *, nfeat, nhid_1, nhid_2, nhid_3, nclass, embedding_dim):
    ks = jax.random.split(key, 13)

    def gcn_init(kw, kb, fin, fout):
        stdv = 1.0 / jnp.sqrt(jnp.float32(fout))
        w = jax.random.uniform(kw, (fin, fout), jnp.float32, -stdv, stdv)
        b = jax.random.uniform(kb, (1, fout), jnp.float32, -stdv, stdv)
        return w, b

    params = {}
    params["em_element"] = jax.random.normal(ks[0], (54, embedding_dim), jnp.float32)
    params["em_charge"] = jax.random.normal(ks[1], (7, embedding_dim), jnp.float32)
    params["em_aromatic"] = jax.random.normal(ks[2], (3, embedding_dim), jnp.float32)
    params["gc1_w"], params["gc1_b"] = gcn_init(ks[3], ks[4], nfeat, nhid_1)
    params["gc2_w"], params["gc2_b"] = gcn_init(ks[5], ks[6], nhid_1, nhid_2)
    params["gc3_w"], params["gc3_b"] = gcn_init(ks[7], ks[8], nhid_2, nhid_3)
    params["gc4_w"], params["gc4_b"] = gcn_init(ks[9], ks[10], nhid_3, nclass)
    fc_std = 1.0 / jnp.sqrt(jnp.float32(227))
    params["fc_w"] = jax.random.uniform(ks[11], (227, 2), jnp.float32, -fc_std, fc_std)
    params["fc_b"] = jax.random.uniform(ks[12], (1, 2), jnp.float32, -fc_std, fc_std)
    return params


def _embed_concat(params, element, charge, aromatic):
    # Embedding lookups + concat in plain JAX (tiny gathers; no clean Pallas win).
    feats = [jnp.take(params["em_element"], element, axis=0),
             jnp.take(params["em_charge"], charge, axis=0)]
    if aromatic is not None:
        feats.append(jnp.take(params["em_aromatic"], aromatic, axis=0))
    return jnp.concatenate(feats, axis=2)


def gcn_h_4layer_forward(params, element, charge, adj, aromatic=None, mask=None):
    x = _embed_concat(params, element, charge, aromatic)      # (B, N, nfeat)
    # F.dropout(..., training=False) is the identity at inference and is elided.
    if mask is not None:
        mask = mask.reshape(element.shape[0], -1)
    return gcn_h_4layer_fused(x, adj, mask, params)           # (B, 2)


def gcn_h_4layer_reference(params, element, charge, adj, aromatic=None, mask=None):
    # Pure-JAX f32 reference with the exact PyTorch module math (for tolerance checks).
    x = _embed_concat(params, element, charge, aromatic)

    def gc(h, w, b):
        return jnp.einsum("bij,bjf->bif", adj, h @ w) + b

    h = jax.nn.relu(gc(x, params["gc1_w"], params["gc1_b"]))
    h = jax.nn.relu(gc(h, params["gc2_w"], params["gc2_b"]))
    h = jax.nn.relu(gc(h, params["gc3_w"], params["gc3_b"]))
    h = gc(h, params["gc4_w"], params["gc4_b"])
    h = h.reshape(element.shape[0], -1)
    if mask is not None:
        h = h * mask
    logits = h @ params["fc_w"] + params["fc_b"]
    return jax.nn.softmax(logits, axis=1)


# -------------------------------------- main --------------------------------------

if __name__ == "__main__":
    B = 8
    N = 227            # fixed by nn.Linear(227, 2) with nclass = 1 (227 is prime)
    embedding_dim = 16
    nfeat = 2 * embedding_dim  # aromatic=None path -> cat(element_emb, charge_emb)
    nhid_1, nhid_2, nhid_3, nclass = 32, 64, 32, 1

    key = jax.random.PRNGKey(0)
    k_par, k_el, k_ch, k_adj, k_mask = jax.random.split(key, 5)

    params = init_params(
        k_par, nfeat=nfeat, nhid_1=nhid_1, nhid_2=nhid_2, nhid_3=nhid_3,
        nclass=nclass, embedding_dim=embedding_dim,
    )

    element = jax.random.randint(k_el, (B, N), 0, 54, dtype=jnp.int32)
    charge = jax.random.randint(k_ch, (B, N), 0, 7, dtype=jnp.int32)
    # Simple symmetric-then-row-normalized dense adjacency, as a GCN would consume.
    a = jax.random.uniform(k_adj, (B, N, N), jnp.float32)
    a = (a + jnp.swapaxes(a, 1, 2)) * 0.5 + jnp.eye(N, dtype=jnp.float32)[None]
    adj = a / jnp.sum(a, axis=-1, keepdims=True)

    fwd = jax.jit(gcn_h_4layer_forward)

    # --- no-mask inference path (specialized kernel, no mask DMA) ---
    out = jax.block_until_ready(fwd(params, element, charge, adj))
    ref = gcn_h_4layer_reference(params, element, charge, adj)
    assert out.shape == (B, 2)
    assert bool(jnp.all(jnp.isfinite(out)))
    assert bool(jnp.allclose(jnp.sum(out, axis=1), 1.0, atol=1e-5))
    assert bool(jnp.allclose(out, ref, atol=5e-2)), float(jnp.max(jnp.abs(out - ref)))

    # --- masked path (mask over flattened gc4 output) ---
    mask = (jax.random.uniform(k_mask, (B, N)) > 0.2).astype(jnp.float32)
    out_m = jax.block_until_ready(fwd(params, element, charge, adj, None, mask))
    ref_m = gcn_h_4layer_reference(params, element, charge, adj, None, mask)
    assert out_m.shape == (B, 2)
    assert bool(jnp.all(jnp.isfinite(out_m)))
    assert bool(jnp.allclose(jnp.sum(out_m, axis=1), 1.0, atol=1e-5))
    assert bool(jnp.allclose(out_m, ref_m, atol=5e-2)), float(jnp.max(jnp.abs(out_m - ref_m)))

    print("KERNEL_OK")
</pallas_src>

<mosaic_0001>
module attributes {stable_mosaic.version = 11 : i64} {
  func.func @_gcn_h_4layer_kernel(%arg0: i32, %arg1: memref<1x32x1024xbf16, #tpu.memory_space<vmem>>, %arg2: memref<4x256x256xbf16, #tpu.memory_space<vmem>>, %arg3: memref<32x32xbf16, #tpu.memory_space<vmem>>, %arg4: memref<32x1xf32, #tpu.memory_space<vmem>>, %arg5: memref<64x32xbf16, #tpu.memory_space<vmem>>, %arg6: memref<64x1xf32, #tpu.memory_space<vmem>>, %arg7: memref<32x64xbf16, #tpu.memory_space<vmem>>, %arg8: memref<32x1xf32, #tpu.memory_space<vmem>>, %arg9: memref<1x32xbf16, #tpu.memory_space<vmem>>, %arg10: memref<1x1xf32, #tpu.memory_space<vmem>>, %arg11: memref<256x2xf32, #tpu.memory_space<vmem>>, %arg12: memref<1x2xf32, #tpu.memory_space<vmem>>, %arg13: memref<1x4x2xf32, #tpu.memory_space<vmem>>) attributes {dimension_semantics = [#tpu.dimension_semantics<parallel>], iteration_bounds = array<i64: 2>, scalar_prefetch = 0 : i64, scratch_operands = 0 : i64, tpu.core_type = #tpu.core_type<tc>, window_params = [{transform_indices = @transform_0, window_bounds = array<i64: 1, 32, 1024>}, {transform_indices = @transform_1, window_bounds = array<i64: 4, 256, 256>}, {pipeline_mode = #tpu.pipeline_mode<synchronous>, transform_indices = @transform_2, window_bounds = array<i64: 32, 32>}, {pipeline_mode = #tpu.pipeline_mode<synchronous>, transform_indices = @transform_3, window_bounds = array<i64: 32, 1>}, {pipeline_mode = #tpu.pipeline_mode<synchronous>, transform_indices = @transform_4, window_bounds = array<i64: 64, 32>}, {pipeline_mode = #tpu.pipeline_mode<synchronous>, transform_indices = @transform_5, window_bounds = array<i64: 64, 1>}, {pipeline_mode = #tpu.pipeline_mode<synchronous>, transform_indices = @transform_6, window_bounds = array<i64: 32, 64>}, {pipeline_mode = #tpu.pipeline_mode<synchronous>, transform_indices = @transform_7, window_bounds = array<i64: 32, 1>}, {pipeline_mode = #tpu.pipeline_mode<synchronous>, transform_indices = @transform_8, window_bounds = array<i64: 1, 32>}, {pipeline_mode = #tpu.pipeline_mode<synchronous>, transform_indices = @transform_9, window_bounds = array<i64: 1, 1>}, {pipeline_mode = #tpu.pipeline_mode<synchronous>, transform_indices = @transform_10, window_bounds = array<i64: 256, 2>}, {pipeline_mode = #tpu.pipeline_mode<synchronous>, transform_indices = @transform_11, window_bounds = array<i64: 1, 2>}, {transform_indices = @transform_12, window_bounds = array<i64: 1, 4, 2>}]} {
    %c0 = arith.constant 0 : index
    %c0_0 = arith.constant 0 : index
    %c0_1 = arith.constant 0 : index
    %0 = vector.load %arg1[%c0, %c0_0, %c0_1] : memref<1x32x1024xbf16, #tpu.memory_space<vmem>>, vector<1x32x256xbf16>
    %1 = vector.shape_cast %0 : vector<1x32x256xbf16> to vector<32x256xbf16>
    %c0_2 = arith.constant 0 : index
    %c0_3 = arith.constant 0 : index
    %2 = vector.load %arg3[%c0_2, %c0_3] : memref<32x32xbf16, #tpu.memory_space<vmem>>, vector<32x32xbf16>
    %cst = arith.constant dense<0.000000e+00> : vector<32x256xf32>
    %3 = tpu.matmul %2, %1, %cst {dimension_numbers = #tpu.dot_dimension_numbers<[1], [0], [0], [1], [0, 0, 1, 1], [], []>} : vector<32x32xbf16>, vector<32x256xbf16>, vector<32x256xf32> -> vector<32x256xf32>
    %4 = arith.truncf %3 : vector<32x256xf32> to vector<32x256xbf16>
    %c0_4 = arith.constant 0 : index
    %c0_5 = arith.constant 0 : index
    %c0_6 = arith.constant 0 : index
    %5 = vector.load %arg2[%c0_4, %c0_5, %c0_6] : memref<4x256x256xbf16, #tpu.memory_space<vmem>>, vector<1x256x256xbf16>
    %6 = vector.shape_cast %5 : vector<1x256x256xbf16> to vector<256x256xbf16>
    %cst_7 = arith.constant dense<0.000000e+00> : vector<32x256xf32>
    %7 = tpu.matmul %4, %6, %cst_7 {dimension_numbers = #tpu.dot_dimension_numbers<[1], [0], [0], [1], [0, 0, 1, 1], [], []>} : vector<32x256xbf16>, vector<256x256xbf16>, vector<32x256xf32> -> vector<32x256xf32>
    %c0_8 = arith.constant 0 : index
    %c0_9 = arith.constant 0 : index
    %8 = vector.load %arg4[%c0_8, %c0_9] : memref<32x1xf32, #tpu.memory_space<vmem>>, vector<32x1xf32>
    %9 = vector.broadcast %8 : vector<32x1xf32> to vector<32x256xf32>
    %10 = arith.addf %7, %9 : vector<32x256xf32>
    %cst_10 = arith.constant 0.000000e+00 : f32
    %11 = vector.broadcast %cst_10 : f32 to vector<32x256xf32>
    %12 = arith.maximumf %10, %11 : vector<32x256xf32>
    %13 = arith.truncf %12 : vector<32x256xf32> to vector<32x256xbf16>
    %c0_11 = arith.constant 0 : index
    %c0_12 = arith.constant 0 : index
    %14 = vector.load %arg5[%c0_11, %c0_12] : memref<64x32xbf16, #tpu.memory_space<vmem>>, vector<64x32xbf16>
    %cst_13 = arith.constant dense<0.000000e+00> : vector<64x256xf32>
    %15 = tpu.matmul %14, %13, %cst_13 {dimension_numbers = #tpu.dot_dimension_numbers<[1], [0], [0], [1], [0, 0, 1, 1], [], []>} : vector<64x32xbf16>, vector<32x256xbf16>, vector<64x256xf32> -> vector<64x256xf32>
    %16 = arith.truncf %15 : vector<64x256xf32> to vector<64x256xbf16>
    %c0_14 = arith.constant 0 : index
    %c0_15 = arith.constant 0 : index
    %c0_16 = arith.constant 0 : index
    %17 = vector.load %arg2[%c0_14, %c0_15, %c0_16] : memref<4x256x256xbf16, #tpu.memory_space<vmem>>, vector<1x256x256xbf16>
    %18 = vector.shape_cast %17 : vector<1x256x256xbf16> to vector<256x256xbf16>
    %cst_17 = arith.constant dense<0.000000e+00> : vector<64x256xf32>
    %19 = tpu.matmul %16, %18, %cst_17 {dimension_numbers = #tpu.dot_dimension_numbers<[1], [0], [0], [1], [0, 0, 1, 1], [], []>} : vector<64x256xbf16>, vector<256x256xbf16>, vector<64x256xf32> -> vector<64x256xf32>
    %c0_18 = arith.constant 0 : index
    %c0_19 = arith.constant 0 : index
    %20 = vector.load %arg6[%c0_18, %c0_19] : memref<64x1xf32, #tpu.memory_space<vmem>>, vector<64x1xf32>
    %21 = vector.broadcast %20 : vector<64x1xf32> to vector<64x256xf32>
    %22 = arith.addf %19, %21 : vector<64x256xf32>
    %cst_20 = arith.constant 0.000000e+00 : f32
    %23 = vector.broadcast %cst_20 : f32 to vector<64x256xf32>
    %24 = arith.maximumf %22, %23 : vector<64x256xf32>
    %25 = arith.truncf %24 : vector<64x256xf32> to vector<64x256xbf16>
    %c0_21 = arith.constant 0 : index
    %c0_22 = arith.constant 0 : index
    %26 = vector.load %arg7[%c0_21, %c0_22] : memref<32x64xbf16, #tpu.memory_space<vmem>>, vector<32x64xbf16>
    %cst_23 = arith.constant dense<0.000000e+00> : vector<32x256xf32>
    %27 = tpu.matmul %26, %25, %cst_23 {dimension_numbers = #tpu.dot_dimension_numbers<[1], [0], [0], [1], [0, 0, 1, 1], [], []>} : vector<32x64xbf16>, vector<64x256xbf16>, vector<32x256xf32> -> vector<32x256xf32>
    %28 = arith.truncf %27 : vector<32x256xf32> to vector<32x256xbf16>
    %c0_24 = arith.constant 0 : index
    %c0_25 = arith.constant 0 : index
    %c0_26 = arith.constant 0 : index
    %29 = vector.load %arg2[%c0_24, %c0_25, %c0_26] : memref<4x256x256xbf16, #tpu.memory_space<vmem>>, vector<1x256x256xbf16>
    %30 = vector.shape_cast %29 : vector<1x256x256xbf16> to vector<256x256xbf16>
    %cst_27 = arith.constant dense<0.000000e+00> : vector<32x256xf32>
    %31 = tpu.matmul %28, %30, %cst_27 {dimension_numbers = #tpu.dot_dimension_numbers<[1], [0], [0], [1], [0, 0, 1, 1], [], []>} : vector<32x256xbf16>, vector<256x256xbf16>, vector<32x256xf32> -> vector<32x256xf32>
    %c0_28 = arith.constant 0 : index
    %c0_29 = arith.constant 0 : index
    %32 = vector.load %arg8[%c0_28, %c0_29] : memref<32x1xf32, #tpu.memory_space<vmem>>, vector<32x1xf32>
    %33 = vector.broadcast %32 : vector<32x1xf32> to vector<32x256xf32>
    %34 = arith.addf %31, %33 : vector<32x256xf32>
    %cst_30 = arith.constant 0.000000e+00 : f32
    %35 = vector.broadcast %cst_30 : f32 to vector<32x256xf32>
    %36 = arith.maximumf %34, %35 : vector<32x256xf32>
    %37 = arith.truncf %36 : vector<32x256xf32> to vector<32x256xbf16>
    %c0_31 = arith.constant 0 : index
    %c0_32 = arith.constant 0 : index
    %38 = vector.load %arg9[%c0_31, %c0_32] : memref<1x32xbf16, #tpu.memory_space<vmem>>, vector<1x32xbf16>
    %cst_33 = arith.constant dense<0.000000e+00> : vector<1x256xf32>
    %39 = tpu.matmul %38, %37, %cst_33 {dimension_numbers = #tpu.dot_dimension_numbers<[1], [0], [0], [1], [0, 0, 1, 1], [], []>} : vector<1x32xbf16>, vector<32x256xbf16>, vector<1x256xf32> -> vector<1x256xf32>
    %40 = arith.truncf %39 : vector<1x256xf32> to vector<1x256xbf16>
    %c0_34 = arith.constant 0 : index
    %c0_35 = arith.constant 0 : index
    %c0_36 = arith.constant 0 : index
    %41 = vector.load %arg2[%c0_34, %c0_35, %c0_36] : memref<4x256x256xbf16, #tpu.memory_space<vmem>>, vector<1x256x256xbf16>
    %42 = vector.shape_cast %41 : vector<1x256x256xbf16> to vector<256x256xbf16>
    %cst_37 = arith.constant dense<0.000000e+00> : vector<1x256xf32>
    %43 = tpu.matmul %40, %42, %cst_37 {dimension_numbers = #tpu.dot_dimension_numbers<[1], [0], [0], [1], [0, 0, 1, 1], [], []>} : vector<1x256xbf16>, vector<256x256xbf16>, vector<1x256xf32> -> vector<1x256xf32>
    %c0_38 = arith.constant 0 : index
    %c0_39 = arith.constant 0 : index
    %44 = vector.load %arg10[%c0_38, %c0_39] : memref<1x1xf32, #tpu.memory_space<vmem>>, vector<1x1xf32>
    %45 = vector.broadcast %44 : vector<1x1xf32> to vector<1x256xf32>
    %46 = arith.addf %43, %45 : vector<1x256xf32>
    %c0_40 = arith.constant 0 : index
    %c0_41 = arith.constant 0 : index
    %c256 = arith.constant 256 : index
    %47 = vector.load %arg1[%c0_40, %c0_41, %c256] : memref<1x32x1024xbf16, #tpu.memory_space<vmem>>, vector<1x32x256xbf16>
    %48 = vector.shape_cast %47 : vector<1x32x256xbf16> to vector<32x256xbf16>
    %c0_42 = arith.constant 0 : index
    %c0_43 = arith.constant 0 : index
    %49 = vector.load %arg3[%c0_42, %c0_43] : memref<32x32xbf16, #tpu.memory_space<vmem>>, vector<32x32xbf16>
    %cst_44 = arith.constant dense<0.000000e+00> : vector<32x256xf32>
    %50 = tpu.matmul %49, %48, %cst_44 {dimension_numbers = #tpu.dot_dimension_numbers<[1], [0], [0], [1], [0, 0, 1, 1], [], []>} : vector<32x32xbf16>, vector<32x256xbf16>, vector<32x256xf32> -> vector<32x256xf32>
    %51 = arith.truncf %50 : vector<32x256xf32> to vector<32x256xbf16>
    %c1 = arith.constant 1 : index
    %c0_45 = arith.constant 0 : index
    %c0_46 = arith.constant 0 : index
    %52 = vector.load %arg2[%c1, %c0_45, %c0_46] : memref<4x256x256xbf16, #tpu.memory_space<vmem>>, vector<1x256x256xbf16>
    %53 = vector.shape_cast %52 : vector<1x256x256xbf16> to vector<256x256xbf16>
    %cst_47 = arith.constant dense<0.000000e+00> : vector<32x256xf32>
    %54 = tpu.matmul %51, %53, %cst_47 {dimension_numbers = #tpu.dot_dimension_numbers<[1], [0], [0], [1], [0, 0, 1, 1], [], []>} : vector<32x256xbf16>, vector<256x256xbf16>, vector<32x256xf32> -> vector<32x256xf32>
    %c0_48 = arith.constant 0 : index
    %c0_49 = arith.constant 0 : index
    %55 = vector.load %arg4[%c0_48, %c0_49] : memref<32x1xf32, #tpu.memory_space<vmem>>, vector<32x1xf32>
    %56 = vector.broadcast %55 : vector<32x1xf32> to vector<32x256xf32>
    %57 = arith.addf %54, %56 : vector<32x256xf32>
    %cst_50 = arith.constant 0.000000e+00 : f32
    %58 = vector.broadcast %cst_50 : f32 to vector<32x256xf32>
    %59 = arith.maximumf %57, %58 : vector<32x256xf32>
    %60 = arith.truncf %59 : vector<32x256xf32> to vector<32x256xbf16>
    %c0_51 = arith.constant 0 : index
    %c0_52 = arith.constant 0 : index
    %61 = vector.load %arg5[%c0_51, %c0_52] : memref<64x32xbf16, #tpu.memory_space<vmem>>, vector<64x32xbf16>
    %cst_53 = arith.constant dense<0.000000e+00> : vector<64x256xf32>
    %62 = tpu.matmul %61, %60, %cst_53 {dimension_numbers = #tpu.dot_dimension_numbers<[1], [0], [0], [1], [0, 0, 1, 1], [], []>} : vector<64x32xbf16>, vector<32x256xbf16>, vector<64x256xf32> -> vector<64x256xf32>
    %63 = arith.truncf %62 : vector<64x256xf32> to vector<64x256xbf16>
    %c1_54 = arith.constant 1 : index
    %c0_55 = arith.constant 0 : index
    %c0_56 = arith.constant 0 : index
    %64 = vector.load %arg2[%c1_54, %c0_55, %c0_56] : memref<4x256x256xbf16, #tpu.memory_space<vmem>>, vector<1x256x256xbf16>
    %65 = vector.shape_cast %64 : vector<1x256x256xbf16> to vector<256x256xbf16>
    %cst_57 = arith.constant dense<0.000000e+00> : vector<64x256xf32>
    %66 = tpu.matmul %63, %65, %cst_57 {dimension_numbers = #tpu.dot_dimension_numbers<[1], [0], [0], [1], [0, 0, 1, 1], [], []>} : vector<64x256xbf16>, vector<256x256xbf16>, vector<64x256xf32> -> vector<64x256xf32>
    %c0_58 = arith.constant 0 : index
    %c0_59 = arith.constant 0 : index
    %67 = vector.load %arg6[%c0_58, %c0_59] : memref<64x1xf32, #tpu.memory_space<vmem>>, vector<64x1xf32>
    %68 = vector.broadcast %67 : vector<64x1xf32> to vector<64x256xf32>
    %69 = arith.addf %66, %68 : vector<64x256xf32>
    %cst_60 = arith.constant 0.000000e+00 : f32
    %70 = vector.broadcast %cst_60 : f32 to vector<64x256xf32>
    %71 = arith.maximumf %69, %70 : vector<64x256xf32>
    %72 = arith.truncf %71 : vector<64x256xf32> to vector<64x256xbf16>
    %c0_61 = arith.constant 0 : index
    %c0_62 = arith.constant 0 : index
    %73 = vector.load %arg7[%c0_61, %c0_62] : memref<32x64xbf16, #tpu.memory_space<vmem>>, vector<32x64xbf16>
    %cst_63 = arith.constant dense<0.000000e+00> : vector<32x256xf32>
    %74 = tpu.matmul %73, %72, %cst_63 {dimension_numbers = #tpu.dot_dimension_numbers<[1], [0], [0], [1], [0, 0, 1, 1], [], []>} : vector<32x64xbf16>, vector<64x256xbf16>, vector<32x256xf32> -> vector<32x256xf32>
    %75 = arith.truncf %74 : vector<32x256xf32> to vector<32x256xbf16>
    %c1_64 = arith.constant 1 : index
    %c0_65 = arith.constant 0 : index
    %c0_66 = arith.constant 0 : index
    %76 = vector.load %arg2[%c1_64, %c0_65, %c0_66] : memref<4x256x256xbf16, #tpu.memory_space<vmem>>, vector<1x256x256xbf16>
    %77 = vector.shape_cast %76 : vector<1x256x256xbf16> to vector<256x256xbf16>
    %cst_67 = arith.constant dense<0.000000e+00> : vector<32x256xf32>
    %78 = tpu.matmul %75, %77, %cst_67 {dimension_numbers = #tpu.dot_dimension_numbers<[1], [0], [0], [1], [0, 0, 1, 1], [], []>} : vector<32x256xbf16>, vector<256x256xbf16>, vector<32x256xf32> -> vector<32x256xf32>
    %c0_68 = arith.constant 0 : index
    %c0_69 = arith.constant 0 : index
    %79 = vector.load %arg8[%c0_68, %c0_69] : memref<32x1xf32, #tpu.memory_space<vmem>>, vector<32x1xf32>
    %80 = vector.broadcast %79 : vector<32x1xf32> to vector<32x256xf32>
    %81 = arith.addf %78, %80 : vector<32x256xf32>
    %cst_70 = arith.constant 0.000000e+00 : f32
    %82 = vector.broadcast %cst_70 : f32 to vector<32x256xf32>
    %83 = arith.maximumf %81, %82 : vector<32x256xf32>
    %84 = arith.truncf %83 : vector<32x256xf32> to vector<32x256xbf16>
    %c0_71 = arith.constant 0 : index
    %c0_72 = arith.constant 0 : index
    %85 = vector.load %arg9[%c0_71, %c0_72] : memref<1x32xbf16, #tpu.memory_space<vmem>>, vector<1x32xbf16>
    %cst_73 = arith.constant dense<0.000000e+00> : vector<1x256xf32>
    %86 = tpu.matmul %85, %84, %cst_73 {dimension_numbers = #tpu.dot_dimension_numbers<[1], [0], [0], [1], [0, 0, 1, 1], [], []>} : vector<1x32xbf16>, vector<32x256xbf16>, vector<1x256xf32> -> vector<1x256xf32>
    %87 = arith.truncf %86 : vector<1x256xf32> to vector<1x256xbf16>
    %c1_74 = arith.constant 1 : index
    %c0_75 = arith.constant 0 : index
    %c0_76 = arith.constant 0 : index
    %88 = vector.load %arg2[%c1_74, %c0_75, %c0_76] : memref<4x256x256xbf16, #tpu.memory_space<vmem>>, vector<1x256x256xbf16>
    %89 = vector.shape_cast %88 : vector<1x256x256xbf16> to vector<256x256xbf16>
    %cst_77 = arith.constant dense<0.000000e+00> : vector<1x256xf32>
    %90 = tpu.matmul %87, %89, %cst_77 {dimension_numbers = #tpu.dot_dimension_numbers<[1], [0], [0], [1], [0, 0, 1, 1], [], []>} : vector<1x256xbf16>, vector<256x256xbf16>, vector<1x256xf32> -> vector<1x256xf32>
    %c0_78 = arith.constant 0 : index
    %c0_79 = arith.constant 0 : index
    %91 = vector.load %arg10[%c0_78, %c0_79] : memref<1x1xf32, #tpu.memory_space<vmem>>, vector<1x1xf32>
    %92 = vector.broadcast %91 : vector<1x1xf32> to vector<1x256xf32>
    %93 = arith.addf %90, %92 : vector<1x256xf32>
    %c0_80 = arith.constant 0 : index
    %c0_81 = arith.constant 0 : index
    %c512 = arith.constant 512 : index
    %94 = vector.load %arg1[%c0_80, %c0_81, %c512] : memref<1x32x1024xbf16, #tpu.memory_space<vmem>>, vector<1x32x256xbf16>
    %95 = vector.shape_cast %94 : vector<1x32x256xbf16> to vector<32x256xbf16>
    %c0_82 = arith.constant 0 : index
    %c0_83 = arith.constant 0 : index
    %96 = vector.load %arg3[%c0_82, %c0_83] : memref<32x32xbf16, #tpu.memory_space<vmem>>, vector<32x32xbf16>
    %cst_84 = arith.constant dense<0.000000e+00> : vector<32x256xf32>
    %97 = tpu.matmul %96, %95, %cst_84 {dimension_numbers = #tpu.dot_dimension_numbers<[1], [0], [0], [1], [0, 0, 1, 1], [], []>} : vector<32x32xbf16>, vector<32x256xbf16>, vector<32x256xf32> -> vector<32x256xf32>
    %98 = arith.truncf %97 : vector<32x256xf32> to vector<32x256xbf16>
    %c2 = arith.constant 2 : index
    %c0_85 = arith.constant 0 : index
    %c0_86 = arith.constant 0 : index
    %99 = vector.load %arg2[%c2, %c0_85, %c0_86] : memref<4x256x256xbf16, #tpu.memory_space<vmem>>, vector<1x256x256xbf16>
    %100 = vector.shape_cast %99 : vector<1x256x256xbf16> to vector<256x256xbf16>
    %cst_87 = arith.constant dense<0.000000e+00> : vector<32x256xf32>
    %101 = tpu.matmul %98, %100, %cst_87 {dimension_numbers = #tpu.dot_dimension_numbers<[1], [0], [0], [1], [0, 0, 1, 1], [], []>} : vector<32x256xbf16>, vector<256x256xbf16>, vector<32x256xf32> -> vector<32x256xf32>
    %c0_88 = arith.constant 0 : index
    %c0_89 = arith.constant 0 : index
    %102 = vector.load %arg4[%c0_88, %c0_89] : memref<32x1xf32, #tpu.memory_space<vmem>>, vector<32x1xf32>
    %103 = vector.broadcast %102 : vector<32x1xf32> to vector<32x256xf32>
    %104 = arith.addf %101, %103 : vector<32x256xf32>
    %cst_90 = arith.constant 0.000000e+00 : f32
    %105 = vector.broadcast %cst_90 : f32 to vector<32x256xf32>
    %106 = arith.maximumf %104, %105 : vector<32x256xf32>
    %107 = arith.truncf %106 : vector<32x256xf32> to vector<32x256xbf16>
    %c0_91 = arith.constant 0 : index
    %c0_92 = arith.constant 0 : index
    %108 = vector.load %arg5[%c0_91, %c0_92] : memref<64x32xbf16, #tpu.memory_space<vmem>>, vector<64x32xbf16>
    %cst_93 = arith.constant dense<0.000000e+00> : vector<64x256xf32>
    %109 = tpu.matmul %108, %107, %cst_93 {dimension_numbers = #tpu.dot_dimension_numbers<[1], [0], [0], [1], [0, 0, 1, 1], [], []>} : vector<64x32xbf16>, vector<32x256xbf16>, vector<64x256xf32> -> vector<64x256xf32>
    %110 = arith.truncf %109 : vector<64x256xf32> to vector<64x256xbf16>
    %c2_94 = arith.constant 2 : index
    %c0_95 = arith.constant 0 : index
    %c0_96 = arith.constant 0 : index
    %111 = vector.load %arg2[%c2_94, %c0_95, %c0_96] : memref<4x256x256xbf16, #tpu.memory_space<vmem>>, vector<1x256x256xbf16>
    %112 = vector.shape_cast %111 : vector<1x256x256xbf16> to vector<256x256xbf16>
    %cst_97 = arith.constant dense<0.000000e+00> : vector<64x256xf32>
    %113 = tpu.matmul %110, %112, %cst_97 {dimension_numbers = #tpu.dot_dimension_numbers<[1], [0], [0], [1], [0, 0, 1, 1], [], []>} : vector<64x256xbf16>, vector<256x256xbf16>, vector<64x256xf32> -> vector<64x256xf32>
    %c0_98 = arith.constant 0 : index
    %c0_99 = arith.constant 0 : index
    %114 = vector.load %arg6[%c0_98, %c0_99] : memref<64x1xf32, #tpu.memory_space<vmem>>, vector<64x1xf32>
    %115 = vector.broadcast %114 : vector<64x1xf32> to vector<64x256xf32>
    %116 = arith.addf %113, %115 : vector<64x256xf32>
    %cst_100 = arith.constant 0.000000e+00 : f32
    %117 = vector.broadcast %cst_100 : f32 to vector<64x256xf32>
    %118 = arith.maximumf %116, %117 : vector<64x256xf32>
    %119 = arith.truncf %118 : vector<64x256xf32> to vector<64x256xbf16>
    %c0_101 = arith.constant 0 : index
    %c0_102 = arith.constant 0 : index
    %120 = vector.load %arg7[%c0_101, %c0_102] : memref<32x64xbf16, #tpu.memory_space<vmem>>, vector<32x64xbf16>
    %cst_103 = arith.constant dense<0.000000e+00> : vector<32x256xf32>
    %121 = tpu.matmul %120, %119, %cst_103 {dimension_numbers = #tpu.dot_dimension_numbers<[1], [0], [0], [1], [0, 0, 1, 1], [], []>} : vector<32x64xbf16>, vector<64x256xbf16>, vector<32x256xf32> -> vector<32x256xf32>
    %122 = arith.truncf %121 : vector<32x256xf32> to vector<32x256xbf16>
    %c2_104 = arith.constant 2 : index
    %c0_105 = arith.constant 0 : index
    %c0_106 = arith.constant 0 : index
    %123 = vector.load %arg2[%c2_104, %c0_105, %c0_106] : memref<4x256x256xbf16, #tpu.memory_space<vmem>>, vector<1x256x256xbf16>
    %124 = vector.shape_cast %123 : vector<1x256x256xbf16> to vector<256x256xbf16>
    %cst_107 = arith.constant dense<0.000000e+00> : vector<32x256xf32>
    %125 = tpu.matmul %122, %124, %cst_107 {dimension_numbers = #tpu.dot_dimension_numbers<[1], [0], [0], [1], [0, 0, 1, 1], [], []>} : vector<32x256xbf16>, vector<256x256xbf16>, vector<32x256xf32> -> vector<32x256xf32>
    %c0_108 = arith.constant 0 : index
    %c0_109 = arith.constant 0 : index
    %126 = vector.load %arg8[%c0_108, %c0_109] : memref<32x1xf32, #tpu.memory_space<vmem>>, vector<32x1xf32>
    %127 = vector.broadcast %126 : vector<32x1xf32> to vector<32x256xf32>
    %128 = arith.addf %125, %127 : vector<32x256xf32>
    %cst_110 = arith.constant 0.000000e+00 : f32
    %129 = vector.broadcast %cst_110 : f32 to vector<32x256xf32>
    %130 = arith.maximumf %128, %129 : vector<32x256xf32>
    %131 = arith.truncf %130 : vector<32x256xf32> to vector<32x256xbf16>
    %c0_111 = arith.constant 0 : index
    %c0_112 = arith.constant 0 : index
    %132 = vector.load %arg9[%c0_111, %c0_112] : memref<1x32xbf16, #tpu.memory_space<vmem>>, vector<1x32xbf16>
    %cst_113 = arith.constant dense<0.000000e+00> : vector<1x256xf32>
    %133 = tpu.matmul %132, %131, %cst_113 {dimension_numbers = #tpu.dot_dimension_numbers<[1], [0], [0], [1], [0, 0, 1, 1], [], []>} : vector<1x32xbf16>, vector<32x256xbf16>, vector<1x256xf32> -> vector<1x256xf32>
    %134 = arith.truncf %133 : vector<1x256xf32> to vector<1x256xbf16>
    %c2_114 = arith.constant 2 : index
    %c0_115 = arith.constant 0 : index
    %c0_116 = arith.constant 0 : index
    %135 = vector.load %arg2[%c2_114, %c0_115, %c0_116] : memref<4x256x256xbf16, #tpu.memory_space<vmem>>, vector<1x256x256xbf16>
    %136 = vector.shape_cast %135 : vector<1x256x256xbf16> to vector<256x256xbf16>
    %cst_117 = arith.constant dense<0.000000e+00> : vector<1x256xf32>
    %137 = tpu.matmul %134, %136, %cst_117 {dimension_numbers = #tpu.dot_dimension_numbers<[1], [0], [0], [1], [0, 0, 1, 1], [], []>} : vector<1x256xbf16>, vector<256x256xbf16>, vector<1x256xf32> -> vector<1x256xf32>
    %c0_118 = arith.constant 0 : index
    %c0_119 = arith.constant 0 : index
    %138 = vector.load %arg10[%c0_118, %c0_119] : memref<1x1xf32, #tpu.memory_space<vmem>>, vector<1x1xf32>
    %139 = vector.broadcast %138 : vector<1x1xf32> to vector<1x256xf32>
    %140 = arith.addf %137, %139 : vector<1x256xf32>
    %c0_120 = arith.constant 0 : index
    %c0_121 = arith.constant 0 : index
    %c768 = arith.constant 768 : index
    %141 = vector.load %arg1[%c0_120, %c0_121, %c768] : memref<1x32x1024xbf16, #tpu.memory_space<vmem>>, vector<1x32x256xbf16>
    %142 = vector.shape_cast %141 : vector<1x32x256xbf16> to vector<32x256xbf16>
    %c0_122 = arith.constant 0 : index
    %c0_123 = arith.constant 0 : index
    %143 = vector.load %arg3[%c0_122, %c0_123] : memref<32x32xbf16, #tpu.memory_space<vmem>>, vector<32x32xbf16>
    %cst_124 = arith.constant dense<0.000000e+00> : vector<32x256xf32>
    %144 = tpu.matmul %143, %142, %cst_124 {dimension_numbers = #tpu.dot_dimension_numbers<[1], [0], [0], [1], [0, 0, 1, 1], [], []>} : vector<32x32xbf16>, vector<32x256xbf16>, vector<32x256xf32> -> vector<32x256xf32>
    %145 = arith.truncf %144 : vector<32x256xf32> to vector<32x256xbf16>
    %c3 = arith.constant 3 : index
    %c0_125 = arith.constant 0 : index
    %c0_126 = arith.constant 0 : index
    %146 = vector.load %arg2[%c3, %c0_125, %c0_126] : memref<4x256x256xbf16, #tpu.memory_space<vmem>>, vector<1x256x256xbf16>
    %147 = vector.shape_cast %146 : vector<1x256x256xbf16> to vector<256x256xbf16>
    %cst_127 = arith.constant dense<0.000000e+00> : vector<32x256xf32>
    %148 = tpu.matmul %145, %147, %cst_127 {dimension_numbers = #tpu.dot_dimension_numbers<[1], [0], [0], [1], [0, 0, 1, 1], [], []>} : vector<32x256xbf16>, vector<256x256xbf16>, vector<32x256xf32> -> vector<32x256xf32>
    %c0_128 = arith.constant 0 : index
    %c0_129 = arith.constant 0 : index
    %149 = vector.load %arg4[%c0_128, %c0_129] : memref<32x1xf32, #tpu.memory_space<vmem>>, vector<32x1xf32>
    %150 = vector.broadcast %149 : vector<32x1xf32> to vector<32x256xf32>
    %151 = arith.addf %148, %150 : vector<32x256xf32>
    %cst_130 = arith.constant 0.000000e+00 : f32
    %152 = vector.broadcast %cst_130 : f32 to vector<32x256xf32>
    %153 = arith.maximumf %151, %152 : vector<32x256xf32>
    %154 = arith.truncf %153 : vector<32x256xf32> to vector<32x256xbf16>
    %c0_131 = arith.constant 0 : index
    %c0_132 = arith.constant 0 : index
    %155 = vector.load %arg5[%c0_131, %c0_132] : memref<64x32xbf16, #tpu.memory_space<vmem>>, vector<64x32xbf16>
    %cst_133 = arith.constant dense<0.000000e+00> : vector<64x256xf32>
    %156 = tpu.matmul %155, %154, %cst_133 {dimension_numbers = #tpu.dot_dimension_numbers<[1], [0], [0], [1], [0, 0, 1, 1], [], []>} : vector<64x32xbf16>, vector<32x256xbf16>, vector<64x256xf32> -> vector<64x256xf32>
    %157 = arith.truncf %156 : vector<64x256xf32> to vector<64x256xbf16>
    %c3_134 = arith.constant 3 : index
    %c0_135 = arith.constant 0 : index
    %c0_136 = arith.constant 0 : index
    %158 = vector.load %arg2[%c3_134, %c0_135, %c0_136] : memref<4x256x256xbf16, #tpu.memory_space<vmem>>, vector<1x256x256xbf16>
    %159 = vector.shape_cast %158 : vector<1x256x256xbf16> to vector<256x256xbf16>
    %cst_137 = arith.constant dense<0.000000e+00> : vector<64x256xf32>
    %160 = tpu.matmul %157, %159, %cst_137 {dimension_numbers = #tpu.dot_dimension_numbers<[1], [0], [0], [1], [0, 0, 1, 1], [], []>} : vector<64x256xbf16>, vector<256x256xbf16>, vector<64x256xf32> -> vector<64x256xf32>
    %c0_138 = arith.constant 0 : index
    %c0_139 = arith.constant 0 : index
    %161 = vector.load %arg6[%c0_138, %c0_139] : memref<64x1xf32, #tpu.memory_space<vmem>>, vector<64x1xf32>
    %162 = vector.broadcast %161 : vector<64x1xf32> to vector<64x256xf32>
    %163 = arith.addf %160, %162 : vector<64x256xf32>
    %cst_140 = arith.constant 0.000000e+00 : f32
    %164 = vector.broadcast %cst_140 : f32 to vector<64x256xf32>
    %165 = arith.maximumf %163, %164 : vector<64x256xf32>
    %166 = arith.truncf %165 : vector<64x256xf32> to vector<64x256xbf16>
    %c0_141 = arith.constant 0 : index
    %c0_142 = arith.constant 0 : index
    %167 = vector.load %arg7[%c0_141, %c0_142] : memref<32x64xbf16, #tpu.memory_space<vmem>>, vector<32x64xbf16>
    %cst_143 = arith.constant dense<0.000000e+00> : vector<32x256xf32>
    %168 = tpu.matmul %167, %166, %cst_143 {dimension_numbers = #tpu.dot_dimension_numbers<[1], [0], [0], [1], [0, 0, 1, 1], [], []>} : vector<32x64xbf16>, vector<64x256xbf16>, vector<32x256xf32> -> vector<32x256xf32>
    %169 = arith.truncf %168 : vector<32x256xf32> to vector<32x256xbf16>
    %c3_144 = arith.constant 3 : index
    %c0_145 = arith.constant 0 : index
    %c0_146 = arith.constant 0 : index
    %170 = vector.load %arg2[%c3_144, %c0_145, %c0_146] : memref<4x256x256xbf16, #tpu.memory_space<vmem>>, vector<1x256x256xbf16>
    %171 = vector.shape_cast %170 : vector<1x256x256xbf16> to vector<256x256xbf16>
    %cst_147 = arith.constant dense<0.000000e+00> : vector<32x256xf32>
    %172 = tpu.matmul %169, %171, %cst_147 {dimension_numbers = #tpu.dot_dimension_numbers<[1], [0], [0], [1], [0, 0, 1, 1], [], []>} : vector<32x256xbf16>, vector<256x256xbf16>, vector<32x256xf32> -> vector<32x256xf32>
    %c0_148 = arith.constant 0 : index
    %c0_149 = arith.constant 0 : index
    %173 = vector.load %arg8[%c0_148, %c0_149] : memref<32x1xf32, #tpu.memory_space<vmem>>, vector<32x1xf32>
    %174 = vector.broadcast %173 : vector<32x1xf32> to vector<32x256xf32>
    %175 = arith.addf %172, %174 : vector<32x256xf32>
    %cst_150 = arith.constant 0.000000e+00 : f32
    %176 = vector.broadcast %cst_150 : f32 to vector<32x256xf32>
    %177 = arith.maximumf %175, %176 : vector<32x256xf32>
    %178 = arith.truncf %177 : vector<32x256xf32> to vector<32x256xbf16>
    %c0_151 = arith.constant 0 : index
    %c0_152 = arith.constant 0 : index
    %179 = vector.load %arg9[%c0_151, %c0_152] : memref<1x32xbf16, #tpu.memory_space<vmem>>, vector<1x32xbf16>
    %cst_153 = arith.constant dense<0.000000e+00> : vector<1x256xf32>
    %180 = tpu.matmul %179, %178, %cst_153 {dimension_numbers = #tpu.dot_dimension_numbers<[1], [0], [0], [1], [0, 0, 1, 1], [], []>} : vector<1x32xbf16>, vector<32x256xbf16>, vector<1x256xf32> -> vector<1x256xf32>
    %181 = arith.truncf %180 : vector<1x256xf32> to vector<1x256xbf16>
    %c3_154 = arith.constant 3 : index
    %c0_155 = arith.constant 0 : index
    %c0_156 = arith.constant 0 : index
    %182 = vector.load %arg2[%c3_154, %c0_155, %c0_156] : memref<4x256x256xbf16, #tpu.memory_space<vmem>>, vector<1x256x256xbf16>
    %183 = vector.shape_cast %182 : vector<1x256x256xbf16> to vector<256x256xbf16>
    %cst_157 = arith.constant dense<0.000000e+00> : vector<1x256xf32>
    %184 = tpu.matmul %181, %183, %cst_157 {dimension_numbers = #tpu.dot_dimension_numbers<[1], [0], [0], [1], [0, 0, 1, 1], [], []>} : vector<1x256xbf16>, vector<256x256xbf16>, vector<1x256xf32> -> vector<1x256xf32>
    %c0_158 = arith.constant 0 : index
    %c0_159 = arith.constant 0 : index
    %185 = vector.load %arg10[%c0_158, %c0_159] : memref<1x1xf32, #tpu.memory_space<vmem>>, vector<1x1xf32>
    %186 = vector.broadcast %185 : vector<1x1xf32> to vector<1x256xf32>
    %187 = arith.addf %184, %186 : vector<1x256xf32>
    %188 = tpu.concatenate %46, %93, %140, %187 in 0 : vector<1x256xf32>, vector<1x256xf32>, vector<1x256xf32>, vector<1x256xf32> -> vector<4x256xf32>
    %c0_160 = arith.constant 0 : index
    %c0_161 = arith.constant 0 : index
    %189 = vector.load %arg11[%c0_160, %c0_161] : memref<256x2xf32, #tpu.memory_space<vmem>>, vector<256x2xf32>
    %cst_162 = arith.constant dense<0.000000e+00> : vector<4x2xf32>
    %190 = tpu.matmul %188, %189, %cst_162 {dimension_numbers = #tpu.dot_dimension_numbers<[1], [0], [0], [1], [0, 0, 1, 1], [], []>} : vector<4x256xf32>, vector<256x2xf32>, vector<4x2xf32> -> vector<4x2xf32>
    %c0_163 = arith.constant 0 : index
    %c0_164 = arith.constant 0 : index
    %191 = vector.load %arg12[%c0_163, %c0_164] : memref<1x2xf32, #tpu.memory_space<vmem>>, vector<1x2xf32>
    %192 = vector.broadcast %191 : vector<1x2xf32> to vector<4x2xf32>
    %193 = arith.addf %190, %192 : vector<4x2xf32>
    %cst_165 = arith.constant dense<0xFF800000> : vector<4xf32>
    %194 = vector.multi_reduction <maximumf>, %193, %cst_165 [1] : vector<4x2xf32> to vector<4xf32>
    %195 = vector.shape_cast %194 : vector<4xf32> to vector<4x1xf32>
    %196 = vector.broadcast %195 : vector<4x1xf32> to vector<4x2xf32>
    %197 = arith.subf %193, %196 : vector<4x2xf32>
    %198 = math.exp %197 : vector<4x2xf32>
    %cst_166 = arith.constant dense<0.000000e+00> : vector<4xf32>
    %199 = vector.multi_reduction <add>, %198, %cst_166 [1] : vector<4x2xf32> to vector<4xf32>
    %200 = vector.shape_cast %199 : vector<4xf32> to vector<4x1xf32>
    %201 = vector.broadcast %200 : vector<4x1xf32> to vector<4x2xf32>
    %202 = arith.divf %198, %201 : vector<4x2xf32>
    %c0_167 = arith.constant 0 : index
    %c0_168 = arith.constant 0 : index
    %c0_169 = arith.constant 0 : index
    %203 = vector.load %arg13[%c0_167, %c0_168, %c0_169] : memref<1x4x2xf32, #tpu.memory_space<vmem>>, vector<1x4x2xf32>
    %204 = vector.shape_cast %203 : vector<1x4x2xf32> to vector<4x2xf32>
    %205 = vector.shape_cast %202 : vector<4x2xf32> to vector<1x4x2xf32>
    tpu.vector_store %arg13[%c0_167, %c0_168, %c0_169], %205 {strides = array<i32>} : memref<1x4x2xf32, #tpu.memory_space<vmem>>, vector<1x4x2xf32>,
    return
  }
  func.func @transform_0(%arg0: i32) -> (i32, i32, i32) {
    %c0_i32 = arith.constant 0 : i32
    %c0_i32_0 = arith.constant 0 : i32
    %c0_i32_1 = arith.constant 0 : i32
    return %arg0, %c0_i32, %c0_i32_0 : i32, i32, i32
  }
  func.func @transform_1(%arg0: i32) -> (i32, i32, i32) {
    %c0_i32 = arith.constant 0 : i32
    %c0_i32_0 = arith.constant 0 : i32
    %c0_i32_1 = arith.constant 0 : i32
    return %arg0, %c0_i32, %c0_i32_0 : i32, i32, i32
  }
  func.func @transform_2(%arg0: i32) -> (i32, i32) {
    %c0_i32 = arith.constant 0 : i32
    %c0_i32_0 = arith.constant 0 : i32
    %c0_i32_1 = arith.constant 0 : i32
    return %c0_i32, %c0_i32_0 : i32, i32
  }
  func.func @transform_3(%arg0: i32) -> (i32, i32) {
    %c0_i32 = arith.constant 0 : i32
    %c0_i32_0 = arith.constant 0 : i32
    %c0_i32_1 = arith.constant 0 : i32
    return %c0_i32, %c0_i32_0 : i32, i32
  }
  func.func @transform_4(%arg0: i32) -> (i32, i32) {
    %c0_i32 = arith.constant 0 : i32
    %c0_i32_0 = arith.constant 0 : i32
    %c0_i32_1 = arith.constant 0 : i32
    return %c0_i32, %c0_i32_0 : i32, i32
  }
  func.func @transform_5(%arg0: i32) -> (i32, i32) {
    %c0_i32 = arith.constant 0 : i32
    %c0_i32_0 = arith.constant 0 : i32
    %c0_i32_1 = arith.constant 0 : i32
    return %c0_i32, %c0_i32_0 : i32, i32
  }
  func.func @transform_6(%arg0: i32) -> (i32, i32) {
    %c0_i32 = arith.constant 0 : i32
    %c0_i32_0 = arith.constant 0 : i32
    %c0_i32_1 = arith.constant 0 : i32
    return %c0_i32, %c0_i32_0 : i32, i32
  }
  func.func @transform_7(%arg0: i32) -> (i32, i32) {
    %c0_i32 = arith.constant 0 : i32
    %c0_i32_0 = arith.constant 0 : i32
    %c0_i32_1 = arith.constant 0 : i32
    return %c0_i32, %c0_i32_0 : i32, i32
  }
  func.func @transform_8(%arg0: i32) -> (i32, i32) {
    %c0_i32 = arith.constant 0 : i32
    %c0_i32_0 = arith.constant 0 : i32
    %c0_i32_1 = arith.constant 0 : i32
    return %c0_i32, %c0_i32_0 : i32, i32
  }
  func.func @transform_9(%arg0: i32) -> (i32, i32) {
    %c0_i32 = arith.constant 0 : i32
    %c0_i32_0 = arith.constant 0 : i32
    %c0_i32_1 = arith.constant 0 : i32
    return %c0_i32, %c0_i32_0 : i32, i32
  }
  func.func @transform_10(%arg0: i32) -> (i32, i32) {
    %c0_i32 = arith.constant 0 : i32
    %c0_i32_0 = arith.constant 0 : i32
    %c0_i32_1 = arith.constant 0 : i32
    return %c0_i32, %c0_i32_0 : i32, i32
  }
  func.func @transform_11(%arg0: i32) -> (i32, i32) {
    %c0_i32 = arith.constant 0 : i32
    %c0_i32_0 = arith.constant 0 : i32
    %c0_i32_1 = arith.constant 0 : i32
    return %c0_i32, %c0_i32_0 : i32, i32
  }
  func.func @transform_12(%arg0: i32) -> (i32, i32, i32) {
    %c0_i32 = arith.constant 0 : i32
    %c0_i32_0 = arith.constant 0 : i32
    %c0_i32_1 = arith.constant 0 : i32
    return %arg0, %c0_i32, %c0_i32_0 : i32, i32, i32
  }
}

</mosaic_0001>

<bundles_post_ra>
// kernel: gcn_h_4layer_forward.1
= control target key start
LH: loop header
LB: loop body
LE: loop exit
PB: predicated region body
PF: predicated region fallthrough
CT: control target
= control target key end

     0   :  { %s4419_s23 = smov 0   ;;  %s5895_s0 = inlined_call_operand.vmem [shape: bf16[2,32,1024], index: 0, kind: input, shape index: {}]   ;;  %s5896_s1 = inlined_call_operand.vmem [shape: bf16[8,256,256], index: 1, kind: input, shape index: {}]   ;;  %s5897_s2 = inlined_call_operand.vmem [shape: bf16[32,32], index: 2, kind: input, shape index: {}]   ;;  %s5898_s3 = inlined_call_operand.vmem [shape: f32[32,1], index: 3, kind: input, shape index: {}]   ;;  %s5899_s4 = inlined_call_operand.vmem [shape: bf16[64,32], index: 4, kind: input, shape index: {}]   ;;  %s5900_s5 = inlined_call_operand.vmem [shape: f32[64,1], index: 5, kind: input, shape index: {}]   ;;  %s5901_s6 = inlined_call_operand.vmem [shape: bf16[32,64], index: 6, kind: input, shape index: {}]   ;;  %s5902_s7 = inlined_call_operand.vmem [shape: f32[32,1], index: 7, kind: input, shape index: {}]   ;;  %s5903_s8 = inlined_call_operand.vmem [shape: bf16[1,32], index: 8, kind: input, shape index: {}]   ;;  %s5904_s9 = inlined_call_operand.<no memory space> [shape: f32[1,1], index: 9, kind: input, shape index: {}]   ;;  %s5905_s10 = inlined_call_operand.vmem [shape: f32[256,2], index: 10, kind: input, shape index: {}]   ;;  %s5906_s11 = inlined_call_operand.vmem [shape: f32[1,2], index: 11, kind: input, shape index: {}]   ;;  %s5907_s12 = inlined_call_operand.vmem [shape: f32[2,4,2], index: 12, kind: output, shape index: {}]  }
   0x1   :  { %v17_v0 = vstv %s5904_s9 }
   0x2   :  { %18 = vst [vmem:[#allocation2] sm:$0x1] %v17_v0 }
   0x3 LB: > { %s3737_s24 = sadd.s32 4294967295, %s4348_s23   ;;  %p3741_p0 = scmp.ge.s32.totalorder %s4348_s23, 1  ;;  %s4348_s23 = sphi %s4419_s23, %s24_s23  }
   0x4   : > { %p376_p1 = scmp.lt.s32.totalorder %s4348_s23, 3 }
   0x6   : > { %p377_p2 = pnand %p3741_p0, %p376_p1 }
   0x8   : > { %380 = sbr.rel (%p377_p2) target bundleno = 6050 (0x17a2), region = 68 }
   0xf   : > { %p423_p3 = scmp.lt.s32.totalorder %s3737_s24, 1  ;;  %v5908_v1 = vmov 0   ;;  %s3744_s25 = sshll.u32 %s3737_s24, 2  ;;  %v4115_v13 = vld [vmem:[%s5897_s2] sm:$0xff]   ;;  %vm478_vm0 = vcmask 261120   ;;  %v4116_v18 = vld [vmem:[%s5897_s2 + $0x8] sm:$0xff]  }
  0x10   : > { %517 = vmatprep.mubr.bf16.mxu0 %v5908_v1  ;;  %4113 = vset.pattern.permute.xlu0 %v5908_v1  ;;  %p429_p4 = scmp.lt.s32.totalorder %s3744_s25, 7  ;;  %v574_v44 = vld [vmem:[%s5898_s3] sm:$0xff]  ;;  %v576_v45 = vld [vmem:[%s5898_s3 + $0x10] sm:$0xff]  ;;  %v575_v46 = vld [vmem:[%s5898_s3 + $0x8] sm:$0xff]  ;;  %vm1103_vm1 = vcmask 523264   ;;  %vm3541_vm2 = vcmask 1040384  }
  0x11   : > { %s4429_s9 = scalar_select %p423_p3, %s3737_s24, 1  ;;  %4114 = vset.pattern.permute.xlu1 %v5908_v1  ;;  %580 = vperm.xlu0 %4113, %v574_v44   ;;  %v577_v47 = vld [vmem:[%s5898_s3 + $0x18] sm:$0xff]  ;;  %v944_v48 = vld [vmem:[%s5900_s5] sm:$0xff]  ;;  %v945_v49 = vld [vmem:[%s5900_s5 + $0x8] sm:$0xff]  ;;  %vm3544_vm3 = vcmask 1041408   ;;  %vm3547_vm4 = vcmask 1042432  }
  0x12   : > { %s6198_s25 = smov (!%p429_p4, %s3744_s25), 7  ;;  %590 = vperm.xlu1 %4114, %v576_v45   ;;  %v946_v50 = vld [vmem:[%s5900_s5 + $0x10] sm:$0xff]  ;;  %v947_v51 = vld [vmem:[%s5900_s5 + $0x18] sm:$0xff]  ;;  %v948_v52 = vld [vmem:[%s5900_s5 + $0x20] sm:$0xff]  ;;  %vm3659_vm5 = vcmask 11264  }
  0x13   : > { %s4035_s26 = sshll.u32 %s4429_s9, 7  ;;  %s4036_s30 = sshll.u32 %s6198_s25, 8  ;;  %v949_v53 = vld [vmem:[%s5900_s5 + $0x28] sm:$0xff]  ;;  %v950_v54 = vld [vmem:[%s5900_s5 + $0x30] sm:$0xff]  ;;  %v951_v55 = vld [vmem:[%s5900_s5 + $0x38] sm:$0xff] }
  0x14   : > { %s4436_s29 = scalar_lea.vmem %s5895_s0, %s4035_s26  ;;  %s4445_s15 = scalar_lea.vmem %s5896_s1, %s4036_s30  ;;  %v1167_v56 = vld [vmem:[%s5902_s7] sm:$0xff]  ;;  %v1168_v57 = vld [vmem:[%s5902_s7 + $0x8] sm:$0xff]  ;;  %v1169_v58 = vld [vmem:[%s5902_s7 + $0x10] sm:$0xff] }
  0x15   : > { %v440_v2 = vld [vmem:[%s4436_s29] sm:$0xff]  ;;  %v4455_v12 = vld [vmem:[%s4445_s15 + $0x14] ss:$8 sps:$4 sm:$0xff]   ;;  %v4462_v14 = vld [vmem:[%s4445_s15 + $0x10] ss:$8 sps:$4 sm:$0xff]   ;;  %585 = vperm.xlu0 %4113, %v575_v46   ;;  %s3747_s26 = sshll.u32 %s4429_s9, 2 }
  0x16   : > { %v441_v3 = vld [vmem:[%s4436_s29 + $0x20] sm:$0xff]  ;;  %v4476_v17 = vld [vmem:[%s4445_s15 + $0x34] ss:$8 sps:$4 sm:$0xff]   ;;  %v4483_v19 = vld [vmem:[%s4445_s15 + $0x30] ss:$8 sps:$4 sm:$0xff]   ;;  %595 = vperm.xlu1 %4114, %v577_v47   ;;  %s438_s28 = scalar_lea.vmem %s5907_s12, %s3747_s26 }
  0x17   : > { %v442_v4 = vld [vmem:[%s4436_s29 + $0x40] sm:$0xff]  ;;  %v3751_v5 = vcombine.high %v440_v2, %v441_v3  ;;  %v3750_v6 = vcombine.low %v440_v2, %v441_v3  ;;  %v4496_v22 = vld [vmem:[%s4445_s15 + $0x54] ss:$8 sps:$4 sm:$0xff]   ;;  %v4500_v23 = vld [vmem:[%s4445_s15 + $0x50] ss:$8 sps:$4 sm:$0xff]  }
  0x18   : > { %v443_v7 = vld [vmem:[%s4436_s29 + $0x60] sm:$0xff]  ;;  %v4511_v26 = vld [vmem:[%s4445_s15 + $0x74] ss:$8 sps:$4 sm:$0xff]   ;;  %v4516_v27 = vld [vmem:[%s4445_s15 + $0x70] ss:$8 sps:$4 sm:$0xff]  }
  0x19   : > { %v3753_v8 = vcombine.high %v442_v4, %v443_v7  ;;  %485 = vmatprep.subr.bf16.mxu0 %v3751_v5  ;;  %v3752_v9 = vcombine.low %v442_v4, %v443_v7  ;;  %v4448_v10 = vld [vmem:[%s4445_s15 + $0x4] ss:$8 sps:$4 sm:$0xff]   ;;  %v4451_v11 = vld [vmem:[%s4445_s15] ss:$8 sps:$4 sm:$0xff]   ;;  %v4527_v30 = vld [vmem:[%s4445_s15 + $0x94] ss:$8 sps:$4 sm:$0xff]   ;;  %954 = vperm.xlu0 %4113, %v944_v48  }
  0x1a   : > { %486 = vmatpush1.bf16.msra.mxu0 %v3750_v6  ;;  %758 = vmatprep.subr.bf16.mxu1 %v4448_v10  ;;  %v4466_v15 = vld [vmem:[%s4445_s15 + $0x24] ss:$8 sps:$4 sm:$0xff]   ;;  %v4471_v16 = vld [vmem:[%s4445_s15 + $0x20] ss:$8 sps:$4 sm:$0xff]   ;;  %v4532_v31 = vld [vmem:[%s4445_s15 + $0x90] ss:$8 sps:$4 sm:$0xff]  }
  0x1b   : > { %487 = vmatprep.subr.bf16.mxu0 %v3753_v8  ;;  %759 = vmatpush1.bf16.msra.mxu1 %v4451_v11  ;;  %v4487_v20 = vld [vmem:[%s4445_s15 + $0x44] ss:$8 sps:$4 sm:$0xff]   ;;  %v4492_v21 = vld [vmem:[%s4445_s15 + $0x40] ss:$8 sps:$4 sm:$0xff]   ;;  %v4543_v34 = vld [vmem:[%s4445_s15 + $0xb4] ss:$8 sps:$4 sm:$0xff]  }
  0x1c   : > { %760 = vmatprep.subr.bf16.mxu1 %v4455_v12  ;;  %v4504_v24 = vld [vmem:[%s4445_s15 + $0x64] ss:$8 sps:$4 sm:$0xff]   ;;  %v4508_v25 = vld [vmem:[%s4445_s15 + $0x60] ss:$8 sps:$4 sm:$0xff]   ;;  %v4548_v35 = vld [vmem:[%s4445_s15 + $0xb0] ss:$8 sps:$4 sm:$0xff]   ;;  %959 = vperm.xlu1 %4114, %v945_v49  }
  0x1d   : > { %v4519_v28 = vld [vmem:[%s4445_s15 + $0x84] ss:$8 sps:$4 sm:$0xff]   ;;  %v4524_v29 = vld [vmem:[%s4445_s15 + $0x80] ss:$8 sps:$4 sm:$0xff]   ;;  %v4559_v38 = vld [vmem:[%s4445_s15 + $0xd4] ss:$8 sps:$4 sm:$0xff]   ;;  %964 = vperm.xlu0 %4113, %v946_v50  }
  0x1e   : > { %488 = vmatpush1.bf16.msra.mxu0 %v3752_v9  ;;  %v4535_v32 = vld [vmem:[%s4445_s15 + $0xa4] ss:$8 sps:$4 sm:$0xff]   ;;  %v4540_v33 = vld [vmem:[%s4445_s15 + $0xa0] ss:$8 sps:$4 sm:$0xff]   ;;  %v4564_v39 = vld [vmem:[%s4445_s15 + $0xd0] ss:$8 sps:$4 sm:$0xff]  }
  0x1f   : > { %761 = vmatpush1.bf16.msra.mxu1 %v4462_v14  ;;  %v4551_v36 = vld [vmem:[%s4445_s15 + $0xc4] ss:$8 sps:$4 sm:$0xff]   ;;  %v4556_v37 = vld [vmem:[%s4445_s15 + $0xc0] ss:$8 sps:$4 sm:$0xff]   ;;  %v4578_v42 = vld [vmem:[%s4445_s15 + $0xf4] ss:$8 sps:$4 sm:$0xff]  }
  0x20   : > { %762 = vmatprep.subr.bf16.mxu1 %v4466_v15  ;;  %v4569_v40 = vld [vmem:[%s4445_s15 + $0xe4] ss:$8 sps:$4 sm:$0xff]   ;;  %v4574_v41 = vld [vmem:[%s4445_s15 + $0xe0] ss:$8 sps:$4 sm:$0xff]   ;;  %v4581_v43 = vld [vmem:[%s4445_s15 + $0xf0] ss:$8 sps:$4 sm:$0xff]   ;;  %969 = vperm.xlu1 %4114, %v947_v51  }
  0x21   : > { %3754 = vmatmul.mubr.msk.bf16.vlgmr.msra.gmra.mrb[0].mxu0 %vm478_vm0, %v4115_v13  ;;  %974 = vperm.xlu0 %4113, %v948_v52   ;;  %v1170_v59 = vld [vmem:[%s5902_s7 + $0x18] sm:$0xff]  ;;  %v1303_v60 = vld [vmem:[#allocation2] sm:$0x1] }
  0x22   : > { %527 = vmatprep.mubr.bf16.mxu0 %v5908_v1 }
  0x23   : > { %763 = vmatpush1.bf16.msra.mxu1 %v4471_v16 }
  0x24   : > { %764 = vmatprep.subr.bf16.mxu1 %v4476_v17  ;;  %979 = vperm.xlu1 %4114, %v949_v53  }
  0x25   : > { %984 = vperm.xlu0 %4113, %v950_v54  }
  0x27   : > { %765 = vmatpush1.bf16.msra.mxu1 %v4483_v19 }
  0x28   : > { %766 = vmatprep.subr.bf16.mxu1 %v4487_v20  ;;  %989 = vperm.xlu1 %4114, %v951_v55  }
  0x29   : > { %3755 = vmatmul.mubr.msk.bf16.gmra.mrb[4].mxu0 %vm478_vm0, %v4116_v18  ;;  %1173 = vperm.xlu0 %4113, %v1167_v56  }
  0x2a   : > { %895 = vmatprep.mubr.bf16.mxu0 %v5908_v1 }
  0x2b   : > { %767 = vmatpush1.bf16.msra.mxu1 %v4492_v21 }
  0x2c   : > { %768 = vmatprep.subr.bf16.mxu1 %v4496_v22  ;;  %1178 = vperm.xlu1 %4114, %v1168_v57  }
  0x2d   : > { %1183 = vperm.xlu0 %4113, %v1169_v58  }
  0x2f   : > { %769 = vmatpush1.bf16.msra.mxu1 %v4500_v23 }
  0x30   : > { %770 = vmatprep.subr.bf16.mxu1 %v4504_v24  ;;  %1188 = vperm.xlu1 %4114, %v1170_v59  }
  0x31   : > { %1306 = vperm.xlu0 %4113, %v1303_v60  }
  0x33   : > { %771 = vmatpush1.bf16.msra.mxu1 %v4508_v25 }
  0x34   : > { %772 = vmatprep.subr.bf16.mxu1 %v4511_v26 }
  0x37   : > { %773 = vmatpush1.bf16.msra.mxu1 %v4516_v27 }
  0x38   : > { %774 = vmatprep.subr.bf16.mxu1 %v4519_v28 }
  0x3b   : > { %775 = vmatpush1.bf16.msra.mxu1 %v4524_v29 }
  0x3c   : > { %776 = vmatprep.subr.bf16.mxu1 %v4527_v30 }
  0x3f   : > { %777 = vmatpush1.bf16.msra.mxu1 %v4532_v31 }
  0x40   : > { %778 = vmatprep.subr.bf16.mxu1 %v4535_v32 }
  0x43   : > { %779 = vmatpush1.bf16.msra.mxu1 %v4540_v33 }
  0x44   : > { %780 = vmatprep.subr.bf16.mxu1 %v4543_v34 }
  0x47   : > { %781 = vmatpush1.bf16.msra.mxu1 %v4548_v35 }
  0x48   : > { %782 = vmatprep.subr.bf16.mxu1 %v4551_v36 }
  0x4b   : > { %783 = vmatpush1.bf16.msra.mxu1 %v4556_v37 }
  0x4c   : > { %784 = vmatprep.subr.bf16.mxu1 %v4559_v38 }
  0x4f   : > { %785 = vmatpush1.bf16.msra.mxu1 %v4564_v39 }
  0x50   : > { %786 = vmatprep.subr.bf16.mxu1 %v4569_v40 }
  0x53   : > { %787 = vmatpush1.bf16.msra.mxu1 %v4574_v41 }
  0x54   : > { %788 = vmatprep.subr.bf16.mxu1 %v4578_v42 }
  0x57   : > { %789 = vmatpush1.bf16.msra.mxu1 %v4581_v43 }
  0x90   : > { %v4634_v13 = vpop.permute.xlu0 %580 }
  0x91   : > { %v4641_v51 = vpop.permute.xlu1 %590 }
  0x94   : > { %v4637_v46 = vpop.permute.xlu0 %585 }
  0xf4   : > { %v519_v61 = vpop.f32.mrb[0].mxu0 }
  0xf5   : > { %v521_v62 = vpop.f32.mrb[1].mxu0 }
  0xf6   : > { %v523_v63 = vpop.f32.mrb[2].mxu0 }
  0xf7   : > { %v538_v0 = vpack.c.bf16 %v523_v63, %v519_v61  ;;  %v525_v2 = vpop.f32.mrb[3].mxu0 }
  0xf8   : > { %v539_v3 = vpack.c.bf16 %v525_v2, %v521_v62  ;;  %v4645_v62 = vpop.permute.xlu1 %595 }
  0xfa   : > { %790 = vmatprep.mubr.bf16.mxu1 %v539_v3 }
  0xfb   : > { %791 = vmatmul.mubr.bf16.vlgmr.msra.gmra.mrb[0].mxu1 %v538_v0 }
  0xfc   : > { %v529_v4 = vpop.f32.mrb[4].mxu0 }
  0xfd   : > { %v531_v5 = vpop.f32.mrb[5].mxu0 }
  0xfe   : > { %v533_v6 = vpop.f32.mrb[6].mxu0 }
  0xff   : > { %v540_v7 = vpack.c.bf16 %v533_v6, %v529_v4  ;;  %v535_v8 = vpop.f32.mrb[7].mxu0 }
 0x100   : > { %v541_v9 = vpack.c.bf16 %v535_v8, %v531_v5 }
 0x102   : > { %800 = vmatprep.mubr.bf16.mxu1 %v541_v9 }
 0x103   : > { %801 = vmatmul.mubr.bf16.gmra.mrb[4].mxu1 %v540_v7 }
 0x104   : > { %1142 = vmatprep.mubr.bf16.mxu1 %v5908_v1 }
 0x1ce   : > { %v792_v18 = vpop.f32.mrb[0].mxu1 }
 0x1cf   : > { %v793_v44 = vadd.f32 %v792_v18, %v4634_v13  ;;  %v794_v45 = vpop.f32.mrb[1].mxu1 }
 0x1d0   : > { %v795_v47 = vadd.f32 %v794_v45, %v4634_v13  ;;  %v796_v48 = vpop.f32.mrb[2].mxu1  ;;  %v4664_v45 = vld [vmem:[%s5899_s4 + $0x8] sm:$0xff]  }
 0x1d1   : > { %v797_v49 = vadd.f32 %v796_v48, %v4637_v46  ;;  %v798_v50 = vpop.f32.mrb[3].mxu1  ;;  %v811_v53 = vmax.f32 %v793_v44, 0.0  ;;  %v4653_v44 = vld [vmem:[%s5899_s4] sm:$0xff]   ;;  %v4688_v48 = vld [vmem:[%s5899_s4 + $0x18] sm:$0xff]  }
 0x1d2   : > { %v799_v52 = vadd.f32 %v798_v50, %v4637_v46  ;;  %v812_v55 = vmax.f32 %v795_v47, 0.0  ;;  %v4676_v47 = vld [vmem:[%s5899_s4 + $0x10] sm:$0xff]  }
 0x1d3   : > { %v813_v54 = vmax.f32 %v797_v49, 0.0 }
 0x1d4   : > { %v814_v56 = vmax.f32 %v799_v52, 0.0 }
 0x1d5   : > { %v819_v57 = vpack.c.bf16 %v813_v54, %v811_v53 }
 0x1d6   : > { %v820_v58 = vpack.c.bf16 %v814_v56, %v812_v55  ;;  %v802_v59 = vpop.f32.mrb[4].mxu1 }
 0x1d7   : > { %v803_v60 = vadd.f32 %v802_v59, %v4641_v51  ;;  %v804_v61 = vpop.f32.mrb[5].mxu1 }
 0x1d8   : > { %v805_v63 = vadd.f32 %v804_v61, %v4641_v51  ;;  %v806_v0 = vpop.f32.mrb[6].mxu1  ;;  %863 = vmatprep.subr.bf16.mxu0 %v820_v58 }
 0x1d9   : > { %v807_v2 = vadd.f32 %v806_v0, %v4645_v62  ;;  %v808_v3 = vpop.f32.mrb[7].mxu1  ;;  %864 = vmatpush1.bf16.msra.mxu0 %v819_v57  ;;  %v815_v5 = vmax.f32 %v803_v60, 0.0 }
 0x1da   : > { %v809_v4 = vadd.f32 %v808_v3, %v4645_v62  ;;  %v816_v7 = vmax.f32 %v805_v63, 0.0 }
 0x1db   : > { %v817_v6 = vmax.f32 %v807_v2, 0.0 }
 0x1dc   : > { %v818_v8 = vmax.f32 %v809_v4, 0.0 }
 0x1dd   : > { %v821_v9 = vpack.c.bf16 %v817_v6, %v815_v5 }
 0x1de   : > { %v822_v18 = vpack.c.bf16 %v818_v8, %v816_v7 }
 0x1e0   : > { %865 = vmatprep.subr.bf16.mxu0 %v822_v18 }
 0x1e1   : > { %866 = vmatpush1.bf16.msra.mxu0 %v821_v9 }
 0x1e2   : > { %992 = vmatprep.subr.bf16.mxu0 %v4448_v10 }
 0x1e4   : > { %3792 = vmatmul.mubr.msk.bf16.vlgmr.msra.gmra.mrb[8].mxu0 %vm478_vm0, %v4653_v44 }
 0x1e5   : > { %905 = vmatprep.mubr.bf16.mxu0 %v5908_v1  ;;  %993 = vmatpush1.bf16.msra.mxu0 %v4451_v11 }
 0x1e6   : > { %994 = vmatprep.subr.bf16.mxu0 %v4455_v12 }
 0x1e9   : > { %995 = vmatpush1.bf16.msra.mxu0 %v4462_v14 }
 0x1ea   : > { %996 = vmatprep.subr.bf16.mxu0 %v4466_v15 }
 0x1ec   : > { %3793 = vmatmul.mubr.msk.bf16.gmra.mrb[12].mxu0 %vm478_vm0, %v4664_v45 }
 0x1ed   : > { %915 = vmatprep.mubr.bf16.mxu0 %v5908_v1  ;;  %997 = vmatpush1.bf16.msra.mxu0 %v4471_v16 }
 0x1ee   : > { %998 = vmatprep.subr.bf16.mxu0 %v4476_v17 }
 0x1f1   : > { %999 = vmatpush1.bf16.msra.mxu0 %v4483_v19 }
 0x1f2   : > { %1000 = vmatprep.subr.bf16.mxu0 %v4487_v20 }
 0x1f4   : > { %3794 = vmatmul.mubr.msk.bf16.gmra.mrb[16].mxu0 %vm478_vm0, %v4676_v47 }
 0x1f5   : > { %925 = vmatprep.mubr.bf16.mxu0 %v5908_v1  ;;  %1001 = vmatpush1.bf16.msra.mxu0 %v4492_v21 }
 0x1f6   : > { %1002 = vmatprep.subr.bf16.mxu0 %v4496_v22 }
 0x1f9   : > { %1003 = vmatpush1.bf16.msra.mxu0 %v4500_v23 }
 0x1fa   : > { %1004 = vmatprep.subr.bf16.mxu0 %v4504_v24 }
 0x1fc   : > { %3795 = vmatmul.mubr.msk.bf16.gmra.mrb[20].mxu0 %vm478_vm0, %v4688_v48 }
 0x1fd   : > { %1005 = vmatpush1.bf16.msra.mxu0 %v4508_v25 }
 0x1fe   : > { %1006 = vmatprep.subr.bf16.mxu0 %v4511_v26 }
 0x201   : > { %1007 = vmatpush1.bf16.msra.mxu0 %v4516_v27 }
 0x202   : > { %1008 = vmatprep.subr.bf16.mxu0 %v4519_v28 }
 0x205   : > { %1009 = vmatpush1.bf16.msra.mxu0 %v4524_v29 }
 0x206   : > { %1010 = vmatprep.subr.bf16.mxu0 %v4527_v30 }
 0x209   : > { %1011 = vmatpush1.bf16.msra.mxu0 %v4532_v31 }
 0x20a   : > { %1012 = vmatprep.subr.bf16.mxu0 %v4535_v32 }
 0x20d   : > { %1013 = vmatpush1.bf16.msra.mxu0 %v4540_v33 }
 0x20e   : > { %1014 = vmatprep.subr.bf16.mxu0 %v4543_v34 }
 0x211   : > { %1015 = vmatpush1.bf16.msra.mxu0 %v4548_v35 }
 0x212   : > { %1016 = vmatprep.subr.bf16.mxu0 %v4551_v36 }
 0x215   : > { %1017 = vmatpush1.bf16.msra.mxu0 %v4556_v37 }
 0x216   : > { %1018 = vmatprep.subr.bf16.mxu0 %v4559_v38 }
 0x219   : > { %1019 = vmatpush1.bf16.msra.mxu0 %v4564_v39 }
 0x21a   : > { %1020 = vmatprep.subr.bf16.mxu0 %v4569_v40 }
 0x21d   : > { %1021 = vmatpush1.bf16.msra.mxu0 %v4574_v41 }
 0x21e   : > { %1022 = vmatprep.subr.bf16.mxu0 %v4578_v42 }
 0x221   : > { %1023 = vmatpush1.bf16.msra.mxu0 %v4581_v43 }
 0x222   : > { %1313 = vmatprep.subr.bf16.mxu0 %v4448_v10 }
 0x2b7   : > { %v897_v49 = vpop.f32.mrb[8].mxu0 }
 0x2b8   : > { %v899_v50 = vpop.f32.mrb[9].mxu0 }
 0x2b9   : > { %v901_v52 = vpop.f32.mrb[10].mxu0 }
 0x2ba   : > { %v936_v53 = vpack.c.bf16 %v901_v52, %v897_v49  ;;  %v903_v54 = vpop.f32.mrb[11].mxu0 }
 0x2bb   : > { %v937_v55 = vpack.c.bf16 %v903_v54, %v899_v50  ;;  %v4745_v50 = vpop.permute.xlu0 %954 }
 0x2bc   : > { %6045 = vst [vmem:[#allocation3_spill] sm:$0xff] %v4745_v50 }
 0x2bd   : > { %1024 = vmatprep.mubr.bf16.mxu0 %v937_v55  ;;  %v4748_v55 = vpop.permute.xlu1 %959 }
 0x2be   : > { %1025 = vmatmul.mubr.bf16.vlgmr.msra.gmra.mrb[24].mxu0 %v936_v53  ;;  %6046 = vst [vmem:[#allocation4_spill] sm:$0xff] %v4748_v55 }
 0x2bf   : > { %v907_v56 = vpop.f32.mrb[12].mxu0  ;;  %1314 = vmatpush1.bf16.msra.mxu0 %v4451_v11 }
 0x2c0   : > { %v909_v57 = vpop.f32.mrb[13].mxu0  ;;  %1315 = vmatprep.subr.bf16.mxu0 %v4455_v12 }
 0x2c1   : > { %v911_v58 = vpop.f32.mrb[14].mxu0 }
 0x2c2   : > { %v938_v59 = vpack.c.bf16 %v911_v58, %v907_v56  ;;  %v913_v60 = vpop.f32.mrb[15].mxu0 }
 0x2c3   : > { %v939_v61 = vpack.c.bf16 %v913_v60, %v909_v57  ;;  %1316 = vmatpush1.bf16.msra.mxu0 %v4462_v14 }
 0x2c4   : > { %1317 = vmatprep.subr.bf16.mxu0 %v4466_v15 }
 0x2c5   : > { %1034 = vmatprep.mubr.bf16.mxu0 %v939_v61 }
 0x2c6   : > { %1035 = vmatmul.mubr.bf16.gmra.mrb[28].mxu0 %v938_v59 }
 0x2c7   : > { %v917_v63 = vpop.f32.mrb[16].mxu0  ;;  %1318 = vmatpush1.bf16.msra.mxu0 %v4471_v16 }
 0x2c8   : > { %v919_v0 = vpop.f32.mrb[17].mxu0  ;;  %1319 = vmatprep.subr.bf16.mxu0 %v4476_v17 }
 0x2c9   : > { %v921_v2 = vpop.f32.mrb[18].mxu0 }
 0x2ca   : > { %v940_v3 = vpack.c.bf16 %v921_v2, %v917_v63  ;;  %v923_v4 = vpop.f32.mrb[19].mxu0 }
 0x2cb   : > { %v941_v5 = vpack.c.bf16 %v923_v4, %v919_v0  ;;  %1320 = vmatpush1.bf16.msra.mxu0 %v4483_v19  ;;  %v4753_v4 = vpop.permute.xlu0 %964 }
 0x2cc   : > { %1321 = vmatprep.subr.bf16.mxu0 %v4487_v20  ;;  %6047 = vst [vmem:[#allocation5_spill] sm:$0xff] %v4753_v4 }
 0x2cd   : > { %1044 = vmatprep.mubr.bf16.mxu0 %v941_v5 }
 0x2ce   : > { %1045 = vmatmul.mubr.bf16.gmra.mrb[32].mxu0 %v940_v3 }
 0x2cf   : > { %v927_v6 = vpop.f32.mrb[20].mxu0  ;;  %1322 = vmatpush1.bf16.msra.mxu0 %v4492_v21 }
 0x2d0   : > { %v929_v7 = vpop.f32.mrb[21].mxu0  ;;  %1323 = vmatprep.subr.bf16.mxu0 %v4496_v22 }
 0x2d1   : > { %v931_v8 = vpop.f32.mrb[22].mxu0 }
 0x2d2   : > { %v942_v9 = vpack.c.bf16 %v931_v8, %v927_v6  ;;  %v933_v18 = vpop.f32.mrb[23].mxu0 }
 0x2d3   : > { %v943_v49 = vpack.c.bf16 %v933_v18, %v929_v7  ;;  %1324 = vmatpush1.bf16.msra.mxu0 %v4500_v23 }
 0x2d4   : > { %1325 = vmatprep.subr.bf16.mxu0 %v4504_v24 }
 0x2d5   : > { %1054 = vmatprep.mubr.bf16.mxu0 %v943_v49 }
 0x2d6   : > { %1055 = vmatmul.mubr.bf16.gmra.mrb[36].mxu0 %v942_v9  ;;  %v4756_v9 = vpop.permute.xlu1 %969 }
 0x2d7   : > { %1326 = vmatpush1.bf16.msra.mxu0 %v4508_v25  ;;  %6048 = vst [vmem:[#allocation6_spill] sm:$0xff] %v4756_v9 }
 0x2d8   : > { %1327 = vmatprep.subr.bf16.mxu0 %v4511_v26 }
 0x2db   : > { %1328 = vmatpush1.bf16.msra.mxu0 %v4516_v27 }
 0x2dc   : > { %1329 = vmatprep.subr.bf16.mxu0 %v4519_v28 }
 0x2df   : > { %1330 = vmatpush1.bf16.msra.mxu0 %v4524_v29 }
 0x2e0   : > { %1331 = vmatprep.subr.bf16.mxu0 %v4527_v30 }
 0x2e3   : > { %1332 = vmatpush1.bf16.msra.mxu0 %v4532_v31 }
 0x2e4   : > { %1333 = vmatprep.subr.bf16.mxu0 %v4535_v32 }
 0x2e7   : > { %1334 = vmatpush1.bf16.msra.mxu0 %v4540_v33 }
 0x2e8   : > { %1335 = vmatprep.subr.bf16.mxu0 %v4543_v34 }
 0x2eb   : > { %1336 = vmatpush1.bf16.msra.mxu0 %v4548_v35 }
 0x2ec   : > { %1337 = vmatprep.subr.bf16.mxu0 %v4551_v36 }
 0x2ef   : > { %1338 = vmatpush1.bf16.msra.mxu0 %v4556_v37 }
 0x2f0   : > { %1339 = vmatprep.subr.bf16.mxu0 %v4559_v38 }
 0x2f3   : > { %1340 = vmatpush1.bf16.msra.mxu0 %v4564_v39 }
 0x2f4   : > { %1341 = vmatprep.subr.bf16.mxu0 %v4569_v40 }
 0x2f7   : > { %1342 = vmatpush1.bf16.msra.mxu0 %v4574_v41 }
 0x2f8   : > { %1343 = vmatprep.subr.bf16.mxu0 %v4578_v42 }
 0x2fb   : > { %1344 = vmatpush1.bf16.msra.mxu0 %v4581_v43 }
 0x391   : > { %v1026_v52 = vpop.f32.mrb[24].mxu0 }
 0x392   : > { %v1027_v53 = vadd.f32 %v1026_v52, %v4745_v50  ;;  %v1028_v54 = vpop.f32.mrb[25].mxu0 }
 0x393   : > { %v1029_v56 = vadd.f32 %v1028_v54, %v4745_v50  ;;  %v1030_v57 = vpop.f32.mrb[26].mxu0 }
 0x394   : > { %v1031_v58 = vadd.f32 %v1030_v57, %v4748_v55  ;;  %v1032_v59 = vpop.f32.mrb[27].mxu0  ;;  %v1065_v61 = vmax.f32 %v1027_v53, 0.0 }
 0x395   : > { %v1033_v60 = vadd.f32 %v1032_v59, %v4748_v55  ;;  %v1066_v0 = vmax.f32 %v1029_v56, 0.0 }
 0x396   : > { %v1067_v63 = vmax.f32 %v1031_v58, 0.0 }
 0x397   : > { %v1068_v2 = vmax.f32 %v1033_v60, 0.0 }
 0x398   : > { %v1081_v3 = vpack.c.bf16 %v1067_v63, %v1065_v61  ;;  %v4761_v61 = vpop.permute.xlu0 %974 }
 0x399   : > { %v1082_v5 = vpack.c.bf16 %v1068_v2, %v1066_v0  ;;  %v1036_v6 = vpop.f32.mrb[28].mxu0  ;;  %6049 = vst [vmem:[#allocation7_spill] sm:$0xff] %v4761_v61 }
 0x39a   : > { %v1037_v7 = vadd.f32 %v1036_v6, %v4753_v4  ;;  %v1038_v8 = vpop.f32.mrb[29].mxu0 }
 0x39b   : > { %v1039_v18 = vadd.f32 %v1038_v8, %v4753_v4  ;;  %v1040_v49 = vpop.f32.mrb[30].mxu0  ;;  %1110 = vmatprep.subr.bf16.mxu1 %v1082_v5  ;;  %v4764_v8 = vpop.permute.xlu1 %979 }
 0x39c   : > { %v1041_v52 = vadd.f32 %v1040_v49, %v4756_v9  ;;  %v1042_v53 = vpop.f32.mrb[31].mxu0  ;;  %1111 = vmatpush1.bf16.msra.mxu1 %v1081_v3  ;;  %v1069_v56 = vmax.f32 %v1037_v7, 0.0  ;;  %6050 = vst [vmem:[#allocation8_spill] sm:$0xff] %v4764_v8 }
 0x39d   : > { %v1043_v54 = vadd.f32 %v1042_v53, %v4756_v9  ;;  %v1070_v58 = vmax.f32 %v1039_v18, 0.0 }
 0x39e   : > { %v1071_v57 = vmax.f32 %v1041_v52, 0.0 }
 0x39f   : > { %v1072_v59 = vmax.f32 %v1043_v54, 0.0 }
 0x3a0   : > { %v1083_v60 = vpack.c.bf16 %v1071_v57, %v1069_v56 }
 0x3a1   : > { %v1084_v63 = vpack.c.bf16 %v1072_v59, %v1070_v58  ;;  %v1046_v0 = vpop.f32.mrb[32].mxu0  ;;  %v4769_v58 = vpop.permute.xlu0 %984 }
 0x3a2   : > { %v1047_v2 = vadd.f32 %v1046_v0, %v4761_v61  ;;  %v1048_v6 = vpop.f32.mrb[33].mxu0  ;;  %6051 = vst [vmem:[#allocation9_spill] sm:$0xff] %v4769_v58 }
 0x3a3   : > { %v1049_v5 = vadd.f32 %v1048_v6, %v4761_v61  ;;  %v1050_v49 = vpop.f32.mrb[34].mxu0  ;;  %1112 = vmatprep.subr.bf16.mxu1 %v1084_v63  ;;  %v4772_v61 = vpop.permute.xlu1 %989 }
 0x3a4   : > { %v1051_v3 = vadd.f32 %v1050_v49, %v4764_v8  ;;  %v1052_v7 = vpop.f32.mrb[35].mxu0  ;;  %1113 = vmatpush1.bf16.msra.mxu1 %v1083_v60  ;;  %v1073_v52 = vmax.f32 %v1047_v2, 0.0  ;;  %6052 = vst [vmem:[#allocation10_spill] sm:$0xff] %v4772_v61 }
 0x3a5   : > { %v1053_v18 = vadd.f32 %v1052_v7, %v4764_v8  ;;  %v1074_v54 = vmax.f32 %v1049_v5, 0.0 }
 0x3a6   : > { %v1075_v53 = vmax.f32 %v1051_v3, 0.0 }
 0x3a7   : > { %v1076_v56 = vmax.f32 %v1053_v18, 0.0 }
 0x3a8   : > { %v1085_v57 = vpack.c.bf16 %v1075_v53, %v1073_v52 }
 0x3a9   : > { %v1086_v59 = vpack.c.bf16 %v1076_v56, %v1074_v54  ;;  %v1056_v0 = vpop.f32.mrb[36].mxu0  ;;  %v4780_v56 = vld [vmem:[%s5901_s6] sm:$0xff]  }
 0x3aa   : > { %v1057_v1 = vadd.f32 %v1056_v0, %v4769_v58  ;;  %v1058_v6 = vpop.f32.mrb[37].mxu0  ;;  %6053 = vst [vmem:[#allocation11_spill] sm:$0xff] %v4780_v56 }
 0x3ab   : > { %v1059_v63 = vadd.f32 %v1058_v6, %v4769_v58  ;;  %v1060_v49 = vpop.f32.mrb[38].mxu0  ;;  %1114 = vmatprep.subr.bf16.mxu1 %v1086_v59 }
 0x3ac   : > { %v1061_v60 = vadd.f32 %v1060_v49, %v4772_v61  ;;  %v1062_v2 = vpop.f32.mrb[39].mxu0  ;;  %1115 = vmatpush1.bf16.msra.mxu1 %v1085_v57  ;;  %v1077_v3 = vmax.f32 %v1057_v1, 0.0  ;;  %v6054_v57 = vmov 0   ;;  %v4791_v1 = vld [vmem:[%s5901_s6 + $0x8] sm:$0xff]  }
 0x3ad   : > { %v1063_v5 = vadd.f32 %v1062_v2, %v4772_v61  ;;  %v1078_v18 = vmax.f32 %v1059_v63, 0.0  ;;  %6055 = vst [vmem:[#allocation12_spill] sm:$0xff] %v4791_v1 }
 0x3ae   : > { %v1079_v7 = vmax.f32 %v1061_v60, 0.0 }
 0x3af   : > { %v1080_v52 = vmax.f32 %v1063_v5, 0.0 }
 0x3b0   : > { %v1087_v53 = vpack.c.bf16 %v1079_v7, %v1077_v3  ;;  %v1354_v3 = vld [vmem:[%s4436_s29 + $0x8] sm:$0xff] }
 0x3b1   : > { %v1088_v54 = vpack.c.bf16 %v1080_v52, %v1078_v18  ;;  %v1355_v7 = vld [vmem:[%s4436_s29 + $0x28] sm:$0xff] }
 0x3b3   : > { %1116 = vmatprep.subr.bf16.mxu1 %v1088_v54 }
 0x3b4   : > { %1117 = vmatpush1.bf16.msra.mxu1 %v1087_v53 }
 0x3b5   : > { %1191 = vmatprep.subr.bf16.mxu1 %v4448_v10 }
 0x3b7   : > { %3798 = vmatmul.mubr.msk.bf16.vlgmr.msra.gmra.mrb[8].mxu1 %vm1103_vm1, %v4780_v56 }
 0x3b8   : > { %1152 = vmatprep.mubr.bf16.mxu1 %v6054_v57  ;;  %1192 = vmatpush1.bf16.msra.mxu1 %v4451_v11 }
 0x3b9   : > { %1193 = vmatprep.subr.bf16.mxu1 %v4455_v12 }
 0x3bc   : > { %1194 = vmatpush1.bf16.msra.mxu1 %v4462_v14 }
 0x3bd   : > { %1195 = vmatprep.subr.bf16.mxu1 %v4466_v15 }
 0x3bf   : > { %3799 = vmatmul.mubr.msk.bf16.gmra.mrb[12].mxu1 %vm1103_vm1, %v4791_v1 }
 0x3c0   : > { %1196 = vmatpush1.bf16.msra.mxu1 %v4471_v16 }
 0x3c1   : > { %1197 = vmatprep.subr.bf16.mxu1 %v4476_v17 }
 0x3c4   : > { %1198 = vmatpush1.bf16.msra.mxu1 %v4483_v19 }
 0x3c5   : > { %1199 = vmatprep.subr.bf16.mxu1 %v4487_v20 }
 0x3c8   : > { %1200 = vmatpush1.bf16.msra.mxu1 %v4492_v21 }
 0x3c9   : > { %1201 = vmatprep.subr.bf16.mxu1 %v4496_v22 }
 0x3cc   : > { %1202 = vmatpush1.bf16.msra.mxu1 %v4500_v23 }
 0x3cd   : > { %1203 = vmatprep.subr.bf16.mxu1 %v4504_v24  ;;  %v4825_v24 = vpop.permute.xlu0 %1173 }
 0x3ce   : > { %6056 = vst [vmem:[#allocation13_spill] sm:$0xff] %v4825_v24 }
 0x3d0   : > { %1204 = vmatpush1.bf16.msra.mxu1 %v4508_v25 }
 0x3d1   : > { %1205 = vmatprep.subr.bf16.mxu1 %v4511_v26 }
 0x3d4   : > { %1206 = vmatpush1.bf16.msra.mxu1 %v4516_v27 }
 0x3d5   : > { %1207 = vmatprep.subr.bf16.mxu1 %v4519_v28  ;;  %v4828_v28 = vpop.permute.xlu1 %1178 }
 0x3d6   : > { %6057 = vst [vmem:[#allocation14_spill] sm:$0xff] %v4828_v28 }
 0x3d8   : > { %1208 = vmatpush1.bf16.msra.mxu1 %v4524_v29 }
 0x3d9   : > { %1209 = vmatprep.subr.bf16.mxu1 %v4527_v30  ;;  %v4836_v59 = vpop.permute.xlu1 %1188 }
 0x3da   : > { %6059 = vst [vmem:[#allocation16_spill] sm:$0xff] %v4836_v59 }
 0x3dc   : > { %1210 = vmatpush1.bf16.msra.mxu1 %v4532_v31 }
 0x3dd   : > { %1211 = vmatprep.subr.bf16.mxu1 %v4535_v32 }
 0x3e0   : > { %1212 = vmatpush1.bf16.msra.mxu1 %v4540_v33 }
 0x3e1   : > { %1213 = vmatprep.subr.bf16.mxu1 %v4543_v34 }
 0x3e4   : > { %1214 = vmatpush1.bf16.msra.mxu1 %v4548_v35 }
 0x3e5   : > { %1215 = vmatprep.subr.bf16.mxu1 %v4551_v36 }
 0x3e8   : > { %1216 = vmatpush1.bf16.msra.mxu1 %v4556_v37 }
 0x3e9   : > { %1217 = vmatprep.subr.bf16.mxu1 %v4559_v38 }
 0x3ec   : > { %1218 = vmatpush1.bf16.msra.mxu1 %v4564_v39  ;;  %v4833_v39 = vpop.permute.xlu0 %1183 }
 0x3ed   : > { %1219 = vmatprep.subr.bf16.mxu1 %v4569_v40  ;;  %6058 = vst [vmem:[#allocation15_spill] sm:$0xff] %v4833_v39 }
 0x3f0   : > { %1220 = vmatpush1.bf16.msra.mxu1 %v4574_v41 }
 0x3f1   : > { %1221 = vmatprep.subr.bf16.mxu1 %v4578_v42 }
 0x3f4   : > { %1222 = vmatpush1.bf16.msra.mxu1 %v4581_v43 }
 0x48a   : > { %v1144_v10 = vpop.f32.mrb[8].mxu1 }
 0x48b   : > { %v1146_v11 = vpop.f32.mrb[9].mxu1 }
 0x48c   : > { %v1148_v12 = vpop.f32.mrb[10].mxu1 }
 0x48d   : > { %v1163_v14 = vpack.c.bf16 %v1148_v12, %v1144_v10  ;;  %v1150_v15 = vpop.f32.mrb[11].mxu1  ;;  %v3802_v10 = vcombine.high %v1354_v3, %v1355_v7  ;;  %v1357_v12 = vld [vmem:[%s4436_s29 + $0x68] sm:$0xff] }
 0x48e   : > { %v1164_v16 = vpack.c.bf16 %v1150_v15, %v1146_v11  ;;  %v1356_v11 = vld [vmem:[%s4436_s29 + $0x48] sm:$0xff]  ;;  %v3801_v15 = vcombine.low %v1354_v3, %v1355_v7  ;;  %v4976_v3 = vld [vmem:[%s4445_s15 + $0x1d0] ss:$8 sps:$4 sm:$0xff]  }
 0x48f   : > { %v4981_v7 = vld [vmem:[%s4445_s15 + $0x1e4] ss:$8 sps:$4 sm:$0xff]  }
 0x490   : > { %1223 = vmatprep.mubr.bf16.mxu1 %v1164_v16  ;;  %v3804_v16 = vcombine.high %v1356_v11, %v1357_v12 }
 0x491   : > { %1224 = vmatmul.mubr.bf16.vlgmr.msra.gmra.mrb[16].mxu1 %v1163_v14  ;;  %v4848_v14 = vld [vmem:[%s5903_s8] sm:$0x1] }
 0x492   : > { %v1154_v17 = vpop.f32.mrb[12].mxu1  ;;  %6060 = vst [vmem:[#allocation17_spill] sm:$0xff] %v4848_v14 }
 0x493   : > { %v1156_v19 = vpop.f32.mrb[13].mxu1 }
 0x494   : > { %v1158_v20 = vpop.f32.mrb[14].mxu1 }
 0x495   : > { %v1165_v21 = vpack.c.bf16 %v1158_v20, %v1154_v17  ;;  %v1160_v22 = vpop.f32.mrb[15].mxu1  ;;  %v3803_v17 = vcombine.low %v1356_v11, %v1357_v12  ;;  %v4857_v20 = vld [vmem:[%s4445_s15 + $0x100] ss:$8 sps:$4 sm:$0xff]  }
 0x496   : > { %v1166_v23 = vpack.c.bf16 %v1160_v22, %v1156_v19  ;;  %v4854_v19 = vld [vmem:[%s4445_s15 + $0x104] ss:$8 sps:$4 sm:$0xff]  }
 0x497   : > { %v4866_v22 = vld [vmem:[%s5897_s2] sm:$0xff]  }
 0x498   : > { %1233 = vmatprep.mubr.bf16.mxu1 %v1166_v23  ;;  %6061 = vst [vmem:[#allocation18_spill] sm:$0xff] %v4866_v22  ;;  %v4873_v23 = vld [vmem:[%s4445_s15 + $0x110] ss:$8 sps:$4 sm:$0xff]  }
 0x499   : > { %1234 = vmatmul.mubr.bf16.gmra.mrb[20].mxu1 %v1165_v21  ;;  %v4861_v21 = vld [vmem:[%s4445_s15 + $0x114] ss:$8 sps:$4 sm:$0xff]  }
 0x49a   : > { %1292 = vmatprep.mubr.bf16.mxu1 %v6054_v57 }
 0x564   : > { %v1225_v25 = vpop.f32.mrb[16].mxu1 }
 0x565   : > { %v1226_v26 = vadd.f32 %v1225_v25, %v4825_v24  ;;  %v1227_v27 = vpop.f32.mrb[17].mxu1  ;;  %v4877_v25 = vld [vmem:[%s4445_s15 + $0x124] ss:$8 sps:$4 sm:$0xff]  }
 0x566   : > { %v1228_v29 = vadd.f32 %v1227_v27, %v4825_v24  ;;  %v1229_v30 = vpop.f32.mrb[18].mxu1  ;;  %v4885_v27 = vld [vmem:[%s4445_s15 + $0x134] ss:$8 sps:$4 sm:$0xff]  }
 0x567   : > { %v1230_v31 = vadd.f32 %v1229_v30, %v4828_v28  ;;  %v1231_v32 = vpop.f32.mrb[19].mxu1  ;;  %v1244_v34 = vmax.f32 %v1226_v26, 0.0  ;;  %v4881_v26 = vld [vmem:[%s4445_s15 + $0x120] ss:$8 sps:$4 sm:$0xff]   ;;  %v4896_v30 = vld [vmem:[%s4445_s15 + $0x130] ss:$8 sps:$4 sm:$0xff]  }
 0x568   : > { %v1232_v33 = vadd.f32 %v1231_v32, %v4828_v28  ;;  %v1245_v36 = vmax.f32 %v1228_v29, 0.0  ;;  %v4890_v29 = vld [vmem:[%s5897_s2 + $0x8] sm:$0xff]  }
 0x569   : > { %v1246_v35 = vmax.f32 %v1230_v31, 0.0  ;;  %6062 = vst [vmem:[#allocation19_spill] sm:$0xff] %v4890_v29  ;;  %v4900_v31 = vld [vmem:[%s4445_s15 + $0x144] ss:$8 sps:$4 sm:$0xff]   ;;  %v4904_v32 = vld [vmem:[%s4445_s15 + $0x140] ss:$8 sps:$4 sm:$0xff]  }
 0x56a   : > { %v1247_v37 = vmax.f32 %v1232_v33, 0.0  ;;  %v4908_v33 = vld [vmem:[%s4445_s15 + $0x154] ss:$8 sps:$4 sm:$0xff]  }
 0x56b   : > { %v1252_v38 = vpack.c.bf16 %v1246_v35, %v1244_v34  ;;  %v4912_v34 = vld [vmem:[%s4445_s15 + $0x150] ss:$8 sps:$4 sm:$0xff]   ;;  %v4916_v35 = vld [vmem:[%s4445_s15 + $0x164] ss:$8 sps:$4 sm:$0xff]  }
 0x56c   : > { %v1253_v40 = vpack.c.bf16 %v1247_v37, %v1245_v36  ;;  %v1235_v41 = vpop.f32.mrb[20].mxu1  ;;  %v4920_v36 = vld [vmem:[%s4445_s15 + $0x160] ss:$8 sps:$4 sm:$0xff]   ;;  %v4924_v37 = vld [vmem:[%s4445_s15 + $0x174] ss:$8 sps:$4 sm:$0xff]  }
 0x56d   : > { %v1236_v42 = vadd.f32 %v1235_v41, %v4833_v39  ;;  %v1237_v43 = vpop.f32.mrb[21].mxu1  ;;  %v4936_v41 = vld [vmem:[%s4445_s15 + $0x180] ss:$8 sps:$4 sm:$0xff]  }
 0x56e   : > { %v1238_v0 = vadd.f32 %v1237_v43, %v4833_v39  ;;  %v1239_v6 = vpop.f32.mrb[22].mxu1  ;;  %1260 = vmatprep.subr.bf16.mxu1 %v1253_v40  ;;  %v4932_v40 = vld [vmem:[%s4445_s15 + $0x184] ss:$8 sps:$4 sm:$0xff]   ;;  %v4944_v43 = vld [vmem:[%s4445_s15 + $0x190] ss:$8 sps:$4 sm:$0xff]  }
 0x56f   : > { %v1240_v63 = vadd.f32 %v1239_v6, %v4836_v59  ;;  %v1241_v49 = vpop.f32.mrb[23].mxu1  ;;  %1261 = vmatpush1.bf16.msra.mxu1 %v1252_v38  ;;  %v1248_v2 = vmax.f32 %v1236_v42, 0.0  ;;  %v4928_v38 = vld [vmem:[%s4445_s15 + $0x170] ss:$8 sps:$4 sm:$0xff]   ;;  %v4940_v42 = vld [vmem:[%s4445_s15 + $0x194] ss:$8 sps:$4 sm:$0xff]  }
 0x570   : > { %v1242_v60 = vadd.f32 %v1241_v49, %v4836_v59  ;;  %v1249_v18 = vmax.f32 %v1238_v0, 0.0  ;;  %v4948_v0 = vld [vmem:[%s4445_s15 + $0x1a4] ss:$8 sps:$4 sm:$0xff]   ;;  %v4952_v6 = vld [vmem:[%s4445_s15 + $0x1a0] ss:$8 sps:$4 sm:$0xff]  }
 0x571   : > { %v1250_v5 = vmax.f32 %v1240_v63, 0.0  ;;  %v4956_v63 = vld [vmem:[%s4445_s15 + $0x1b4] ss:$8 sps:$4 sm:$0xff]   ;;  %v4960_v49 = vld [vmem:[%s4445_s15 + $0x1b0] ss:$8 sps:$4 sm:$0xff]  }
 0x572   : > { %v1251_v52 = vmax.f32 %v1242_v60, 0.0  ;;  %v4964_v60 = vld [vmem:[%s4445_s15 + $0x1c4] ss:$8 sps:$4 sm:$0xff]  }
 0x573   : > { %v1254_v53 = vpack.c.bf16 %v1250_v5, %v1248_v2  ;;  %v4969_v2 = vld [vmem:[%s4445_s15 + $0x1c0] ss:$8 sps:$4 sm:$0xff]   ;;  %v4973_v5 = vld [vmem:[%s4445_s15 + $0x1d4] ss:$8 sps:$4 sm:$0xff]  }
 0x574   : > { %v1255_v54 = vpack.c.bf16 %v1251_v52, %v1249_v18  ;;  %v4984_v18 = vld [vmem:[%s4445_s15 + $0x1e0] ss:$8 sps:$4 sm:$0xff]   ;;  %v4989_v52 = vld [vmem:[%s4445_s15 + $0x1f4] ss:$8 sps:$4 sm:$0xff]  }
 0x576   : > { %1262 = vmatprep.subr.bf16.mxu1 %v1255_v54 }
 0x577   : > { %1263 = vmatpush1.bf16.msra.mxu1 %v1254_v53  ;;  %v4992_v53 = vld [vmem:[%s4445_s15 + $0x1f0] ss:$8 sps:$4 sm:$0xff]  }
 0x578   : > { %1378 = vmatprep.subr.bf16.mxu1 %v3802_v10 }
 0x57a   : > { %3800 = vmatmul.mubr.msk.bf16.vlgmr.msra.gmra.mrb[24].mxu1 %vm478_vm0, %v4848_v14 }
 0x57b   : > { %1379 = vmatpush1.bf16.msra.mxu1 %v3801_v15  ;;  %1410 = vmatprep.mubr.bf16.mxu1 %v6054_v57 }
 0x57c   : > { %1380 = vmatprep.subr.bf16.mxu1 %v3804_v16 }
 0x57f   : > { %1381 = vmatpush1.bf16.msra.mxu1 %v3803_v17 }
 0x580   : > { %1628 = vmatprep.subr.bf16.mxu1 %v4854_v19 }
 0x582   : > { %3805 = vmatmul.mubr.msk.bf16.vlgmr.msra.gmra.mrb[28].mxu1 %vm478_vm0, %v4866_v22 }
 0x583   : > { %1420 = vmatprep.mubr.bf16.mxu1 %v6054_v57  ;;  %1629 = vmatpush1.bf16.msra.mxu1 %v4857_v20 }
 0x584   : > { %1630 = vmatprep.subr.bf16.mxu1 %v4861_v21 }
 0x587   : > { %1631 = vmatpush1.bf16.msra.mxu1 %v4873_v23 }
 0x588   : > { %1632 = vmatprep.subr.bf16.mxu1 %v4877_v25 }
 0x58a   : > { %3806 = vmatmul.mubr.msk.bf16.gmra.mrb[32].mxu1 %vm478_vm0, %v4890_v29 }
 0x58b   : > { %1633 = vmatpush1.bf16.msra.mxu1 %v4881_v26 }
 0x58c   : > { %1634 = vmatprep.subr.bf16.mxu1 %v4885_v27 }
 0x58f   : > { %1635 = vmatpush1.bf16.msra.mxu1 %v4896_v30 }
 0x590   : > { %1636 = vmatprep.subr.bf16.mxu1 %v4900_v31 }
 0x593   : > { %1637 = vmatpush1.bf16.msra.mxu1 %v4904_v32 }
 0x594   : > { %1638 = vmatprep.subr.bf16.mxu1 %v4908_v33 }
 0x597   : > { %1639 = vmatpush1.bf16.msra.mxu1 %v4912_v34 }
 0x598   : > { %1640 = vmatprep.subr.bf16.mxu1 %v4916_v35 }
 0x59b   : > { %1641 = vmatpush1.bf16.msra.mxu1 %v4920_v36 }
 0x59c   : > { %1642 = vmatprep.subr.bf16.mxu1 %v4924_v37 }
 0x59f   : > { %1643 = vmatpush1.bf16.msra.mxu1 %v4928_v38 }
 0x5a0   : > { %1644 = vmatprep.subr.bf16.mxu1 %v4932_v40 }
 0x5a3   : > { %1645 = vmatpush1.bf16.msra.mxu1 %v4936_v41 }
 0x5a4   : > { %1646 = vmatprep.subr.bf16.mxu1 %v4940_v42 }
 0x5a7   : > { %1647 = vmatpush1.bf16.msra.mxu1 %v4944_v43 }
 0x5a8   : > { %1648 = vmatprep.subr.bf16.mxu1 %v4948_v0 }
 0x5ab   : > { %1649 = vmatpush1.bf16.msra.mxu1 %v4952_v6 }
 0x5ac   : > { %1650 = vmatprep.subr.bf16.mxu1 %v4956_v63 }
 0x5af   : > { %1651 = vmatpush1.bf16.msra.mxu1 %v4960_v49 }
 0x5b0   : > { %1652 = vmatprep.subr.bf16.mxu1 %v4964_v60 }
 0x5b3   : > { %1653 = vmatpush1.bf16.msra.mxu1 %v4969_v2 }
 0x5b4   : > { %1654 = vmatprep.subr.bf16.mxu1 %v4973_v5 }
 0x5b7   : > { %1655 = vmatpush1.bf16.msra.mxu1 %v4976_v3 }
 0x5b8   : > { %1656 = vmatprep.subr.bf16.mxu1 %v4981_v7 }
 0x5bb   : > { %1657 = vmatpush1.bf16.msra.mxu1 %v4984_v18 }
 0x5bc   : > { %1658 = vmatprep.subr.bf16.mxu1 %v4989_v52 }
 0x5bf   : > { %1659 = vmatpush1.bf16.msra.mxu1 %v4992_v53 }
 0x64d   : > { %v1294_v54 = vpop.f32.mrb[24].mxu1 }
 0x64e   : > { %v1296_v10 = vpop.f32.mrb[25].mxu1  ;;  %v1301_v15 = vpack.c.bf16 %v1294_v54, %v1294_v54 }
 0x64f   : > { %v1302_v11 = vpack.c.bf16 %v1296_v10, %v1296_v10  ;;  %v1298_v12 = vpop.f32.mrb[26].mxu1 }
 0x650   : > { %v1299_v16 = vpop.f32.mrb[27].mxu1 }
 0x651   : > { %1345 = vmatprep.mubr.bf16.mxu0 %v1302_v11 }
 0x652   : > { %1346 = vmatmul.mubr.bf16.vlgmr.msra.gmra.mrb[40].mxu0 %v1301_v15 }
 0x653   : > { %1725 = vmatprep.mubr.bf16.mxu0 %v6054_v57 }
 0x655   : > { %v1412_v17 = vpop.f32.mrb[28].mxu1 }
 0x656   : > { %v1414_v14 = vpop.f32.mrb[29].mxu1 }
 0x657   : > { %v1416_v59 = vpop.f32.mrb[30].mxu1 }
 0x658   : > { %v1431_v39 = vpack.c.bf16 %v1416_v59, %v1412_v17  ;;  %v1418_v28 = vpop.f32.mrb[31].mxu1 }
 0x659   : > { %v1432_v24 = vpack.c.bf16 %v1418_v28, %v1414_v14 }
 0x65b   : > { %1660 = vmatprep.mubr.bf16.mxu1 %v1432_v24 }
 0x65c   : > { %1661 = vmatmul.mubr.bf16.vlgmr.msra.gmra.mrb[36].mxu1 %v1431_v39 }
 0x65d   : > { %v1422_v29 = vpop.f32.mrb[32].mxu1 }
 0x65e   : > { %v1424_v22 = vpop.f32.mrb[33].mxu1 }
 0x65f   : > { %v1426_v1 = vpop.f32.mrb[34].mxu1 }
 0x660   : > { %v1433_v56 = vpack.c.bf16 %v1426_v1, %v1422_v29  ;;  %v1428_v10 = vpop.f32.mrb[35].mxu1 }
 0x661   : > { %v1434_v12 = vpack.c.bf16 %v1428_v10, %v1424_v22 }
 0x663   : > { %1670 = vmatprep.mubr.bf16.mxu1 %v1434_v12 }
 0x664   : > { %1671 = vmatmul.mubr.bf16.gmra.mrb[40].mxu1 %v1433_v56 }
 0x665   : > { %1903 = vmatprep.mubr.bf16.mxu1 %v6054_v57 }
 0x725   : > { %v4998_v54 = vpop.f32.mrb[40].mxu0 }
 0x726   : > { %6063 = vst [vmem:[#allocation20_spill] sm:$0xff] %v4998_v54  ;;  %v5000_v11 = vpop.f32.mrb[41].mxu0 }
 0x727   : > { %6064 = vst [vmem:[#allocation21_spill] sm:$0xff] %v5000_v11  ;;  %v1351_v15 = vpop.f32.mrb[42].mxu0 }
 0x728   : > { %v1352_v59 = vpop.f32.mrb[43].mxu0 }
 0x72f   : > { %v1662_v16 = vpop.f32.mrb[36].mxu1 }
 0x730   : > { %v1663_v24 = vadd.f32 %v1662_v16, %v4634_v13  ;;  %v1664_v28 = vpop.f32.mrb[37].mxu1 }
 0x731   : > { %v1665_v39 = vadd.f32 %v1664_v28, %v4634_v13  ;;  %v1666_v14 = vpop.f32.mrb[38].mxu1 }
 0x732   : > { %v1667_v1 = vadd.f32 %v1666_v14, %v4637_v46  ;;  %v1668_v22 = vpop.f32.mrb[39].mxu1  ;;  %v1681_v29 = vmax.f32 %v1663_v24, 0.0 }
 0x733   : > { %v1669_v56 = vadd.f32 %v1668_v22, %v4637_v46  ;;  %v1682_v10 = vmax.f32 %v1665_v39, 0.0 }
 0x734   : > { %v1683_v17 = vmax.f32 %v1667_v1, 0.0 }
 0x735   : > { %v1684_v12 = vmax.f32 %v1669_v56, 0.0 }
 0x736   : > { %v1689_v54 = vpack.c.bf16 %v1683_v17, %v1681_v29 }
 0x737   : > { %v1690_v11 = vpack.c.bf16 %v1684_v12, %v1682_v10  ;;  %v1672_v15 = vpop.f32.mrb[40].mxu1 }
 0x738   : > { %v1673_v59 = vadd.f32 %v1672_v15, %v4641_v51  ;;  %v1674_v61 = vpop.f32.mrb[41].mxu1 }
 0x739   : > { %v1675_v16 = vadd.f32 %v1674_v61, %v4641_v51  ;;  %v1676_v58 = vpop.f32.mrb[42].mxu1  ;;  %1693 = vmatprep.subr.bf16.mxu0 %v1690_v11 }
 0x73a   : > { %v1677_v28 = vadd.f32 %v1676_v58, %v4645_v62  ;;  %v1678_v14 = vpop.f32.mrb[43].mxu1  ;;  %1694 = vmatpush1.bf16.msra.mxu0 %v1689_v54  ;;  %v1685_v24 = vmax.f32 %v1673_v59, 0.0 }
 0x73b   : > { %v1679_v22 = vadd.f32 %v1678_v14, %v4645_v62  ;;  %v1686_v39 = vmax.f32 %v1675_v16, 0.0 }
 0x73c   : > { %v1687_v1 = vmax.f32 %v1677_v28, 0.0 }
 0x73d   : > { %v1688_v56 = vmax.f32 %v1679_v22, 0.0 }
 0x73e   : > { %v1691_v29 = vpack.c.bf16 %v1687_v1, %v1685_v24 }
 0x73f   : > { %v1692_v17 = vpack.c.bf16 %v1688_v56, %v1686_v39 }
 0x741   : > { %1695 = vmatprep.subr.bf16.mxu0 %v1692_v17 }
 0x742   : > { %1696 = vmatpush1.bf16.msra.mxu0 %v1691_v29 }
 0x743   : > { %1774 = vmatprep.subr.bf16.mxu0 %v4854_v19 }
 0x745   : > { %3871 = vmatmul.mubr.msk.bf16.vlgmr.msra.gmra.mrb[44].mxu0 %vm478_vm0, %v4653_v44 }
 0x746   : > { %1735 = vmatprep.mubr.bf16.mxu0 %v6054_v57  ;;  %1775 = vmatpush1.bf16.msra.mxu0 %v4857_v20 }
 0x747   : > { %1776 = vmatprep.subr.bf16.mxu0 %v4861_v21 }
 0x74a   : > { %1777 = vmatpush1.bf16.msra.mxu0 %v4873_v23 }
 0x74b   : > { %1778 = vmatprep.subr.bf16.mxu0 %v4877_v25 }
 0x74d   : > { %3872 = vmatmul.mubr.msk.bf16.gmra.mrb[48].mxu0 %vm478_vm0, %v4664_v45 }
 0x74e   : > { %1745 = vmatprep.mubr.bf16.mxu0 %v6054_v57  ;;  %1779 = vmatpush1.bf16.msra.mxu0 %v4881_v26 }
 0x74f   : > { %1780 = vmatprep.subr.bf16.mxu0 %v4885_v27 }
 0x752   : > { %1781 = vmatpush1.bf16.msra.mxu0 %v4896_v30 }
 0x753   : > { %1782 = vmatprep.subr.bf16.mxu0 %v4900_v31 }
 0x755   : > { %3873 = vmatmul.mubr.msk.bf16.gmra.mrb[52].mxu0 %vm478_vm0, %v4676_v47 }
 0x756   : > { %1755 = vmatprep.mubr.bf16.mxu0 %v6054_v57  ;;  %1783 = vmatpush1.bf16.msra.mxu0 %v4904_v32 }
 0x757   : > { %1784 = vmatprep.subr.bf16.mxu0 %v4908_v33 }
 0x75a   : > { %1785 = vmatpush1.bf16.msra.mxu0 %v4912_v34 }
 0x75b   : > { %1786 = vmatprep.subr.bf16.mxu0 %v4916_v35 }
 0x75d   : > { %3874 = vmatmul.mubr.msk.bf16.gmra.mrb[56].mxu0 %vm478_vm0, %v4688_v48 }
 0x75e   : > { %1787 = vmatpush1.bf16.msra.mxu0 %v4920_v36 }
 0x75f   : > { %1788 = vmatprep.subr.bf16.mxu0 %v4924_v37 }
 0x762   : > { %1789 = vmatpush1.bf16.msra.mxu0 %v4928_v38 }
 0x763   : > { %1790 = vmatprep.subr.bf16.mxu0 %v4932_v40 }
 0x766   : > { %1791 = vmatpush1.bf16.msra.mxu0 %v4936_v41 }
 0x767   : > { %1792 = vmatprep.subr.bf16.mxu0 %v4940_v42 }
 0x76a   : > { %1793 = vmatpush1.bf16.msra.mxu0 %v4944_v43 }
 0x76b   : > { %1794 = vmatprep.subr.bf16.mxu0 %v4948_v0 }
 0x76e   : > { %1795 = vmatpush1.bf16.msra.mxu0 %v4952_v6 }
 0x76f   : > { %1796 = vmatprep.subr.bf16.mxu0 %v4956_v63 }
 0x772   : > { %1797 = vmatpush1.bf16.msra.mxu0 %v4960_v49 }
 0x773   : > { %1798 = vmatprep.subr.bf16.mxu0 %v4964_v60 }
 0x776   : > { %1799 = vmatpush1.bf16.msra.mxu0 %v4969_v2 }
 0x777   : > { %1800 = vmatprep.subr.bf16.mxu0 %v4973_v5 }
 0x77a   : > { %1801 = vmatpush1.bf16.msra.mxu0 %v4976_v3 }
 0x77b   : > { %1802 = vmatprep.subr.bf16.mxu0 %v4981_v7 }
 0x77e   : > { %1803 = vmatpush1.bf16.msra.mxu0 %v4984_v18 }
 0x77f   : > { %1804 = vmatprep.subr.bf16.mxu0 %v4989_v52 }
 0x782   : > { %1805 = vmatpush1.bf16.msra.mxu0 %v4992_v53 }
 0x818   : > { %v1727_v44 = vpop.f32.mrb[44].mxu0 }
 0x819   : > { %v1729_v45 = vpop.f32.mrb[45].mxu0 }
 0x81a   : > { %v1731_v47 = vpop.f32.mrb[46].mxu0 }
 0x81b   : > { %v1766_v48 = vpack.c.bf16 %v1731_v47, %v1727_v44  ;;  %v1733_v61 = vpop.f32.mrb[47].mxu0 }
 0x81c   : > { %v1767_v58 = vpack.c.bf16 %v1733_v61, %v1729_v45 }
 0x81e   : > { %1806 = vmatprep.mubr.bf16.mxu0 %v1767_v58 }
 0x81f   : > { %1807 = vmatmul.mubr.bf16.vlgmr.msra.gmra.mrb[60].mxu0 %v1766_v48 }
 0x820   : > { %v1737_v54 = vpop.f32.mrb[48].mxu0 }
 0x821   : > { %v1739_v11 = vpop.f32.mrb[49].mxu0 }
 0x822   : > { %v1741_v10 = vpop.f32.mrb[50].mxu0 }
 0x823   : > { %v1768_v12 = vpack.c.bf16 %v1741_v10, %v1737_v54  ;;  %v1743_v15 = vpop.f32.mrb[51].mxu0 }
 0x824   : > { %v1769_v59 = vpack.c.bf16 %v1743_v15, %v1739_v11 }
 0x826   : > { %1816 = vmatprep.mubr.bf16.mxu0 %v1769_v59 }
 0x827   : > { %1817 = vmatmul.mubr.bf16.gmra.mrb[64].mxu0 %v1768_v12 }
 0x828   : > { %v1747_v16 = vpop.f32.mrb[52].mxu0 }
 0x829   : > { %v1749_v28 = vpop.f32.mrb[53].mxu0 }
 0x82a   : > { %v1751_v14 = vpop.f32.mrb[54].mxu0 }
 0x82b   : > { %v1770_v22 = vpack.c.bf16 %v1751_v14, %v1747_v16  ;;  %v1753_v24 = vpop.f32.mrb[55].mxu0 }
 0x82c   : > { %v1771_v1 = vpack.c.bf16 %v1753_v24, %v1749_v28 }
 0x82e   : > { %1826 = vmatprep.mubr.bf16.mxu0 %v1771_v1 }
 0x82f   : > { %1827 = vmatmul.mubr.bf16.gmra.mrb[68].mxu0 %v1770_v22 }
 0x830   : > { %v1757_v39 = vpop.f32.mrb[56].mxu0 }
 0x831   : > { %v1759_v56 = vpop.f32.mrb[57].mxu0 }
 0x832   : > { %v1761_v29 = vpop.f32.mrb[58].mxu0 }
 0x833   : > { %v1772_v17 = vpack.c.bf16 %v1761_v29, %v1757_v39  ;;  %v1763_v44 = vpop.f32.mrb[59].mxu0 }
 0x834   : > { %v1773_v45 = vpack.c.bf16 %v1763_v44, %v1759_v56 }
 0x836   : > { %1836 = vmatprep.mubr.bf16.mxu0 %v1773_v45 }
 0x837   : > { %1837 = vmatmul.mubr.bf16.gmra.mrb[72].mxu0 %v1772_v17 }
 0x838   : > { %2025 = vmatprep.mubr.bf16.mxu0 %v6054_v57 }
 0x8f2   : > { %v1808_v47 = vpop.f32.mrb[60].mxu0 }
 0x8f3   : > { %v1809_v48 = vadd.f32 %v1808_v47, %v4745_v50  ;;  %v1810_v61 = vpop.f32.mrb[61].mxu0 }
 0x8f4   : > { %v1811_v58 = vadd.f32 %v1810_v61, %v4745_v50  ;;  %v1812_v54 = vpop.f32.mrb[62].mxu0  ;;  %v5222_v50 = vld [vmem:[%s4445_s15 + $0x2d4] ss:$8 sps:$4 sm:$0xff]  }
 0x8f5   : > { %v1813_v11 = vadd.f32 %v1812_v54, %v4748_v55  ;;  %v1814_v10 = vpop.f32.mrb[63].mxu0  ;;  %v1847_v15 = vmax.f32 %v1809_v48, 0.0  ;;  %6092 = vst [vmem:[#allocation38_spill] sm:$0xff] %v5222_v50 }
 0x8f6   : > { %v1815_v12 = vadd.f32 %v1814_v10, %v4748_v55  ;;  %v1848_v16 = vmax.f32 %v1811_v58, 0.0  ;;  %v5217_v55 = vld [vmem:[%s4445_s15 + $0x2c0] ss:$8 sps:$4 sm:$0xff]  }
 0x8f7   : > { %v1849_v59 = vmax.f32 %v1813_v11, 0.0  ;;  %6091 = vst [vmem:[#allocation37_spill] sm:$0xff] %v5217_v55 }
 0x8f8   : > { %v1850_v28 = vmax.f32 %v1815_v12, 0.0  ;;  %v6065_v12 = vld [vmem:[#allocation7_spill] sm:$0xff] }
 0x8f9   : > { %v1863_v14 = vpack.c.bf16 %v1849_v59, %v1847_v15 }
 0x8fa   : > { %v1864_v22 = vpack.c.bf16 %v1850_v28, %v1848_v16  ;;  %v1818_v24 = vpop.f32.mrb[64].mxu0 }
 0x8fb   : > { %v1819_v1 = vadd.f32 %v1818_v24, %v4753_v4  ;;  %v1820_v39 = vpop.f32.mrb[65].mxu0 }
 0x8fc   : > { %v1821_v56 = vadd.f32 %v1820_v39, %v4753_v4  ;;  %v1822_v29 = vpop.f32.mrb[66].mxu0  ;;  %1871 = vmatprep.subr.bf16.mxu1 %v1864_v22  ;;  %v5214_v4 = vld [vmem:[%s4445_s15 + $0x2c4] ss:$8 sps:$4 sm:$0xff]  }
 0x8fd   : > { %v1823_v17 = vadd.f32 %v1822_v29, %v4756_v9  ;;  %v1824_v44 = vpop.f32.mrb[67].mxu0  ;;  %1872 = vmatpush1.bf16.msra.mxu1 %v1863_v14  ;;  %v1851_v47 = vmax.f32 %v1819_v1, 0.0  ;;  %6090 = vst [vmem:[#allocation36_spill] sm:$0xff] %v5214_v4 }
 0x8fe   : > { %v1825_v45 = vadd.f32 %v1824_v44, %v4756_v9  ;;  %v1852_v61 = vmax.f32 %v1821_v56, 0.0  ;;  %v5209_v9 = vld [vmem:[%s4445_s15 + $0x2b0] ss:$8 sps:$4 sm:$0xff]  }
 0x8ff   : > { %v1853_v48 = vmax.f32 %v1823_v17, 0.0  ;;  %6089 = vst [vmem:[#allocation35_spill] sm:$0xff] %v5209_v9 }
 0x900   : > { %v1854_v58 = vmax.f32 %v1825_v45, 0.0 }
 0x901   : > { %v1865_v54 = vpack.c.bf16 %v1853_v48, %v1851_v47  ;;  %v6066_v47 = vld [vmem:[#allocation9_spill] sm:$0xff] }
 0x902   : > { %v1866_v11 = vpack.c.bf16 %v1854_v58, %v1852_v61  ;;  %v1828_v10 = vpop.f32.mrb[68].mxu0 }
 0x903   : > { %v1829_v15 = vadd.f32 %v1828_v10, %v6065_v12  ;;  %v1830_v59 = vpop.f32.mrb[69].mxu0 }
 0x904   : > { %v1831_v16 = vadd.f32 %v1830_v59, %v6065_v12  ;;  %v1832_v28 = vpop.f32.mrb[70].mxu0  ;;  %1873 = vmatprep.subr.bf16.mxu1 %v1866_v11  ;;  %v6067_v11 = vld [vmem:[#allocation10_spill] sm:$0xff] }
 0x905   : > { %v1833_v22 = vadd.f32 %v1832_v28, %v4764_v8  ;;  %v1834_v24 = vpop.f32.mrb[71].mxu0  ;;  %1874 = vmatpush1.bf16.msra.mxu1 %v1865_v54  ;;  %v1855_v1 = vmax.f32 %v1829_v15, 0.0  ;;  %v5206_v12 = vld [vmem:[%s4445_s15 + $0x2b4] ss:$8 sps:$4 sm:$0xff]  }
 0x906   : > { %v1835_v14 = vadd.f32 %v1834_v24, %v4764_v8  ;;  %v1856_v56 = vmax.f32 %v1831_v16, 0.0  ;;  %v5202_v8 = vld [vmem:[%s4445_s15 + $0x2a0] ss:$8 sps:$4 sm:$0xff]   ;;  %6088 = vst [vmem:[#allocation34_spill] sm:$0xff] %v5206_v12 }
 0x907   : > { %v1857_v39 = vmax.f32 %v1833_v22, 0.0  ;;  %6087 = vst [vmem:[#allocation33_spill] sm:$0xff] %v5202_v8 }
 0x908   : > { %v1858_v29 = vmax.f32 %v1835_v14, 0.0 }
 0x909   : > { %v1867_v17 = vpack.c.bf16 %v1857_v39, %v1855_v1  ;;  %v6068_v39 = vld [vmem:[#allocation11_spill] sm:$0xff] }
 0x90a   : > { %v1868_v44 = vpack.c.bf16 %v1858_v29, %v1856_v56  ;;  %v1838_v45 = vpop.f32.mrb[72].mxu0  ;;  %v6069_v56 = vld [vmem:[#allocation12_spill] sm:$0xff] }
 0x90b   : > { %v1839_v48 = vadd.f32 %v1838_v45, %v6066_v47  ;;  %v1840_v61 = vpop.f32.mrb[73].mxu0  ;;  %v2077_v29 = vld [vmem:[%s4436_s29 + $0x10] sm:$0xff] }
 0x90c   : > { %v1841_v58 = vadd.f32 %v1840_v61, %v6066_v47  ;;  %v1842_v10 = vpop.f32.mrb[74].mxu0  ;;  %1875 = vmatprep.subr.bf16.mxu1 %v1868_v44  ;;  %v5197_v47 = vld [vmem:[%s4445_s15 + $0x2a4] ss:$8 sps:$4 sm:$0xff]  }
 0x90d   : > { %v1843_v59 = vadd.f32 %v1842_v10, %v6067_v11  ;;  %v1844_v28 = vpop.f32.mrb[75].mxu0  ;;  %1876 = vmatpush1.bf16.msra.mxu1 %v1867_v17  ;;  %v1859_v15 = vmax.f32 %v1839_v48, 0.0  ;;  %v2078_v17 = vld [vmem:[%s4436_s29 + $0x30] sm:$0xff]  ;;  %6086 = vst [vmem:[#allocation32_spill] sm:$0xff] %v5197_v47 }
 0x90e   : > { %v1845_v54 = vadd.f32 %v1844_v28, %v6067_v11  ;;  %v1860_v16 = vmax.f32 %v1841_v58, 0.0  ;;  %v3879_v44 = vcombine.high %v2077_v29, %v2078_v17  ;;  %v3878_v45 = vcombine.low %v2077_v29, %v2078_v17  ;;  %v2079_v10 = vld [vmem:[%s4436_s29 + $0x50] sm:$0xff] }
 0x90f   : > { %v1861_v22 = vmax.f32 %v1843_v59, 0.0  ;;  %v2080_v59 = vld [vmem:[%s4436_s29 + $0x70] sm:$0xff] }
 0x910   : > { %v1862_v24 = vmax.f32 %v1845_v54, 0.0  ;;  %v5193_v11 = vld [vmem:[%s4445_s15 + $0x290] ss:$8 sps:$4 sm:$0xff]  }
 0x911   : > { %v1869_v14 = vpack.c.bf16 %v1861_v22, %v1859_v15  ;;  %v3881_v22 = vcombine.high %v2079_v10, %v2080_v59  ;;  %6085 = vst [vmem:[#allocation31_spill] sm:$0xff] %v5193_v11 }
 0x912   : > { %v1870_v1 = vpack.c.bf16 %v1862_v24, %v1860_v16  ;;  %v3880_v24 = vcombine.low %v2079_v10, %v2080_v59  ;;  %v5135_v10 = vld [vmem:[%s4445_s15 + $0x220] ss:$8 sps:$4 sm:$0xff]   ;;  %v5139_v59 = vld [vmem:[%s4445_s15 + $0x234] ss:$8 sps:$4 sm:$0xff]  }
 0x913   : > { %6071 = vst [vmem:[#allocation11_spill] sm:$0xff] %v5139_v59 }
 0x914   : > { %1877 = vmatprep.subr.bf16.mxu1 %v1870_v1  ;;  %v5112_v1 = vld [vmem:[%s4445_s15 + $0x204] ss:$8 sps:$4 sm:$0xff]  }
 0x915   : > { %1878 = vmatpush1.bf16.msra.mxu1 %v1869_v14 }
 0x916   : > { %1928 = vmatprep.subr.bf16.mxu1 %v4854_v19 }
 0x918   : > { %3875 = vmatmul.mubr.msk.bf16.vlgmr.msra.gmra.mrb[44].mxu1 %vm1103_vm1, %v6068_v39 }
 0x919   : > { %1913 = vmatprep.mubr.bf16.mxu1 %v6054_v57  ;;  %1929 = vmatpush1.bf16.msra.mxu1 %v4857_v20 }
 0x91a   : > { %1930 = vmatprep.subr.bf16.mxu1 %v4861_v21 }
 0x91d   : > { %1931 = vmatpush1.bf16.msra.mxu1 %v4873_v23 }
 0x91e   : > { %1932 = vmatprep.subr.bf16.mxu1 %v4877_v25 }
 0x920   : > { %3876 = vmatmul.mubr.msk.bf16.gmra.mrb[48].mxu1 %vm1103_vm1, %v6069_v56 }
 0x921   : > { %1933 = vmatpush1.bf16.msra.mxu1 %v4881_v26 }
 0x922   : > { %1934 = vmatprep.subr.bf16.mxu1 %v4885_v27 }
 0x925   : > { %1935 = vmatpush1.bf16.msra.mxu1 %v4896_v30 }
 0x926   : > { %1936 = vmatprep.subr.bf16.mxu1 %v4900_v31 }
 0x929   : > { %1937 = vmatpush1.bf16.msra.mxu1 %v4904_v32 }
 0x92a   : > { %1938 = vmatprep.subr.bf16.mxu1 %v4908_v33 }
 0x92d   : > { %1939 = vmatpush1.bf16.msra.mxu1 %v4912_v34 }
 0x92e   : > { %1940 = vmatprep.subr.bf16.mxu1 %v4916_v35 }
 0x931   : > { %1941 = vmatpush1.bf16.msra.mxu1 %v4920_v36 }
 0x932   : > { %1942 = vmatprep.subr.bf16.mxu1 %v4924_v37 }
 0x935   : > { %1943 = vmatpush1.bf16.msra.mxu1 %v4928_v38 }
 0x936   : > { %1944 = vmatprep.subr.bf16.mxu1 %v4932_v40 }
 0x939   : > { %1945 = vmatpush1.bf16.msra.mxu1 %v4936_v41 }
 0x93a   : > { %1946 = vmatprep.subr.bf16.mxu1 %v4940_v42 }
 0x93d   : > { %1947 = vmatpush1.bf16.msra.mxu1 %v4944_v43 }
 0x93e   : > { %1948 = vmatprep.subr.bf16.mxu1 %v4948_v0 }
 0x941   : > { %1949 = vmatpush1.bf16.msra.mxu1 %v4952_v6 }
 0x942   : > { %1950 = vmatprep.subr.bf16.mxu1 %v4956_v63 }
 0x945   : > { %1951 = vmatpush1.bf16.msra.mxu1 %v4960_v49 }
 0x946   : > { %1952 = vmatprep.subr.bf16.mxu1 %v4964_v60 }
 0x949   : > { %1953 = vmatpush1.bf16.msra.mxu1 %v4969_v2 }
 0x94a   : > { %1954 = vmatprep.subr.bf16.mxu1 %v4973_v5 }
 0x94d   : > { %1955 = vmatpush1.bf16.msra.mxu1 %v4976_v3 }
 0x94e   : > { %1956 = vmatprep.subr.bf16.mxu1 %v4981_v7 }
 0x951   : > { %1957 = vmatpush1.bf16.msra.mxu1 %v4984_v18 }
 0x952   : > { %1958 = vmatprep.subr.bf16.mxu1 %v4989_v52 }
 0x955   : > { %1959 = vmatpush1.bf16.msra.mxu1 %v4992_v53 }
 0x956   : > { %2101 = vmatprep.subr.bf16.mxu1 %v3879_v44  ;;  %v5117_v44 = vld [vmem:[%s4445_s15 + $0x200] ss:$8 sps:$4 sm:$0xff]  }
 0x9eb   : > { %v1905_v48 = vpop.f32.mrb[44].mxu1 }
 0x9ec   : > { %v1907_v61 = vpop.f32.mrb[45].mxu1 }
 0x9ed   : > { %v1909_v58 = vpop.f32.mrb[46].mxu1 }
 0x9ee   : > { %v1924_v28 = vpack.c.bf16 %v1909_v58, %v1905_v48  ;;  %v1911_v54 = vpop.f32.mrb[47].mxu1  ;;  %v6070_v48 = vld [vmem:[#allocation18_spill] sm:$0xff]  ;;  %v5131_v58 = vld [vmem:[%s4445_s15 + $0x224] ss:$8 sps:$4 sm:$0xff]  }
 0x9ef   : > { %v1925_v15 = vpack.c.bf16 %v1911_v54, %v1907_v61  ;;  %v5127_v61 = vld [vmem:[%s4445_s15 + $0x210] ss:$8 sps:$4 sm:$0xff]  }
 0x9f0   : > { %v5145_v54 = vld [vmem:[%s4445_s15 + $0x230] ss:$8 sps:$4 sm:$0xff]  }
 0x9f1   : > { %1960 = vmatprep.mubr.bf16.mxu1 %v1925_v15  ;;  %6073 = vst [vmem:[#allocation12_spill] sm:$0xff] %v5145_v54  ;;  %v5149_v15 = vld [vmem:[%s4445_s15 + $0x244] ss:$8 sps:$4 sm:$0xff]  }
 0x9f2   : > { %1961 = vmatmul.mubr.bf16.vlgmr.msra.gmra.mrb[52].mxu1 %v1924_v28  ;;  %v6072_v28 = vld [vmem:[#allocation19_spill] sm:$0xff]  ;;  %6074 = vst [vmem:[#allocation18_spill] sm:$0xff] %v5149_v15 }
 0x9f3   : > { %v1915_v16 = vpop.f32.mrb[48].mxu1  ;;  %2102 = vmatpush1.bf16.msra.mxu1 %v3878_v45  ;;  %v5120_v45 = vld [vmem:[%s4445_s15 + $0x214] ss:$8 sps:$4 sm:$0xff]  }
 0x9f4   : > { %v1917_v14 = vpop.f32.mrb[49].mxu1  ;;  %2103 = vmatprep.subr.bf16.mxu1 %v3881_v22  ;;  %v5153_v22 = vld [vmem:[%s4445_s15 + $0x240] ss:$8 sps:$4 sm:$0xff]  }
 0x9f5   : > { %v1919_v39 = vpop.f32.mrb[50].mxu1  ;;  %6075 = vst [vmem:[#allocation19_spill] sm:$0xff] %v5153_v22 }
 0x9f6   : > { %v1926_v56 = vpack.c.bf16 %v1919_v39, %v1915_v16  ;;  %v1921_v29 = vpop.f32.mrb[51].mxu1  ;;  %v5157_v16 = vld [vmem:[%s4445_s15 + $0x254] ss:$8 sps:$4 sm:$0xff]   ;;  %v5169_v39 = vld [vmem:[%s4445_s15 + $0x260] ss:$8 sps:$4 sm:$0xff]  }
 0x9f7   : > { %v1927_v17 = vpack.c.bf16 %v1921_v29, %v1917_v14  ;;  %2104 = vmatpush1.bf16.msra.mxu1 %v3880_v24  ;;  %6076 = vst [vmem:[#allocation22_spill] sm:$0xff] %v5157_v16  ;;  %v5161_v24 = vld [vmem:[%s4445_s15 + $0x250] ss:$8 sps:$4 sm:$0xff]   ;;  %v5165_v14 = vld [vmem:[%s4445_s15 + $0x264] ss:$8 sps:$4 sm:$0xff]   ;;  %6079 = vst [vmem:[#allocation25_spill] sm:$0xff] %v5169_v39 }
 0x9f8   : > { %2351 = vmatprep.subr.bf16.mxu1 %v5112_v1  ;;  %6077 = vst [vmem:[#allocation23_spill] sm:$0xff] %v5161_v24  ;;  %6078 = vst [vmem:[#allocation24_spill] sm:$0xff] %v5165_v14  ;;  %v5177_v29 = vld [vmem:[%s4445_s15 + $0x270] ss:$8 sps:$4 sm:$0xff]  }
 0x9f9   : > { %1970 = vmatprep.mubr.bf16.mxu1 %v1927_v17  ;;  %6081 = vst [vmem:[#allocation27_spill] sm:$0xff] %v5177_v29  ;;  %v5181_v17 = vld [vmem:[%s4445_s15 + $0x284] ss:$8 sps:$4 sm:$0xff]  }
 0x9fa   : > { %1971 = vmatmul.mubr.bf16.gmra.mrb[56].mxu1 %v1926_v56  ;;  %v5173_v56 = vld [vmem:[%s4445_s15 + $0x274] ss:$8 sps:$4 sm:$0xff]   ;;  %6082 = vst [vmem:[#allocation28_spill] sm:$0xff] %v5181_v17 }
 0x9fb   : > { %2133 = vmatprep.mubr.bf16.mxu1 %v6054_v57  ;;  %6080 = vst [vmem:[#allocation26_spill] sm:$0xff] %v5173_v56 }
 0xa02   : > { %3882 = vmatmul.mubr.msk.bf16.vlgmr.msra.gmra.mrb[60].mxu1 %vm478_vm0, %v6070_v48  ;;  %v5185_v48 = vld [vmem:[%s4445_s15 + $0x280] ss:$8 sps:$4 sm:$0xff]  }
 0xa03   : > { %2143 = vmatprep.mubr.bf16.mxu1 %v6054_v57  ;;  %2352 = vmatpush1.bf16.msra.mxu1 %v5117_v44  ;;  %6083 = vst [vmem:[#allocation29_spill] sm:$0xff] %v5185_v48 }
 0xa04   : > { %2353 = vmatprep.subr.bf16.mxu1 %v5120_v45 }
 0xa07   : > { %2354 = vmatpush1.bf16.msra.mxu1 %v5127_v61 }
 0xa08   : > { %2355 = vmatprep.subr.bf16.mxu1 %v5131_v58 }
 0xa0a   : > { %3883 = vmatmul.mubr.msk.bf16.gmra.mrb[64].mxu1 %vm478_vm0, %v6072_v28  ;;  %v5189_v28 = vld [vmem:[%s4445_s15 + $0x294] ss:$8 sps:$4 sm:$0xff]  }
 0xa0b   : > { %2356 = vmatpush1.bf16.msra.mxu1 %v5135_v10  ;;  %6084 = vst [vmem:[#allocation30_spill] sm:$0xff] %v5189_v28 }
 0xa0c   : > { %2357 = vmatprep.subr.bf16.mxu1 %v5139_v59 }
 0xa0f   : > { %2358 = vmatpush1.bf16.msra.mxu1 %v5145_v54 }
 0xa10   : > { %2359 = vmatprep.subr.bf16.mxu1 %v5149_v15 }
 0xa13   : > { %2360 = vmatpush1.bf16.msra.mxu1 %v5153_v22 }
 0xa14   : > { %2361 = vmatprep.subr.bf16.mxu1 %v5157_v16 }
 0xa17   : > { %2362 = vmatpush1.bf16.msra.mxu1 %v5161_v24 }
 0xa18   : > { %2363 = vmatprep.subr.bf16.mxu1 %v5165_v14 }
 0xa1b   : > { %2364 = vmatpush1.bf16.msra.mxu1 %v5169_v39 }
 0xa1c   : > { %2365 = vmatprep.subr.bf16.mxu1 %v5173_v56 }
 0xa1f   : > { %2366 = vmatpush1.bf16.msra.mxu1 %v5177_v29 }
 0xa20   : > { %2367 = vmatprep.subr.bf16.mxu1 %v5181_v17  ;;  %v6099_v17 = vld [vmem:[#allocation14_spill] sm:$0xff] }
 0xa23   : > { %2368 = vmatpush1.bf16.msra.mxu1 %v5185_v48 }
 0xa24   : > { %2369 = vmatprep.subr.bf16.mxu1 %v5189_v28 }
 0xa27   : > { %2370 = vmatpush1.bf16.msra.mxu1 %v5193_v11 }
 0xa28   : > { %2371 = vmatprep.subr.bf16.mxu1 %v5197_v47  ;;  %v5230_v47 = vld [vmem:[%s4445_s15 + $0x2e4] ss:$8 sps:$4 sm:$0xff]  }
 0xa29   : > { %6094 = vst [vmem:[#allocation40_spill] sm:$0xff] %v5230_v47 }
 0xa2b   : > { %2372 = vmatpush1.bf16.msra.mxu1 %v5202_v8  ;;  %v5225_v8 = vld [vmem:[%s4445_s15 + $0x2d0] ss:$8 sps:$4 sm:$0xff]  }
 0xa2c   : > { %2373 = vmatprep.subr.bf16.mxu1 %v5206_v12  ;;  %6093 = vst [vmem:[#allocation39_spill] sm:$0xff] %v5225_v8  ;;  %v5233_v12 = vld [vmem:[%s4445_s15 + $0x2e0] ss:$8 sps:$4 sm:$0xff]  }
 0xa2d   : > { %6095 = vst [vmem:[#allocation41_spill] sm:$0xff] %v5233_v12 }
 0xa2f   : > { %2374 = vmatpush1.bf16.msra.mxu1 %v5209_v9  ;;  %v5238_v9 = vld [vmem:[%s4445_s15 + $0x2f4] ss:$8 sps:$4 sm:$0xff]  }
 0xa30   : > { %2375 = vmatprep.subr.bf16.mxu1 %v5214_v4  ;;  %6096 = vst [vmem:[#allocation42_spill] sm:$0xff] %v5238_v9  ;;  %v5241_v4 = vld [vmem:[%s4445_s15 + $0x2f0] ss:$8 sps:$4 sm:$0xff]  }
 0xa31   : > { %6097 = vst [vmem:[#allocation43_spill] sm:$0xff] %v5241_v4 }
 0xa33   : > { %2376 = vmatpush1.bf16.msra.mxu1 %v5217_v55 }
 0xa34   : > { %2377 = vmatprep.subr.bf16.mxu1 %v5222_v50  ;;  %v6098_v50 = vld [vmem:[#allocation13_spill] sm:$0xff] }
 0xa37   : > { %2378 = vmatpush1.bf16.msra.mxu1 %v5225_v8 }
 0xa38   : > { %2379 = vmatprep.subr.bf16.mxu1 %v5230_v47 }
 0xa3b   : > { %2380 = vmatpush1.bf16.msra.mxu1 %v5233_v12 }
 0xa3c   : > { %2381 = vmatprep.subr.bf16.mxu1 %v5238_v9 }
 0xa3f   : > { %2382 = vmatpush1.bf16.msra.mxu1 %v5241_v4  ;;  %v6100_v4 = vld [vmem:[#allocation15_spill] sm:$0xff] }
 0xac5   : > { %v1962_v55 = vpop.f32.mrb[52].mxu1 }
 0xac6   : > { %v1963_v11 = vadd.f32 %v1962_v55, %v6098_v50  ;;  %v1964_v8 = vpop.f32.mrb[53].mxu1 }
 0xac7   : > { %v1965_v28 = vadd.f32 %v1964_v8, %v6098_v50  ;;  %v1966_v48 = vpop.f32.mrb[54].mxu1  ;;  %v6101_v8 = vld [vmem:[#allocation16_spill] sm:$0xff] }
 0xac8   : > { %v1967_v29 = vadd.f32 %v1966_v48, %v6099_v17  ;;  %v1968_v47 = vpop.f32.mrb[55].mxu1  ;;  %v1981_v56 = vmax.f32 %v1963_v11, 0.0 }
 0xac9   : > { %v1969_v12 = vadd.f32 %v1968_v47, %v6099_v17  ;;  %v1982_v14 = vmax.f32 %v1965_v28, 0.0 }
 0xaca   : > { %v1983_v39 = vmax.f32 %v1967_v29, 0.0 }
 0xacb   : > { %v1984_v24 = vmax.f32 %v1969_v12, 0.0 }
 0xacc   : > { %v1989_v16 = vpack.c.bf16 %v1983_v39, %v1981_v56 }
 0xacd   : > { %v1990_v9 = vpack.c.bf16 %v1984_v24, %v1982_v14  ;;  %v1972_v22 = vpop.f32.mrb[56].mxu1 }
 0xace   : > { %v1973_v15 = vadd.f32 %v1972_v22, %v6100_v4  ;;  %v1974_v54 = vpop.f32.mrb[57].mxu1 }
 0xacf   : > { %v1975_v55 = vadd.f32 %v1974_v54, %v6100_v4  ;;  %v1976_v59 = vpop.f32.mrb[58].mxu1  ;;  %1993 = vmatprep.subr.bf16.mxu0 %v1990_v9 }
 0xad0   : > { %v1977_v50 = vadd.f32 %v1976_v59, %v6101_v8  ;;  %v1978_v48 = vpop.f32.mrb[59].mxu1  ;;  %1994 = vmatpush1.bf16.msra.mxu0 %v1989_v16  ;;  %v1985_v11 = vmax.f32 %v1973_v15, 0.0  ;;  %v6102_v59 = vld [vmem:[#allocation17_spill] sm:$0xff] }
 0xad1   : > { %v1979_v47 = vadd.f32 %v1978_v48, %v6101_v8  ;;  %v1986_v28 = vmax.f32 %v1975_v55, 0.0 }
 0xad2   : > { %v1987_v29 = vmax.f32 %v1977_v50, 0.0 }
 0xad3   : > { %v1988_v12 = vmax.f32 %v1979_v47, 0.0 }
 0xad4   : > { %v1991_v39 = vpack.c.bf16 %v1987_v29, %v1985_v11  ;;  %v5301_v29 = vld [vmem:[%s5899_s4] sm:$0xff]  }
 0xad5   : > { %v1992_v24 = vpack.c.bf16 %v1988_v12, %v1986_v28  ;;  %v2135_v14 = vpop.f32.mrb[60].mxu1  ;;  %v5313_v28 = vld [vmem:[%s5899_s4 + $0x8] sm:$0xff]  }
 0xad6   : > { %v2137_v56 = vpop.f32.mrb[61].mxu1  ;;  %v6103_v12 = vld [vmem:[#allocation11_spill] sm:$0xff] }
 0xad7   : > { %1995 = vmatprep.subr.bf16.mxu0 %v1992_v24  ;;  %v2139_v22 = vpop.f32.mrb[62].mxu1  ;;  %v6105_v24 = vld [vmem:[#allocation18_spill] sm:$0xff] }
 0xad8   : > { %v2154_v17 = vpack.c.bf16 %v2139_v22, %v2135_v14  ;;  %1996 = vmatpush1.bf16.msra.mxu0 %v1991_v39  ;;  %v2141_v54 = vpop.f32.mrb[63].mxu1  ;;  %v6104_v39 = vld [vmem:[#allocation12_spill] sm:$0xff]  ;;  %v6107_v22 = vld [vmem:[#allocation22_spill] sm:$0xff] }
 0xad9   : > { %v2155_v9 = vpack.c.bf16 %v2141_v54, %v2137_v56  ;;  %2036 = vmatprep.subr.bf16.mxu0 %v4854_v19  ;;  %v5325_v14 = vld [vmem:[%s5899_s4 + $0x10] sm:$0xff]   ;;  %v6106_v56 = vld [vmem:[#allocation19_spill] sm:$0xff] }
 0xada   : > { %v6108_v54 = vld [vmem:[#allocation23_spill] sm:$0xff] }
 0xadb   : > { %3877 = vmatmul.mubr.msk.bf16.vlgmr.msra.gmra.mrb[76].mxu0 %vm478_vm0, %v6102_v59  ;;  %2383 = vmatprep.mubr.bf16.mxu1 %v2155_v9  ;;  %v6109_v9 = vld [vmem:[#allocation24_spill] sm:$0xff]  ;;  %v5337_v59 = vld [vmem:[%s5899_s4 + $0x18] sm:$0xff]  }
 0xadc   : > { %2384 = vmatmul.mubr.bf16.vlgmr.msra.gmra.mrb[68].mxu1 %v2154_v17  ;;  %2037 = vmatpush1.bf16.msra.mxu0 %v4857_v20  ;;  %6110 = vst [vmem:[#allocation15_spill] sm:$0xff] %v5337_v59 }
 0xadd   : > { %v2145_v50 = vpop.f32.mrb[64].mxu1  ;;  %2038 = vmatprep.subr.bf16.mxu0 %v4861_v21 }
 0xade   : > { %v2147_v15 = vpop.f32.mrb[65].mxu1 }
 0xadf   : > { %v2149_v16 = vpop.f32.mrb[66].mxu1 }
 0xae0   : > { %v2156_v55 = vpack.c.bf16 %v2149_v16, %v2145_v50  ;;  %v2151_v48 = vpop.f32.mrb[67].mxu1  ;;  %2039 = vmatpush1.bf16.msra.mxu0 %v4873_v23  ;;  %v6111_v50 = vld [vmem:[#allocation25_spill] sm:$0xff]  ;;  %v6113_v16 = vld [vmem:[#allocation27_spill] sm:$0xff] }
 0xae1   : > { %v2157_v47 = vpack.c.bf16 %v2151_v48, %v2147_v15  ;;  %2040 = vmatprep.subr.bf16.mxu0 %v4877_v25  ;;  %v6112_v15 = vld [vmem:[#allocation26_spill] sm:$0xff]  ;;  %v6115_v48 = vld [vmem:[#allocation29_spill] sm:$0xff] }
 0xae3   : > { %2393 = vmatprep.mubr.bf16.mxu1 %v2157_v47  ;;  %v6116_v47 = vld [vmem:[#allocation30_spill] sm:$0xff] }
 0xae4   : > { %2394 = vmatmul.mubr.bf16.gmra.mrb[72].mxu1 %v2156_v55  ;;  %2041 = vmatpush1.bf16.msra.mxu0 %v4881_v26  ;;  %v6114_v55 = vld [vmem:[#allocation28_spill] sm:$0xff] }
 0xae5   : > { %2042 = vmatprep.subr.bf16.mxu0 %v4885_v27  ;;  %2626 = vmatprep.mubr.bf16.mxu1 %v6054_v57 }
 0xae8   : > { %2043 = vmatpush1.bf16.msra.mxu0 %v4896_v30 }
 0xae9   : > { %2044 = vmatprep.subr.bf16.mxu0 %v4900_v31 }
 0xaec   : > { %2045 = vmatpush1.bf16.msra.mxu0 %v4904_v32 }
 0xaed   : > { %2046 = vmatprep.subr.bf16.mxu0 %v4908_v33 }
 0xaf0   : > { %2047 = vmatpush1.bf16.msra.mxu0 %v4912_v34 }
 0xaf1   : > { %2048 = vmatprep.subr.bf16.mxu0 %v4916_v35 }
 0xaf4   : > { %2049 = vmatpush1.bf16.msra.mxu0 %v4920_v36 }
 0xaf5   : > { %2050 = vmatprep.subr.bf16.mxu0 %v4924_v37 }
 0xaf8   : > { %2051 = vmatpush1.bf16.msra.mxu0 %v4928_v38 }
 0xaf9   : > { %2052 = vmatprep.subr.bf16.mxu0 %v4932_v40 }
 0xafc   : > { %2053 = vmatpush1.bf16.msra.mxu0 %v4936_v41 }
 0xafd   : > { %2054 = vmatprep.subr.bf16.mxu0 %v4940_v42 }
 0xb00   : > { %2055 = vmatpush1.bf16.msra.mxu0 %v4944_v43 }
 0xb01   : > { %2056 = vmatprep.subr.bf16.mxu0 %v4948_v0 }
 0xb04   : > { %2057 = vmatpush1.bf16.msra.mxu0 %v4952_v6 }
 0xb05   : > { %2058 = vmatprep.subr.bf16.mxu0 %v4956_v63 }
 0xb08   : > { %2059 = vmatpush1.bf16.msra.mxu0 %v4960_v49 }
 0xb09   : > { %2060 = vmatprep.subr.bf16.mxu0 %v4964_v60 }
 0xb0c   : > { %2061 = vmatpush1.bf16.msra.mxu0 %v4969_v2 }
 0xb0d   : > { %2062 = vmatprep.subr.bf16.mxu0 %v4973_v5 }
 0xb10   : > { %2063 = vmatpush1.bf16.msra.mxu0 %v4976_v3 }
 0xb11   : > { %2064 = vmatprep.subr.bf16.mxu0 %v4981_v7 }
 0xb14   : > { %2065 = vmatpush1.bf16.msra.mxu0 %v4984_v18 }
 0xb15   : > { %2066 = vmatprep.subr.bf16.mxu0 %v4989_v52 }
 0xb18   : > { %2067 = vmatpush1.bf16.msra.mxu0 %v4992_v53 }
 0xbae   : > { %v2027_v19 = vpop.f32.mrb[76].mxu0 }
 0xbaf   : > { %v2034_v20 = vpack.c.bf16 %v2027_v19, %v2027_v19  ;;  %v2029_v21 = vpop.f32.mrb[77].mxu0  ;;  %v2385_v23 = vpop.f32.mrb[68].mxu1  ;;  %v6117_v19 = vld [vmem:[#allocation31_spill] sm:$0xff] }
 0xbb0   : > { %v2035_v25 = vpack.c.bf16 %v2029_v21, %v2029_v21  ;;  %v2386_v26 = vadd.f32 %v2385_v23, %v4634_v13  ;;  %v2387_v27 = vpop.f32.mrb[69].mxu1  ;;  %v2031_v30 = vpop.f32.mrb[78].mxu0  ;;  %v6119_v21 = vld [vmem:[#allocation33_spill] sm:$0xff]  ;;  %v6120_v23 = vld [vmem:[#allocation34_spill] sm:$0xff] }
 0xbb1   : > { %v2388_v31 = vadd.f32 %v2387_v27, %v4634_v13  ;;  %v2389_v32 = vpop.f32.mrb[70].mxu1  ;;  %v2032_v33 = vpop.f32.mrb[79].mxu0  ;;  %v6123_v27 = vld [vmem:[#allocation37_spill] sm:$0xff]  ;;  %v6124_v30 = vld [vmem:[#allocation38_spill] sm:$0xff] }
 0xbb2   : > { %v2390_v34 = vadd.f32 %v2389_v32, %v4637_v46  ;;  %2068 = vmatprep.mubr.bf16.mxu0 %v2035_v25  ;;  %v2391_v35 = vpop.f32.mrb[71].mxu1  ;;  %v2404_v37 = vmax.f32 %v2386_v26, 0.0  ;;  %v6121_v25 = vld [vmem:[#allocation35_spill] sm:$0xff]  ;;  %v6122_v26 = vld [vmem:[#allocation36_spill] sm:$0xff]  ;;  %v6127_v33 = vld [vmem:[#allocation41_spill] sm:$0xff] }
 0xbb3   : > { %v2392_v36 = vadd.f32 %v2391_v35, %v4637_v46  ;;  %2069 = vmatmul.mubr.bf16.vlgmr.msra.gmra.mrb[80].mxu0 %v2034_v20  ;;  %v2405_v40 = vmax.f32 %v2388_v31, 0.0  ;;  %v6118_v20 = vld [vmem:[#allocation32_spill] sm:$0xff]  ;;  %v6125_v31 = vld [vmem:[#allocation39_spill] sm:$0xff] }
 0xbb4   : > { %v2406_v38 = vmax.f32 %v2390_v34, 0.0  ;;  %2448 = vmatprep.mubr.bf16.mxu0 %v6054_v57  ;;  %v6126_v32 = vld [vmem:[#allocation40_spill] sm:$0xff]  ;;  %v6128_v34 = vld [vmem:[#allocation42_spill] sm:$0xff]  ;;  %v6129_v35 = vld [vmem:[#allocation43_spill] sm:$0xff] }
 0xbb5   : > { %v2407_v41 = vmax.f32 %v2392_v36, 0.0  ;;  %v1309_v36 = vlaneseq }
 0xbb6   : > { %v2412_v42 = vpack.c.bf16 %v2406_v38, %v2404_v37 }
 0xbb7   : > { %v2413_v43 = vpack.c.bf16 %v2407_v41, %v2405_v40  ;;  %v2395_v0 = vpop.f32.mrb[72].mxu1  ;;  %v1310_v37 = vshrl.u32 %v1309_v36, 7  ;;  %v1307_v40 = vpop.permute.xlu0 %1306 }
 0xbb8   : > { %v2396_v6 = vadd.f32 %v2395_v0, %v4641_v51  ;;  %v2397_v63 = vpop.f32.mrb[73].mxu1 }
 0xbb9   : > { %v2398_v49 = vadd.f32 %v2397_v63, %v4641_v51  ;;  %v2399_v60 = vpop.f32.mrb[74].mxu1  ;;  %2416 = vmatprep.subr.bf16.mxu0 %v2413_v43  ;;  %v1311_v38 = vsub.s32 0, %v1310_v37 }
 0xbba   : > { %v2400_v2 = vadd.f32 %v2399_v60, %v4645_v62  ;;  %v2401_v5 = vpop.f32.mrb[75].mxu1  ;;  %2417 = vmatpush1.bf16.msra.mxu0 %v2412_v42  ;;  %v2408_v7 = vmax.f32 %v2396_v6, 0.0 }
 0xbbb   : > { %v2402_v3 = vadd.f32 %v2401_v5, %v4645_v62  ;;  %v2409_v52 = vmax.f32 %v2398_v49, 0.0  ;;  %v5360_v41 = vrot.slane %v1307_v40, %v1311_v38  ;;  %v6131_v49 = vld [vmem:[#allocation20_spill] sm:$0xff] }
 0xbbc   : > { %v2410_v18 = vmax.f32 %v2400_v2, 0.0 }
 0xbbd   : > { %v2411_v53 = vmax.f32 %v2402_v3, 0.0  ;;  %6130 = vst [vmem:[#allocation16_spill] sm:$0xff] %v5360_v41  ;;  %v1348_v60 = vadd.f32 %v6131_v49, %v5360_v41  ;;  %v6132_v3 = vld [vmem:[#allocation21_spill] sm:$0xff] }
 0xbbe   : > { %v2414_v17 = vpack.c.bf16 %v2410_v18, %v2408_v7  ;;  %v1350_v7 = vadd.f32 %v6132_v3, %v5360_v41 }
 0xbbf   : > { %v2415_v11 = vpack.c.bf16 %v2411_v53, %v2409_v52 }
 0xbc1   : > { %2418 = vmatprep.subr.bf16.mxu0 %v2415_v11 }
 0xbc2   : > { %2419 = vmatpush1.bf16.msra.mxu0 %v2414_v17 }
 0xbc3   : > { %2497 = vmatprep.subr.bf16.mxu0 %v5112_v1 }
 0xbc5   : > { %3948 = vmatmul.mubr.msk.bf16.vlgmr.msra.gmra.mrb[84].mxu0 %vm478_vm0, %v5301_v29 }
 0xbc6   : > { %2458 = vmatprep.mubr.bf16.mxu0 %v6054_v57  ;;  %2498 = vmatpush1.bf16.msra.mxu0 %v5117_v44 }
 0xbc7   : > { %2499 = vmatprep.subr.bf16.mxu0 %v5120_v45 }
 0xbca   : > { %2500 = vmatpush1.bf16.msra.mxu0 %v5127_v61 }
 0xbcb   : > { %2501 = vmatprep.subr.bf16.mxu0 %v5131_v58 }
 0xbcd   : > { %3949 = vmatmul.mubr.msk.bf16.gmra.mrb[88].mxu0 %vm478_vm0, %v5313_v28 }
 0xbce   : > { %2468 = vmatprep.mubr.bf16.mxu0 %v6054_v57  ;;  %2502 = vmatpush1.bf16.msra.mxu0 %v5135_v10 }
 0xbcf   : > { %2503 = vmatprep.subr.bf16.mxu0 %v6103_v12 }
 0xbd2   : > { %2504 = vmatpush1.bf16.msra.mxu0 %v6104_v39 }
 0xbd3   : > { %2505 = vmatprep.subr.bf16.mxu0 %v6105_v24 }
 0xbd5   : > { %3950 = vmatmul.mubr.msk.bf16.gmra.mrb[92].mxu0 %vm478_vm0, %v5325_v14 }
 0xbd6   : > { %2478 = vmatprep.mubr.bf16.mxu0 %v6054_v57  ;;  %2506 = vmatpush1.bf16.msra.mxu0 %v6106_v56 }
 0xbd7   : > { %2507 = vmatprep.subr.bf16.mxu0 %v6107_v22 }
 0xbda   : > { %2508 = vmatpush1.bf16.msra.mxu0 %v6108_v54 }
 0xbdb   : > { %2509 = vmatprep.subr.bf16.mxu0 %v6109_v9 }
 0xbdd   : > { %3951 = vmatmul.mubr.msk.bf16.gmra.mrb[96].mxu0 %vm478_vm0, %v5337_v59 }
 0xbde   : > { %2510 = vmatpush1.bf16.msra.mxu0 %v6111_v50 }
 0xbdf   : > { %2511 = vmatprep.subr.bf16.mxu0 %v6112_v15 }
 0xbe2   : > { %2512 = vmatpush1.bf16.msra.mxu0 %v6113_v16 }
 0xbe3   : > { %2513 = vmatprep.subr.bf16.mxu0 %v6114_v55 }
 0xbe6   : > { %2514 = vmatpush1.bf16.msra.mxu0 %v6115_v48 }
 0xbe7   : > { %2515 = vmatprep.subr.bf16.mxu0 %v6116_v47 }
 0xbea   : > { %2516 = vmatpush1.bf16.msra.mxu0 %v6117_v19 }
 0xbeb   : > { %2517 = vmatprep.subr.bf16.mxu0 %v6118_v20 }
 0xbee   : > { %2518 = vmatpush1.bf16.msra.mxu0 %v6119_v21 }
 0xbef   : > { %2519 = vmatprep.subr.bf16.mxu0 %v6120_v23 }
 0xbf2   : > { %2520 = vmatpush1.bf16.msra.mxu0 %v6121_v25 }
 0xbf3   : > { %2521 = vmatprep.subr.bf16.mxu0 %v6122_v26 }
 0xbf6   : > { %2522 = vmatpush1.bf16.msra.mxu0 %v6123_v27 }
 0xbf7   : > { %2523 = vmatprep.subr.bf16.mxu0 %v6124_v30 }
 0xbfa   : > { %2524 = vmatpush1.bf16.msra.mxu0 %v6125_v31 }
 0xbfb   : > { %2525 = vmatprep.subr.bf16.mxu0 %v6126_v32 }
 0xbfe   : > { %2526 = vmatpush1.bf16.msra.mxu0 %v6127_v33 }
 0xbff   : > { %2527 = vmatprep.subr.bf16.mxu0 %v6128_v34 }
 0xc02   : > { %2528 = vmatpush1.bf16.msra.mxu0 %v6129_v35 }
 0xc86   : > { %v2070_v42 = vpop.f32.mrb[80].mxu0 }
 0xc87   : > { %v2071_v43 = vadd.f32 %v2070_v42, %v5360_v41  ;;  %v2072_v0 = vpop.f32.mrb[81].mxu0 }
 0xc88   : > { %v2073_v6 = vadd.f32 %v2072_v0, %v5360_v41  ;;  %v2074_v63 = vpop.f32.mrb[82].mxu0 }
 0xc89   : > { %v3525_v2 = vrot.slane %v2071_v43, 7  ;;  %v2075_v5 = vpop.f32.mrb[83].mxu0 }
 0xc8a   : > { %v3526_v18 = vrot.slane %v2073_v6, 7 }
 0xc8b   : > { %v5368_v52 = vsel %vm3541_vm2, %v1348_v60, %v3525_v2 }
 0xc8c   : > { %6133 = vst [vmem:[#allocation17_spill] sm:$0xff] %v5368_v52  ;;  %v5370_v53 = vsel %vm3541_vm2, %v1350_v7, %v3526_v18 }
 0xc8d   : > { %6134 = vst [vmem:[#allocation11_spill] sm:$0xff] %v5370_v53 }
 0xc98   : > { %v2450_v17 = vpop.f32.mrb[84].mxu0 }
 0xc99   : > { %v2452_v11 = vpop.f32.mrb[85].mxu0 }
 0xc9a   : > { %v2454_v36 = vpop.f32.mrb[86].mxu0 }
 0xc9b   : > { %v2489_v37 = vpack.c.bf16 %v2454_v36, %v2450_v17  ;;  %v2456_v38 = vpop.f32.mrb[87].mxu0 }
 0xc9c   : > { %v2490_v40 = vpack.c.bf16 %v2456_v38, %v2452_v11 }
 0xc9e   : > { %2529 = vmatprep.mubr.bf16.mxu0 %v2490_v40 }
 0xc9f   : > { %2530 = vmatmul.mubr.bf16.vlgmr.msra.gmra.mrb[100].mxu0 %v2489_v37 }
 0xca0   : > { %v2460_v42 = vpop.f32.mrb[88].mxu0 }
 0xca1   : > { %v2462_v0 = vpop.f32.mrb[89].mxu0 }
 0xca2   : > { %v2464_v43 = vpop.f32.mrb[90].mxu0 }
 0xca3   : > { %v2491_v63 = vpack.c.bf16 %v2464_v43, %v2460_v42  ;;  %v2466_v49 = vpop.f32.mrb[91].mxu0 }
 0xca4   : > { %v2492_v5 = vpack.c.bf16 %v2466_v49, %v2462_v0  ;;  %v6135_v0 = vld [vmem:[#allocation3_spill] sm:$0xff] }
 0xca6   : > { %2539 = vmatprep.mubr.bf16.mxu0 %v2492_v5 }
 0xca7   : > { %2540 = vmatmul.mubr.bf16.gmra.mrb[104].mxu0 %v2491_v63 }
 0xca8   : > { %v2470_v6 = vpop.f32.mrb[92].mxu0 }
 0xca9   : > { %v2472_v60 = vpop.f32.mrb[93].mxu0 }
 0xcaa   : > { %v2474_v2 = vpop.f32.mrb[94].mxu0 }
 0xcab   : > { %v2493_v3 = vpack.c.bf16 %v2474_v2, %v2470_v6  ;;  %v2476_v7 = vpop.f32.mrb[95].mxu0  ;;  %v6136_v6 = vld [vmem:[#allocation4_spill] sm:$0xff] }
 0xcac   : > { %v2494_v18 = vpack.c.bf16 %v2476_v7, %v2472_v60 }
 0xcae   : > { %2549 = vmatprep.mubr.bf16.mxu0 %v2494_v18 }
 0xcaf   : > { %2550 = vmatmul.mubr.bf16.gmra.mrb[108].mxu0 %v2493_v3 }
 0xcb0   : > { %v2480_v17 = vpop.f32.mrb[96].mxu0 }
 0xcb1   : > { %v2482_v11 = vpop.f32.mrb[97].mxu0 }
 0xcb2   : > { %v2484_v36 = vpop.f32.mrb[98].mxu0 }
 0xcb3   : > { %v2495_v37 = vpack.c.bf16 %v2484_v36, %v2480_v17  ;;  %v2486_v38 = vpop.f32.mrb[99].mxu0 }
 0xcb4   : > { %v2496_v40 = vpack.c.bf16 %v2486_v38, %v2482_v11 }
 0xcb6   : > { %2559 = vmatprep.mubr.bf16.mxu0 %v2496_v40  ;;  %v6137_v40 = vld [vmem:[#allocation5_spill] sm:$0xff] }
 0xcb7   : > { %2560 = vmatmul.mubr.bf16.gmra.mrb[112].mxu0 %v2495_v37 }
 0xcb8   : > { %2748 = vmatprep.mubr.bf16.mxu0 %v6054_v57 }
 0xd72   : > { %v2531_v42 = vpop.f32.mrb[100].mxu0 }
 0xd73   : > { %v2532_v43 = vadd.f32 %v2531_v42, %v6135_v0  ;;  %v2533_v63 = vpop.f32.mrb[101].mxu0 }
 0xd74   : > { %v2534_v49 = vadd.f32 %v2533_v63, %v6135_v0  ;;  %v2535_v5 = vpop.f32.mrb[102].mxu0  ;;  %v6138_v63 = vld [vmem:[#allocation6_spill] sm:$0xff] }
 0xd75   : > { %v2536_v60 = vadd.f32 %v2535_v5, %v6136_v6  ;;  %v2537_v2 = vpop.f32.mrb[103].mxu0  ;;  %v2570_v7 = vmax.f32 %v2532_v43, 0.0 }
 0xd76   : > { %v2538_v3 = vadd.f32 %v2537_v2, %v6136_v6  ;;  %v2571_v17 = vmax.f32 %v2534_v49, 0.0 }
 0xd77   : > { %v2572_v18 = vmax.f32 %v2536_v60, 0.0 }
 0xd78   : > { %v2573_v11 = vmax.f32 %v2538_v3, 0.0 }
 0xd79   : > { %v2586_v36 = vpack.c.bf16 %v2572_v18, %v2570_v7 }
 0xd7a   : > { %v2587_v37 = vpack.c.bf16 %v2573_v11, %v2571_v17  ;;  %v2541_v38 = vpop.f32.mrb[104].mxu0  ;;  %v6139_v11 = vld [vmem:[#allocation7_spill] sm:$0xff] }
 0xd7b   : > { %v2542_v53 = vadd.f32 %v2541_v38, %v6137_v40  ;;  %v2543_v52 = vpop.f32.mrb[105].mxu0 }
 0xd7c   : > { %v2544_v42 = vadd.f32 %v2543_v52, %v6137_v40  ;;  %v2545_v41 = vpop.f32.mrb[106].mxu0  ;;  %2594 = vmatprep.subr.bf16.mxu1 %v2587_v37  ;;  %v6140_v37 = vld [vmem:[#allocation8_spill] sm:$0xff] }
 0xd7d   : > { %v2546_v0 = vadd.f32 %v2545_v41, %v6138_v63  ;;  %v2547_v5 = vpop.f32.mrb[107].mxu0  ;;  %2595 = vmatpush1.bf16.msra.mxu1 %v2586_v36  ;;  %v2574_v43 = vmax.f32 %v2542_v53, 0.0 }
 0xd7e   : > { %v2548_v2 = vadd.f32 %v2547_v5, %v6138_v63  ;;  %v2575_v49 = vmax.f32 %v2544_v42, 0.0 }
 0xd7f   : > { %v2576_v60 = vmax.f32 %v2546_v0, 0.0 }
 0xd80   : > { %v2577_v3 = vmax.f32 %v2548_v2, 0.0 }
 0xd81   : > { %v2588_v7 = vpack.c.bf16 %v2576_v60, %v2574_v43 }
 0xd82   : > { %v2589_v18 = vpack.c.bf16 %v2577_v3, %v2575_v49  ;;  %v2551_v17 = vpop.f32.mrb[108].mxu0  ;;  %v6141_v49 = vld [vmem:[#allocation9_spill] sm:$0xff] }
 0xd83   : > { %v2552_v38 = vadd.f32 %v2551_v17, %v6139_v11  ;;  %v2553_v6 = vpop.f32.mrb[109].mxu0 }
 0xd84   : > { %v2554_v52 = vadd.f32 %v2553_v6, %v6139_v11  ;;  %v2555_v40 = vpop.f32.mrb[110].mxu0  ;;  %2596 = vmatprep.subr.bf16.mxu1 %v2589_v18  ;;  %v6142_v18 = vld [vmem:[#allocation10_spill] sm:$0xff] }
 0xd85   : > { %v2556_v41 = vadd.f32 %v2555_v40, %v6140_v37  ;;  %v2557_v59 = vpop.f32.mrb[111].mxu0  ;;  %2597 = vmatpush1.bf16.msra.mxu1 %v2588_v7  ;;  %v2578_v53 = vmax.f32 %v2552_v38, 0.0 }
 0xd86   : > { %v2558_v36 = vadd.f32 %v2557_v59, %v6140_v37  ;;  %v2579_v42 = vmax.f32 %v2554_v52, 0.0  ;;  %v6163_v37 = vld [vmem:[#allocation13_spill] sm:$0xff] }
 0xd87   : > { %v2580_v0 = vmax.f32 %v2556_v41, 0.0 }
 0xd88   : > { %v2581_v5 = vmax.f32 %v2558_v36, 0.0 }
 0xd89   : > { %v2590_v2 = vpack.c.bf16 %v2580_v0, %v2578_v53  ;;  %v5393_v0 = vld [vmem:[%s5901_s6] sm:$0xff]  }
 0xd8a   : > { %v2591_v43 = vpack.c.bf16 %v2581_v5, %v2579_v42  ;;  %v2561_v60 = vpop.f32.mrb[112].mxu0  ;;  %6143 = vst [vmem:[#allocation12_spill] sm:$0xff] %v5393_v0 }
 0xd8b   : > { %v2562_v3 = vadd.f32 %v2561_v60, %v6141_v49  ;;  %v2563_v17 = vpop.f32.mrb[113].mxu0 }
 0xd8c   : > { %v2564_v6 = vadd.f32 %v2563_v17, %v6141_v49  ;;  %v2565_v11 = vpop.f32.mrb[114].mxu0  ;;  %2598 = vmatprep.subr.bf16.mxu1 %v2591_v43  ;;  %v5441_v43 = vld [vmem:[%s4445_s15 + $0x304] ss:$8 sps:$4 sm:$0xff]  }
 0xd8d   : > { %v2566_v40 = vadd.f32 %v2565_v11, %v6142_v18  ;;  %v2567_v63 = vpop.f32.mrb[115].mxu0  ;;  %2599 = vmatpush1.bf16.msra.mxu1 %v2590_v2  ;;  %v2582_v7 = vmax.f32 %v2562_v3, 0.0 }
 0xd8e   : > { %v2568_v59 = vadd.f32 %v2567_v63, %v6142_v18  ;;  %v2583_v52 = vmax.f32 %v2564_v6, 0.0  ;;  %v5574_v18 = vld [vmem:[%s4445_s15 + $0x3f0] ss:$8 sps:$4 sm:$0xff]  }
 0xd8f   : > { %v2584_v38 = vmax.f32 %v2566_v40, 0.0  ;;  %v5446_v40 = vld [vmem:[%s4445_s15 + $0x300] ss:$8 sps:$4 sm:$0xff]   ;;  %6162 = vst [vmem:[#allocation38_spill] sm:$0xff] %v5574_v18 }
 0xd90   : > { %v2585_v41 = vmax.f32 %v2568_v59, 0.0  ;;  %v5449_v59 = vld [vmem:[%s4445_s15 + $0x314] ss:$8 sps:$4 sm:$0xff]  }
 0xd91   : > { %v2592_v36 = vpack.c.bf16 %v2584_v38, %v2582_v7  ;;  %v4327_v7 = vld [vmem:[%s5897_s2] sm:$0xff]   ;;  %v5458_v38 = vld [vmem:[%s4445_s15 + $0x310] ss:$8 sps:$4 sm:$0xff]  }
 0xd92   : > { %v2593_v53 = vpack.c.bf16 %v2585_v41, %v2583_v52  ;;  %v5462_v52 = vld [vmem:[%s4445_s15 + $0x324] ss:$8 sps:$4 sm:$0xff]   ;;  %v5466_v41 = vld [vmem:[%s4445_s15 + $0x320] ss:$8 sps:$4 sm:$0xff]  }
 0xd94   : > { %2600 = vmatprep.subr.bf16.mxu1 %v2593_v53  ;;  %v4328_v53 = vld [vmem:[%s5897_s2 + $0x8] sm:$0xff]  }
 0xd95   : > { %2601 = vmatpush1.bf16.msra.mxu1 %v2592_v36  ;;  %v5470_v36 = vld [vmem:[%s4445_s15 + $0x334] ss:$8 sps:$4 sm:$0xff]  }
 0xd96   : > { %2651 = vmatprep.subr.bf16.mxu1 %v5112_v1  ;;  %v5405_v1 = vld [vmem:[%s5901_s6 + $0x8] sm:$0xff]  }
 0xd97   : > { %6144 = vst [vmem:[#allocation18_spill] sm:$0xff] %v5405_v1 }
 0xd98   : > { %3952 = vmatmul.mubr.msk.bf16.vlgmr.msra.gmra.mrb[76].mxu1 %vm1103_vm1, %v5393_v0  ;;  %v5571_v0 = vld [vmem:[%s4445_s15 + $0x3f4] ss:$8 sps:$4 sm:$0xff]  }
 0xd99   : > { %2636 = vmatprep.mubr.bf16.mxu1 %v6054_v57  ;;  %2652 = vmatpush1.bf16.msra.mxu1 %v5117_v44  ;;  %v2800_v44 = vld [vmem:[%s4436_s29 + $0x18] sm:$0xff]  ;;  %6161 = vst [vmem:[#allocation37_spill] sm:$0xff] %v5571_v0 }
 0xd9a   : > { %2653 = vmatprep.subr.bf16.mxu1 %v5120_v45  ;;  %v2801_v45 = vld [vmem:[%s4436_s29 + $0x38] sm:$0xff] }
 0xd9d   : > { %2654 = vmatpush1.bf16.msra.mxu1 %v5127_v61  ;;  %v3956_v61 = vcombine.high %v2800_v44, %v2801_v45 }
 0xd9e   : > { %2655 = vmatprep.subr.bf16.mxu1 %v5131_v58  ;;  %v3955_v58 = vcombine.low %v2800_v44, %v2801_v45  ;;  %v5478_v44 = vld [vmem:[%s4445_s15 + $0x330] ss:$8 sps:$4 sm:$0xff]   ;;  %v5482_v45 = vld [vmem:[%s4445_s15 + $0x344] ss:$8 sps:$4 sm:$0xff]  }
 0xda0   : > { %3953 = vmatmul.mubr.msk.bf16.gmra.mrb[80].mxu1 %vm1103_vm1, %v5405_v1  ;;  %v5566_v1 = vld [vmem:[%s4445_s15 + $0x3e0] ss:$8 sps:$4 sm:$0xff]  }
 0xda1   : > { %2656 = vmatpush1.bf16.msra.mxu1 %v5135_v10  ;;  %6160 = vst [vmem:[#allocation36_spill] sm:$0xff] %v5566_v1 }
 0xda2   : > { %2657 = vmatprep.subr.bf16.mxu1 %v6103_v12 }
 0xda5   : > { %2658 = vmatpush1.bf16.msra.mxu1 %v6104_v39 }
 0xda6   : > { %2659 = vmatprep.subr.bf16.mxu1 %v6105_v24  ;;  %v2802_v24 = vld [vmem:[%s4436_s29 + $0x58] sm:$0xff] }
 0xda9   : > { %2660 = vmatpush1.bf16.msra.mxu1 %v6106_v56  ;;  %v2803_v56 = vld [vmem:[%s4436_s29 + $0x78] sm:$0xff] }
 0xdaa   : > { %2661 = vmatprep.subr.bf16.mxu1 %v6107_v22  ;;  %v3958_v11 = vcombine.high %v2802_v24, %v2803_v56  ;;  %v3957_v5 = vcombine.low %v2802_v24, %v2803_v56  ;;  %v5506_v24 = vld [vmem:[%s4445_s15 + $0x374] ss:$8 sps:$4 sm:$0xff]   ;;  %v5510_v56 = vld [vmem:[%s4445_s15 + $0x370] ss:$8 sps:$4 sm:$0xff]  }
 0xdab   : > { %6145 = vst [vmem:[#allocation19_spill] sm:$0xff] %v5506_v24  ;;  %6146 = vst [vmem:[#allocation22_spill] sm:$0xff] %v5510_v56 }
 0xdad   : > { %2662 = vmatpush1.bf16.msra.mxu1 %v6108_v54 }
 0xdae   : > { %2663 = vmatprep.subr.bf16.mxu1 %v6109_v9 }
 0xdb1   : > { %2664 = vmatpush1.bf16.msra.mxu1 %v6111_v50 }
 0xdb2   : > { %2665 = vmatprep.subr.bf16.mxu1 %v6112_v15 }
 0xdb5   : > { %2666 = vmatpush1.bf16.msra.mxu1 %v6113_v16 }
 0xdb6   : > { %2667 = vmatprep.subr.bf16.mxu1 %v6114_v55 }
 0xdb9   : > { %2668 = vmatpush1.bf16.msra.mxu1 %v6115_v48 }
 0xdba   : > { %2669 = vmatprep.subr.bf16.mxu1 %v6116_v47 }
 0xdbd   : > { %2670 = vmatpush1.bf16.msra.mxu1 %v6117_v19 }
 0xdbe   : > { %2671 = vmatprep.subr.bf16.mxu1 %v6118_v20 }
 0xdc1   : > { %2672 = vmatpush1.bf16.msra.mxu1 %v6119_v21 }
 0xdc2   : > { %2673 = vmatprep.subr.bf16.mxu1 %v6120_v23 }
 0xdc5   : > { %2674 = vmatpush1.bf16.msra.mxu1 %v6121_v25 }
 0xdc6   : > { %2675 = vmatprep.subr.bf16.mxu1 %v6122_v26 }
 0xdc9   : > { %2676 = vmatpush1.bf16.msra.mxu1 %v6123_v27 }
 0xdca   : > { %2677 = vmatprep.subr.bf16.mxu1 %v6124_v30 }
 0xdcd   : > { %2678 = vmatpush1.bf16.msra.mxu1 %v6125_v31 }
 0xdce   : > { %2679 = vmatprep.subr.bf16.mxu1 %v6126_v32 }
 0xdd1   : > { %2680 = vmatpush1.bf16.msra.mxu1 %v6127_v33 }
 0xdd2   : > { %2681 = vmatprep.subr.bf16.mxu1 %v6128_v34 }
 0xdd5   : > { %2682 = vmatpush1.bf16.msra.mxu1 %v6129_v35 }
 0xdd6   : > { %2824 = vmatprep.subr.bf16.mxu1 %v3956_v61  ;;  %v5486_v61 = vld [vmem:[%s4445_s15 + $0x340] ss:$8 sps:$4 sm:$0xff]  }
 0xe6b   : > { %v2628_v10 = vpop.f32.mrb[76].mxu1 }
 0xe6c   : > { %v2630_v12 = vpop.f32.mrb[77].mxu1 }
 0xe6d   : > { %v2632_v39 = vpop.f32.mrb[78].mxu1 }
 0xe6e   : > { %v2647_v22 = vpack.c.bf16 %v2632_v39, %v2628_v10  ;;  %v2634_v54 = vpop.f32.mrb[79].mxu1  ;;  %v5494_v10 = vld [vmem:[%s4445_s15 + $0x350] ss:$8 sps:$4 sm:$0xff]   ;;  %v5502_v39 = vld [vmem:[%s4445_s15 + $0x360] ss:$8 sps:$4 sm:$0xff]  }
 0xe6f   : > { %v2648_v63 = vpack.c.bf16 %v2634_v54, %v2630_v12  ;;  %v5498_v12 = vld [vmem:[%s4445_s15 + $0x364] ss:$8 sps:$4 sm:$0xff]   ;;  %v5518_v54 = vld [vmem:[%s4445_s15 + $0x380] ss:$8 sps:$4 sm:$0xff]  }
 0xe70   : > { %6148 = vst [vmem:[#allocation24_spill] sm:$0xff] %v5518_v54 }
 0xe71   : > { %2683 = vmatprep.mubr.bf16.mxu1 %v2648_v63  ;;  %v5522_v63 = vld [vmem:[%s4445_s15 + $0x394] ss:$8 sps:$4 sm:$0xff]  }
 0xe72   : > { %2684 = vmatmul.mubr.bf16.vlgmr.msra.gmra.mrb[84].mxu1 %v2647_v22  ;;  %v5514_v22 = vld [vmem:[%s4445_s15 + $0x384] ss:$8 sps:$4 sm:$0xff]   ;;  %6149 = vst [vmem:[#allocation25_spill] sm:$0xff] %v5522_v63 }
 0xe73   : > { %v2638_v42 = vpop.f32.mrb[80].mxu1  ;;  %2825 = vmatpush1.bf16.msra.mxu1 %v3955_v58  ;;  %v5490_v58 = vld [vmem:[%s4445_s15 + $0x354] ss:$8 sps:$4 sm:$0xff]   ;;  %6147 = vst [vmem:[#allocation23_spill] sm:$0xff] %v5514_v22 }
 0xe74   : > { %v2640_v2 = vpop.f32.mrb[81].mxu1  ;;  %2826 = vmatprep.subr.bf16.mxu1 %v3958_v11  ;;  %v5526_v11 = vld [vmem:[%s4445_s15 + $0x390] ss:$8 sps:$4 sm:$0xff]  }
 0xe75   : > { %v2642_v60 = vpop.f32.mrb[82].mxu1  ;;  %6150 = vst [vmem:[#allocation26_spill] sm:$0xff] %v5526_v11 }
 0xe76   : > { %v2649_v3 = vpack.c.bf16 %v2642_v60, %v2638_v42  ;;  %v2644_v17 = vpop.f32.mrb[83].mxu1  ;;  %v5530_v42 = vld [vmem:[%s4445_s15 + $0x3a4] ss:$8 sps:$4 sm:$0xff]   ;;  %v5542_v60 = vld [vmem:[%s4445_s15 + $0x3b0] ss:$8 sps:$4 sm:$0xff]  }
 0xe77   : > { %v2650_v6 = vpack.c.bf16 %v2644_v17, %v2640_v2  ;;  %2827 = vmatpush1.bf16.msra.mxu1 %v3957_v5  ;;  %6151 = vst [vmem:[#allocation27_spill] sm:$0xff] %v5530_v42  ;;  %v5535_v5 = vld [vmem:[%s4445_s15 + $0x3a0] ss:$8 sps:$4 sm:$0xff]   ;;  %v5539_v2 = vld [vmem:[%s4445_s15 + $0x3b4] ss:$8 sps:$4 sm:$0xff]   ;;  %6154 = vst [vmem:[#allocation30_spill] sm:$0xff] %v5542_v60 }
 0xe78   : > { %3074 = vmatprep.subr.bf16.mxu1 %v5441_v43  ;;  %6152 = vst [vmem:[#allocation28_spill] sm:$0xff] %v5535_v5  ;;  %6153 = vst [vmem:[#allocation29_spill] sm:$0xff] %v5539_v2  ;;  %v5550_v17 = vld [vmem:[%s4445_s15 + $0x3c0] ss:$8 sps:$4 sm:$0xff]  }
 0xe79   : > { %2693 = vmatprep.mubr.bf16.mxu1 %v2650_v6  ;;  %6156 = vst [vmem:[#allocation32_spill] sm:$0xff] %v5550_v17  ;;  %v5555_v6 = vld [vmem:[%s4445_s15 + $0x3d4] ss:$8 sps:$4 sm:$0xff]  }
 0xe7a   : > { %2694 = vmatmul.mubr.bf16.gmra.mrb[88].mxu1 %v2649_v3  ;;  %v5547_v3 = vld [vmem:[%s4445_s15 + $0x3c4] ss:$8 sps:$4 sm:$0xff]   ;;  %6157 = vst [vmem:[#allocation33_spill] sm:$0xff] %v5555_v6 }
 0xe7b   : > { %2856 = vmatprep.mubr.bf16.mxu1 %v6054_v57  ;;  %6155 = vst [vmem:[#allocation31_spill] sm:$0xff] %v5547_v3 }
 0xe82   : > { %3959 = vmatmul.mubr.msk.bf16.vlgmr.msra.gmra.mrb[92].mxu1 %vm478_vm0, %v4327_v7  ;;  %v5558_v7 = vld [vmem:[%s4445_s15 + $0x3d0] ss:$8 sps:$4 sm:$0xff]  }
 0xe83   : > { %2866 = vmatprep.mubr.bf16.mxu1 %v6054_v57  ;;  %3075 = vmatpush1.bf16.msra.mxu1 %v5446_v40  ;;  %6158 = vst [vmem:[#allocation34_spill] sm:$0xff] %v5558_v7 }
 0xe84   : > { %3076 = vmatprep.subr.bf16.mxu1 %v5449_v59 }
 0xe87   : > { %3077 = vmatpush1.bf16.msra.mxu1 %v5458_v38 }
 0xe88   : > { %3078 = vmatprep.subr.bf16.mxu1 %v5462_v52 }
 0xe8a   : > { %3960 = vmatmul.mubr.msk.bf16.gmra.mrb[96].mxu1 %vm478_vm0, %v4328_v53  ;;  %v5563_v53 = vld [vmem:[%s4445_s15 + $0x3e4] ss:$8 sps:$4 sm:$0xff]  }
 0xe8b   : > { %3079 = vmatpush1.bf16.msra.mxu1 %v5466_v41  ;;  %6159 = vst [vmem:[#allocation35_spill] sm:$0xff] %v5563_v53 }
 0xe8c   : > { %3080 = vmatprep.subr.bf16.mxu1 %v5470_v36 }
 0xe8f   : > { %3081 = vmatpush1.bf16.msra.mxu1 %v5478_v44 }
 0xe90   : > { %3082 = vmatprep.subr.bf16.mxu1 %v5482_v45 }
 0xe93   : > { %3083 = vmatpush1.bf16.msra.mxu1 %v5486_v61 }
 0xe94   : > { %3084 = vmatprep.subr.bf16.mxu1 %v5490_v58 }
 0xe97   : > { %3085 = vmatpush1.bf16.msra.mxu1 %v5494_v10 }
 0xe98   : > { %3086 = vmatprep.subr.bf16.mxu1 %v5498_v12 }
 0xe9b   : > { %3087 = vmatpush1.bf16.msra.mxu1 %v5502_v39 }
 0xe9c   : > { %3088 = vmatprep.subr.bf16.mxu1 %v5506_v24 }
 0xe9f   : > { %3089 = vmatpush1.bf16.msra.mxu1 %v5510_v56 }
 0xea0   : > { %3090 = vmatprep.subr.bf16.mxu1 %v5514_v22 }
 0xea3   : > { %3091 = vmatpush1.bf16.msra.mxu1 %v5518_v54 }
 0xea4   : > { %3092 = vmatprep.subr.bf16.mxu1 %v5522_v63 }
 0xea7   : > { %3093 = vmatpush1.bf16.msra.mxu1 %v5526_v11 }
 0xea8   : > { %3094 = vmatprep.subr.bf16.mxu1 %v5530_v42 }
 0xeab   : > { %3095 = vmatpush1.bf16.msra.mxu1 %v5535_v5 }
 0xeac   : > { %3096 = vmatprep.subr.bf16.mxu1 %v5539_v2 }
 0xeaf   : > { %3097 = vmatpush1.bf16.msra.mxu1 %v5542_v60  ;;  %v6164_v60 = vld [vmem:[#allocation14_spill] sm:$0xff] }
 0xeb0   : > { %3098 = vmatprep.subr.bf16.mxu1 %v5547_v3 }
 0xeb3   : > { %3099 = vmatpush1.bf16.msra.mxu1 %v5550_v17 }
 0xeb4   : > { %3100 = vmatprep.subr.bf16.mxu1 %v5555_v6 }
 0xeb7   : > { %3101 = vmatpush1.bf16.msra.mxu1 %v5558_v7 }
 0xeb8   : > { %3102 = vmatprep.subr.bf16.mxu1 %v5563_v53 }
 0xebb   : > { %3103 = vmatpush1.bf16.msra.mxu1 %v5566_v1 }
 0xebc   : > { %3104 = vmatprep.subr.bf16.mxu1 %v5571_v0 }
 0xebf   : > { %3105 = vmatpush1.bf16.msra.mxu1 %v5574_v18 }
 0xf45   : > { %v2685_v49 = vpop.f32.mrb[84].mxu1 }
 0xf46   : > { %v2686_v6 = vadd.f32 %v2685_v49, %v6163_v37  ;;  %v2687_v7 = vpop.f32.mrb[85].mxu1 }
 0xf47   : > { %v2688_v17 = vadd.f32 %v2687_v7, %v6163_v37  ;;  %v2689_v3 = vpop.f32.mrb[86].mxu1 }
 0xf48   : > { %v2690_v2 = vadd.f32 %v2689_v3, %v6164_v60  ;;  %v2691_v53 = vpop.f32.mrb[87].mxu1  ;;  %v2704_v5 = vmax.f32 %v2686_v6, 0.0 }
 0xf49   : > { %v2692_v1 = vadd.f32 %v2691_v53, %v6164_v60  ;;  %v2705_v11 = vmax.f32 %v2688_v17, 0.0 }
 0xf4a   : > { %v2706_v42 = vmax.f32 %v2690_v2, 0.0 }
 0xf4b   : > { %v2707_v63 = vmax.f32 %v2692_v1, 0.0 }
 0xf4c   : > { %v2712_v54 = vpack.c.bf16 %v2706_v42, %v2704_v5 }
 0xf4d   : > { %v2713_v0 = vpack.c.bf16 %v2707_v63, %v2705_v11  ;;  %v2695_v22 = vpop.f32.mrb[88].mxu1 }
 0xf4e   : > { %v2696_v18 = vadd.f32 %v2695_v22, %v6100_v4  ;;  %v2697_v56 = vpop.f32.mrb[89].mxu1 }
 0xf4f   : > { %v2698_v49 = vadd.f32 %v2697_v56, %v6100_v4  ;;  %v2699_v24 = vpop.f32.mrb[90].mxu1  ;;  %2716 = vmatprep.subr.bf16.mxu0 %v2713_v0 }
 0xf50   : > { %v2700_v7 = vadd.f32 %v2699_v24, %v6101_v8  ;;  %v2701_v3 = vpop.f32.mrb[91].mxu1  ;;  %2717 = vmatpush1.bf16.msra.mxu0 %v2712_v54  ;;  %v2708_v2 = vmax.f32 %v2696_v18, 0.0  ;;  %v4329_v54 = vld [vmem:[%s4445_s15 + $0x204] ss:$8 sps:$4 sm:$0xff]   ;;  %v5590_v18 = vld [vmem:[%s5903_s8] sm:$0x1] }
 0xf51   : > { %v2702_v6 = vadd.f32 %v2701_v3, %v6101_v8  ;;  %v2709_v1 = vmax.f32 %v2698_v49, 0.0  ;;  %v4331_v49 = vld [vmem:[%s4445_s15 + $0x200] ss:$8 sps:$4 sm:$0xff]   ;;  %v4332_v3 = vld [vmem:[%s4445_s15 + $0x214] ss:$8 sps:$4 sm:$0xff]  }
 0xf52   : > { %v2710_v17 = vmax.f32 %v2700_v7, 0.0 }
 0xf53   : > { %v2711_v42 = vmax.f32 %v2702_v6, 0.0 }
 0xf54   : > { %v2714_v63 = vpack.c.bf16 %v2710_v17, %v2708_v2 }
 0xf55   : > { %v2715_v11 = vpack.c.bf16 %v2711_v42, %v2709_v1  ;;  %v2858_v22 = vpop.f32.mrb[92].mxu1  ;;  %v4333_v42 = vld [vmem:[%s4445_s15 + $0x210] ss:$8 sps:$4 sm:$0xff]  }
 0xf56   : > { %v2860_v5 = vpop.f32.mrb[93].mxu1 }
 0xf57   : > { %2718 = vmatprep.subr.bf16.mxu0 %v2715_v11  ;;  %v2862_v56 = vpop.f32.mrb[94].mxu1  ;;  %v4334_v11 = vld [vmem:[%s4445_s15 + $0x224] ss:$8 sps:$4 sm:$0xff]  }
 0xf58   : > { %v2877_v0 = vpack.c.bf16 %v2862_v56, %v2858_v22  ;;  %2719 = vmatpush1.bf16.msra.mxu0 %v2714_v63  ;;  %v2864_v24 = vpop.f32.mrb[95].mxu1  ;;  %v4335_v22 = vld [vmem:[%s4445_s15 + $0x220] ss:$8 sps:$4 sm:$0xff]   ;;  %v4337_v56 = vld [vmem:[%s4445_s15 + $0x230] ss:$8 sps:$4 sm:$0xff]  }
 0xf59   : > { %v2878_v53 = vpack.c.bf16 %v2864_v24, %v2860_v5  ;;  %2759 = vmatprep.subr.bf16.mxu0 %v4329_v54  ;;  %v4336_v5 = vld [vmem:[%s4445_s15 + $0x234] ss:$8 sps:$4 sm:$0xff]   ;;  %v4339_v24 = vld [vmem:[%s4445_s15 + $0x240] ss:$8 sps:$4 sm:$0xff]   ;;  %v4341_v54 = vld [vmem:[%s4445_s15 + $0x250] ss:$8 sps:$4 sm:$0xff]  }
 0xf5b   : > { %3954 = vmatmul.mubr.msk.bf16.vlgmr.msra.gmra.mrb[116].mxu0 %vm478_vm0, %v5590_v18  ;;  %3106 = vmatprep.mubr.bf16.mxu1 %v2878_v53  ;;  %v4340_v53 = vld [vmem:[%s4445_s15 + $0x254] ss:$8 sps:$4 sm:$0xff]  }
 0xf5c   : > { %3107 = vmatmul.mubr.bf16.vlgmr.msra.gmra.mrb[100].mxu1 %v2877_v0  ;;  %2760 = vmatpush1.bf16.msra.mxu0 %v4331_v49  ;;  %v4338_v0 = vld [vmem:[%s4445_s15 + $0x244] ss:$8 sps:$4 sm:$0xff]  }
 0xf5d   : > { %v2868_v7 = vpop.f32.mrb[96].mxu1  ;;  %2761 = vmatprep.subr.bf16.mxu0 %v4332_v3 }
 0xf5e   : > { %v2870_v6 = vpop.f32.mrb[97].mxu1 }
 0xf5f   : > { %v2872_v2 = vpop.f32.mrb[98].mxu1 }
 0xf60   : > { %v2879_v17 = vpack.c.bf16 %v2872_v2, %v2868_v7  ;;  %v2874_v1 = vpop.f32.mrb[99].mxu1  ;;  %2762 = vmatpush1.bf16.msra.mxu0 %v4333_v42 }
 0xf61   : > { %v2880_v63 = vpack.c.bf16 %v2874_v1, %v2870_v6  ;;  %2763 = vmatprep.subr.bf16.mxu0 %v4334_v11 }
 0xf63   : > { %3116 = vmatprep.mubr.bf16.mxu1 %v2880_v63 }
 0xf64   : > { %3117 = vmatmul.mubr.bf16.gmra.mrb[104].mxu1 %v2879_v17  ;;  %2764 = vmatpush1.bf16.msra.mxu0 %v4335_v22 }
 0xf65   : > { %2765 = vmatprep.subr.bf16.mxu0 %v4336_v5  ;;  %3349 = vmatprep.mubr.bf16.mxu1 %v6054_v57 }
 0xf68   : > { %2766 = vmatpush1.bf16.msra.mxu0 %v4337_v56  ;;  %v6170_v56 = vld [vmem:[#allocation25_spill] sm:$0xff] }
 0xf69   : > { %2767 = vmatprep.subr.bf16.mxu0 %v4338_v0  ;;  %v6171_v0 = vld [vmem:[#allocation26_spill] sm:$0xff] }
 0xf6c   : > { %2768 = vmatpush1.bf16.msra.mxu0 %v4339_v24  ;;  %v6172_v24 = vld [vmem:[#allocation27_spill] sm:$0xff] }
 0xf6d   : > { %2769 = vmatprep.subr.bf16.mxu0 %v4340_v53  ;;  %v6173_v53 = vld [vmem:[#allocation28_spill] sm:$0xff] }
 0xf70   : > { %2770 = vmatpush1.bf16.msra.mxu0 %v4341_v54  ;;  %v6174_v54 = vld [vmem:[#allocation29_spill] sm:$0xff] }
 0xf71   : > { %2771 = vmatprep.subr.bf16.mxu0 %v6109_v9 }
 0xf74   : > { %2772 = vmatpush1.bf16.msra.mxu0 %v6111_v50 }
 0xf75   : > { %2773 = vmatprep.subr.bf16.mxu0 %v6112_v15 }
 0xf78   : > { %2774 = vmatpush1.bf16.msra.mxu0 %v6113_v16 }
 0xf79   : > { %2775 = vmatprep.subr.bf16.mxu0 %v6114_v55 }
 0xf7c   : > { %2776 = vmatpush1.bf16.msra.mxu0 %v6115_v48 }
 0xf7d   : > { %2777 = vmatprep.subr.bf16.mxu0 %v6116_v47 }
 0xf80   : > { %2778 = vmatpush1.bf16.msra.mxu0 %v6117_v19 }
 0xf81   : > { %2779 = vmatprep.subr.bf16.mxu0 %v6118_v20 }
 0xf84   : > { %2780 = vmatpush1.bf16.msra.mxu0 %v6119_v21 }
 0xf85   : > { %2781 = vmatprep.subr.bf16.mxu0 %v6120_v23 }
 0xf88   : > { %2782 = vmatpush1.bf16.msra.mxu0 %v6121_v25 }
 0xf89   : > { %2783 = vmatprep.subr.bf16.mxu0 %v6122_v26 }
 0xf8c   : > { %2784 = vmatpush1.bf16.msra.mxu0 %v6123_v27 }
 0xf8d   : > { %2785 = vmatprep.subr.bf16.mxu0 %v6124_v30 }
 0xf90   : > { %2786 = vmatpush1.bf16.msra.mxu0 %v6125_v31 }
 0xf91   : > { %2787 = vmatprep.subr.bf16.mxu0 %v6126_v32 }
 0xf94   : > { %2788 = vmatpush1.bf16.msra.mxu0 %v6127_v33 }
 0xf95   : > { %2789 = vmatprep.subr.bf16.mxu0 %v6128_v34 }
 0xf98   : > { %2790 = vmatpush1.bf16.msra.mxu0 %v6129_v35 }
0x102e   : > { %v2750_v9 = vpop.f32.mrb[116].mxu0 }
0x102f   : > { %v2757_v50 = vpack.c.bf16 %v2750_v9, %v2750_v9  ;;  %v2752_v15 = vpop.f32.mrb[117].mxu0  ;;  %v3108_v16 = vpop.f32.mrb[100].mxu1  ;;  %v6175_v9 = vld [vmem:[#allocation30_spill] sm:$0xff] }
0x1030   : > { %v2758_v55 = vpack.c.bf16 %v2752_v15, %v2752_v15  ;;  %v3109_v48 = vadd.f32 %v3108_v16, %v4634_v13  ;;  %v3110_v47 = vpop.f32.mrb[101].mxu1  ;;  %v2754_v19 = vpop.f32.mrb[118].mxu0  ;;  %v6177_v15 = vld [vmem:[#allocation32_spill] sm:$0xff]  ;;  %v6178_v16 = vld [vmem:[#allocation33_spill] sm:$0xff] }
0x1031   : > { %v3111_v20 = vadd.f32 %v3110_v47, %v4634_v13  ;;  %v3112_v21 = vpop.f32.mrb[102].mxu1  ;;  %v2755_v23 = vpop.f32.mrb[119].mxu0  ;;  %v6181_v47 = vld [vmem:[#allocation36_spill] sm:$0xff]  ;;  %v6182_v19 = vld [vmem:[#allocation37_spill] sm:$0xff] }
0x1032   : > { %v3113_v25 = vadd.f32 %v3112_v21, %v4637_v46  ;;  %2791 = vmatprep.mubr.bf16.mxu0 %v2758_v55  ;;  %v3114_v26 = vpop.f32.mrb[103].mxu1  ;;  %v3127_v30 = vmax.f32 %v3109_v48, 0.0  ;;  %v6179_v55 = vld [vmem:[#allocation34_spill] sm:$0xff]  ;;  %v6180_v48 = vld [vmem:[#allocation35_spill] sm:$0xff]  ;;  %v6184_v23 = vld [vmem:[#allocation16_spill] sm:$0xff] }
0x1033   : > { %v3115_v27 = vadd.f32 %v3114_v26, %v4637_v46  ;;  %2792 = vmatmul.mubr.bf16.vlgmr.msra.gmra.mrb[120].mxu0 %v2757_v50  ;;  %v3128_v32 = vmax.f32 %v3111_v20, 0.0  ;;  %v6176_v50 = vld [vmem:[#allocation31_spill] sm:$0xff]  ;;  %v6183_v20 = vld [vmem:[#allocation38_spill] sm:$0xff] }
0x1034   : > { %v3129_v31 = vmax.f32 %v3113_v25, 0.0  ;;  %3171 = vmatprep.mubr.bf16.mxu0 %v6054_v57 }
0x1035   : > { %v3130_v33 = vmax.f32 %v3115_v27, 0.0 }
0x1036   : > { %v3135_v34 = vpack.c.bf16 %v3129_v31, %v3127_v30 }
0x1037   : > { %v3136_v35 = vpack.c.bf16 %v3130_v33, %v3128_v32  ;;  %v3118_v49 = vpop.f32.mrb[104].mxu1 }
0x1038   : > { %v3119_v13 = vadd.f32 %v3118_v49, %v4641_v51  ;;  %v3120_v7 = vpop.f32.mrb[105].mxu1  ;;  %v6186_v49 = vld [vmem:[#allocation11_spill] sm:$0xff] }
0x1039   : > { %v3121_v3 = vadd.f32 %v3120_v7, %v4641_v51  ;;  %v3122_v6 = vpop.f32.mrb[106].mxu1  ;;  %3139 = vmatprep.subr.bf16.mxu0 %v3136_v35  ;;  %v6165_v51 = vld [vmem:[#allocation15_spill] sm:$0xff] }
0x103a   : > { %v3123_v2 = vadd.f32 %v3122_v6, %v4645_v62  ;;  %v3124_v46 = vpop.f32.mrb[107].mxu1  ;;  %3140 = vmatpush1.bf16.msra.mxu0 %v3135_v34  ;;  %v3131_v1 = vmax.f32 %v3119_v13, 0.0  ;;  %v6185_v34 = vld [vmem:[#allocation17_spill] sm:$0xff] }
0x103b   : > { %v3125_v17 = vadd.f32 %v3124_v46, %v4645_v62  ;;  %v3132_v63 = vmax.f32 %v3121_v3, 0.0  ;;  %v6166_v62 = vld [vmem:[#allocation19_spill] sm:$0xff] }
0x103c   : > { %v3133_v42 = vmax.f32 %v3123_v2, 0.0 }
0x103d   : > { %v3134_v11 = vmax.f32 %v3125_v17, 0.0 }
0x103e   : > { %v3137_v22 = vpack.c.bf16 %v3133_v42, %v3131_v1 }
0x103f   : > { %v3138_v5 = vpack.c.bf16 %v3134_v11, %v3132_v63 }
0x1041   : > { %3141 = vmatprep.subr.bf16.mxu0 %v3138_v5 }
0x1042   : > { %3142 = vmatpush1.bf16.msra.mxu0 %v3137_v22 }
0x1043   : > { %3220 = vmatprep.subr.bf16.mxu0 %v5441_v43 }
0x1045   : > { %4025 = vmatmul.mubr.msk.bf16.vlgmr.msra.gmra.mrb[124].mxu0 %vm478_vm0, %v5301_v29  ;;  %v6167_v29 = vld [vmem:[#allocation22_spill] sm:$0xff] }
0x1046   : > { %3181 = vmatprep.mubr.bf16.mxu0 %v6054_v57  ;;  %3221 = vmatpush1.bf16.msra.mxu0 %v5446_v40 }
0x1047   : > { %3222 = vmatprep.subr.bf16.mxu0 %v5449_v59 }
0x104a   : > { %3223 = vmatpush1.bf16.msra.mxu0 %v5458_v38 }
0x104b   : > { %3224 = vmatprep.subr.bf16.mxu0 %v5462_v52 }
0x104d   : > { %4026 = vmatmul.mubr.msk.bf16.gmra.mrb[128].mxu0 %vm478_vm0, %v5313_v28  ;;  %v6168_v28 = vld [vmem:[#allocation23_spill] sm:$0xff] }
0x104e   : > { %3191 = vmatprep.mubr.bf16.mxu0 %v6054_v57  ;;  %3225 = vmatpush1.bf16.msra.mxu0 %v5466_v41 }
0x104f   : > { %3226 = vmatprep.subr.bf16.mxu0 %v5470_v36 }
0x1052   : > { %3227 = vmatpush1.bf16.msra.mxu0 %v5478_v44 }
0x1053   : > { %3228 = vmatprep.subr.bf16.mxu0 %v5482_v45 }
0x1055   : > { %4027 = vmatmul.mubr.msk.bf16.gmra.mrb[132].mxu0 %vm478_vm0, %v5325_v14  ;;  %v6169_v14 = vld [vmem:[#allocation24_spill] sm:$0xff] }
0x1056   : > { %3201 = vmatprep.mubr.bf16.mxu0 %v6054_v57  ;;  %3229 = vmatpush1.bf16.msra.mxu0 %v5486_v61 }
0x1057   : > { %3230 = vmatprep.subr.bf16.mxu0 %v5490_v58 }
0x105a   : > { %3231 = vmatpush1.bf16.msra.mxu0 %v5494_v10 }
0x105b   : > { %3232 = vmatprep.subr.bf16.mxu0 %v5498_v12 }
0x105d   : > { %4028 = vmatmul.mubr.msk.bf16.gmra.mrb[136].mxu0 %vm478_vm0, %v6165_v51 }
0x105e   : > { %3233 = vmatpush1.bf16.msra.mxu0 %v5502_v39 }
0x105f   : > { %3234 = vmatprep.subr.bf16.mxu0 %v6166_v62 }
0x1062   : > { %3235 = vmatpush1.bf16.msra.mxu0 %v6167_v29 }
0x1063   : > { %3236 = vmatprep.subr.bf16.mxu0 %v6168_v28 }
0x1066   : > { %3237 = vmatpush1.bf16.msra.mxu0 %v6169_v14 }
0x1067   : > { %3238 = vmatprep.subr.bf16.mxu0 %v6170_v56 }
0x106a   : > { %3239 = vmatpush1.bf16.msra.mxu0 %v6171_v0 }
0x106b   : > { %3240 = vmatprep.subr.bf16.mxu0 %v6172_v24 }
0x106e   : > { %3241 = vmatpush1.bf16.msra.mxu0 %v6173_v53 }
0x106f   : > { %3242 = vmatprep.subr.bf16.mxu0 %v6174_v54 }
0x1072   : > { %3243 = vmatpush1.bf16.msra.mxu0 %v6175_v9 }
0x1073   : > { %3244 = vmatprep.subr.bf16.mxu0 %v6176_v50 }
0x1076   : > { %3245 = vmatpush1.bf16.msra.mxu0 %v6177_v15 }
0x1077   : > { %3246 = vmatprep.subr.bf16.mxu0 %v6178_v16 }
0x107a   : > { %3247 = vmatpush1.bf16.msra.mxu0 %v6179_v55 }
0x107b   : > { %3248 = vmatprep.subr.bf16.mxu0 %v6180_v48 }
0x107e   : > { %3249 = vmatpush1.bf16.msra.mxu0 %v6181_v47 }
0x107f   : > { %3250 = vmatprep.subr.bf16.mxu0 %v6182_v19 }
0x1082   : > { %3251 = vmatpush1.bf16.msra.mxu0 %v6183_v20 }
0x1106   : > { %v2793_v21 = vpop.f32.mrb[120].mxu0 }
0x1107   : > { %v2794_v25 = vadd.f32 %v2793_v21, %v6184_v23  ;;  %v2795_v26 = vpop.f32.mrb[121].mxu0 }
0x1108   : > { %v2796_v27 = vadd.f32 %v2795_v26, %v6184_v23  ;;  %v2797_v30 = vpop.f32.mrb[122].mxu0 }
0x1109   : > { %v3531_v31 = vrot.slane %v2794_v25, 6  ;;  %v2798_v32 = vpop.f32.mrb[123].mxu0 }
0x110a   : > { %v3532_v33 = vrot.slane %v2796_v27, 6 }
0x110b   : > { %v5681_v35 = vsel %vm3544_vm3, %v6185_v34, %v3531_v31 }
0x110c   : > { %v5684_v13 = vsel %vm3544_vm3, %v6186_v49, %v3532_v33 }
0x1118   : > { %v3173_v7 = vpop.f32.mrb[124].mxu0 }
0x1119   : > { %v3175_v3 = vpop.f32.mrb[125].mxu0 }
0x111a   : > { %v3177_v6 = vpop.f32.mrb[126].mxu0 }
0x111b   : > { %v3212_v2 = vpack.c.bf16 %v3177_v6, %v3173_v7  ;;  %v3179_v46 = vpop.f32.mrb[127].mxu0  ;;  %v6187_v6 = vld [vmem:[#allocation3_spill] sm:$0xff] }
0x111c   : > { %v3213_v17 = vpack.c.bf16 %v3179_v46, %v3175_v3 }
0x111e   : > { %3252 = vmatprep.mubr.bf16.mxu0 %v3213_v17 }
0x111f   : > { %3253 = vmatmul.mubr.bf16.vlgmr.msra.gmra.mrb[140].mxu0 %v3212_v2 }
0x1120   : > { %v3183_v1 = vpop.f32.mrb[128].mxu0 }
0x1121   : > { %v3185_v42 = vpop.f32.mrb[129].mxu0 }
0x1122   : > { %v3187_v63 = vpop.f32.mrb[130].mxu0 }
0x1123   : > { %v3214_v11 = vpack.c.bf16 %v3187_v63, %v3183_v1  ;;  %v3189_v22 = vpop.f32.mrb[131].mxu0 }
0x1124   : > { %v3215_v5 = vpack.c.bf16 %v3189_v22, %v3185_v42  ;;  %v6188_v42 = vld [vmem:[#allocation4_spill] sm:$0xff] }
0x1126   : > { %3262 = vmatprep.mubr.bf16.mxu0 %v3215_v5 }
0x1127   : > { %3263 = vmatmul.mubr.bf16.gmra.mrb[144].mxu0 %v3214_v11 }
0x1128   : > { %v3193_v51 = vpop.f32.mrb[132].mxu0 }
0x1129   : > { %v3195_v21 = vpop.f32.mrb[133].mxu0 }
0x112a   : > { %v3197_v25 = vpop.f32.mrb[134].mxu0 }
0x112b   : > { %v3216_v26 = vpack.c.bf16 %v3197_v25, %v3193_v51  ;;  %v3199_v27 = vpop.f32.mrb[135].mxu0 }
0x112c   : > { %v3217_v30 = vpack.c.bf16 %v3199_v27, %v3195_v21 }
0x112e   : > { %3272 = vmatprep.mubr.bf16.mxu0 %v3217_v30 }
0x112f   : > { %3273 = vmatmul.mubr.bf16.gmra.mrb[148].mxu0 %v3216_v26 }
0x1130   : > { %v3203_v31 = vpop.f32.mrb[136].mxu0 }
0x1131   : > { %v3205_v32 = vpop.f32.mrb[137].mxu0 }
0x1132   : > { %v3207_v33 = vpop.f32.mrb[138].mxu0 }
0x1133   : > { %v3218_v34 = vpack.c.bf16 %v3207_v33, %v3203_v31  ;;  %v3209_v49 = vpop.f32.mrb[139].mxu0  ;;  %v6189_v31 = vld [vmem:[#allocation5_spill] sm:$0xff] }
0x1134   : > { %v3219_v7 = vpack.c.bf16 %v3209_v49, %v3205_v32 }
0x1136   : > { %3282 = vmatprep.mubr.bf16.mxu0 %v3219_v7  ;;  %v6190_v7 = vld [vmem:[#allocation6_spill] sm:$0xff] }
0x1137   : > { %3283 = vmatmul.mubr.bf16.gmra.mrb[152].mxu0 %v3218_v34 }
0x1138   : > { %3471 = vmatprep.mubr.bf16.mxu0 %v6054_v57 }
0x11f2   : > { %v3254_v3 = vpop.f32.mrb[140].mxu0 }
0x11f3   : > { %v3255_v2 = vadd.f32 %v3254_v3, %v6187_v6  ;;  %v3256_v46 = vpop.f32.mrb[141].mxu0 }
0x11f4   : > { %v3257_v17 = vadd.f32 %v3256_v46, %v6187_v6  ;;  %v3258_v1 = vpop.f32.mrb[142].mxu0 }
0x11f5   : > { %v3259_v63 = vadd.f32 %v3258_v1, %v6188_v42  ;;  %v3260_v11 = vpop.f32.mrb[143].mxu0  ;;  %v3293_v5 = vmax.f32 %v3255_v2, 0.0 }
0x11f6   : > { %v3261_v22 = vadd.f32 %v3260_v11, %v6188_v42  ;;  %v3294_v21 = vmax.f32 %v3257_v17, 0.0 }
0x11f7   : > { %v3295_v51 = vmax.f32 %v3259_v63, 0.0 }
0x11f8   : > { %v3296_v25 = vmax.f32 %v3261_v22, 0.0 }
0x11f9   : > { %v3309_v26 = vpack.c.bf16 %v3295_v51, %v3293_v5  ;;  %v6191_v5 = vld [vmem:[#allocation7_spill] sm:$0xff] }
0x11fa   : > { %v3310_v27 = vpack.c.bf16 %v3296_v25, %v3294_v21  ;;  %v3264_v30 = vpop.f32.mrb[144].mxu0 }
0x11fb   : > { %v3265_v32 = vadd.f32 %v3264_v30, %v6189_v31  ;;  %v3266_v33 = vpop.f32.mrb[145].mxu0 }
0x11fc   : > { %v3267_v34 = vadd.f32 %v3266_v33, %v6189_v31  ;;  %v3268_v49 = vpop.f32.mrb[146].mxu0  ;;  %3317 = vmatprep.subr.bf16.mxu1 %v3310_v27  ;;  %v6192_v27 = vld [vmem:[#allocation8_spill] sm:$0xff] }
0x11fd   : > { %v3269_v3 = vadd.f32 %v3268_v49, %v6190_v7  ;;  %v3270_v6 = vpop.f32.mrb[147].mxu0  ;;  %3318 = vmatpush1.bf16.msra.mxu1 %v3309_v26  ;;  %v3297_v2 = vmax.f32 %v3265_v32, 0.0 }
0x11fe   : > { %v3271_v46 = vadd.f32 %v3270_v6, %v6190_v7  ;;  %v3298_v17 = vmax.f32 %v3267_v34, 0.0 }
0x11ff   : > { %v3299_v1 = vmax.f32 %v3269_v3, 0.0 }
0x1200   : > { %v3300_v42 = vmax.f32 %v3271_v46, 0.0 }
0x1201   : > { %v3311_v63 = vpack.c.bf16 %v3299_v1, %v3297_v2  ;;  %v6193_v2 = vld [vmem:[#allocation9_spill] sm:$0xff] }
0x1202   : > { %v3312_v11 = vpack.c.bf16 %v3300_v42, %v3298_v17  ;;  %v3274_v22 = vpop.f32.mrb[148].mxu0 }
0x1203   : > { %v3275_v51 = vadd.f32 %v3274_v22, %v6191_v5  ;;  %v3276_v21 = vpop.f32.mrb[149].mxu0 }
0x1204   : > { %v3277_v25 = vadd.f32 %v3276_v21, %v6191_v5  ;;  %v3278_v30 = vpop.f32.mrb[150].mxu0  ;;  %3319 = vmatprep.subr.bf16.mxu1 %v3312_v11  ;;  %v6194_v11 = vld [vmem:[#allocation10_spill] sm:$0xff] }
0x1205   : > { %v3279_v31 = vadd.f32 %v3278_v30, %v6192_v27  ;;  %v3280_v33 = vpop.f32.mrb[151].mxu0  ;;  %3320 = vmatpush1.bf16.msra.mxu1 %v3311_v63  ;;  %v3301_v32 = vmax.f32 %v3275_v51, 0.0 }
0x1206   : > { %v3281_v26 = vadd.f32 %v3280_v33, %v6192_v27  ;;  %v3302_v34 = vmax.f32 %v3277_v25, 0.0 }
0x1207   : > { %v3303_v49 = vmax.f32 %v3279_v31, 0.0 }
0x1208   : > { %v3304_v7 = vmax.f32 %v3281_v26, 0.0  ;;  %v6195_v26 = vld [vmem:[#allocation12_spill] sm:$0xff] }
0x1209   : > { %v3313_v3 = vpack.c.bf16 %v3303_v49, %v3301_v32  ;;  %v6196_v32 = vld [vmem:[#allocation18_spill] sm:$0xff] }
0x120a   : > { %v3314_v6 = vpack.c.bf16 %v3304_v7, %v3302_v34  ;;  %v3284_v46 = vpop.f32.mrb[152].mxu0 }
0x120b   : > { %v3285_v1 = vadd.f32 %v3284_v46, %v6193_v2  ;;  %v3286_v17 = vpop.f32.mrb[153].mxu0 }
0x120c   : > { %v3287_v42 = vadd.f32 %v3286_v17, %v6193_v2  ;;  %v3288_v22 = vpop.f32.mrb[154].mxu0  ;;  %3321 = vmatprep.subr.bf16.mxu1 %v3314_v6 }
0x120d   : > { %v3289_v5 = vadd.f32 %v3288_v22, %v6194_v11  ;;  %v3290_v21 = vpop.f32.mrb[155].mxu0  ;;  %3322 = vmatpush1.bf16.msra.mxu1 %v3313_v3  ;;  %v3305_v51 = vmax.f32 %v3285_v1, 0.0 }
0x120e   : > { %v3291_v63 = vadd.f32 %v3290_v21, %v6194_v11  ;;  %v3306_v25 = vmax.f32 %v3287_v42, 0.0 }
0x120f   : > { %v3307_v30 = vmax.f32 %v3289_v5, 0.0 }
0x1210   : > { %v3308_v27 = vmax.f32 %v3291_v63, 0.0 }
0x1211   : > { %v3315_v31 = vpack.c.bf16 %v3307_v30, %v3305_v51 }
0x1212   : > { %v3316_v33 = vpack.c.bf16 %v3308_v27, %v3306_v25 }
0x1214   : > { %3323 = vmatprep.subr.bf16.mxu1 %v3316_v33 }
0x1215   : > { %3324 = vmatpush1.bf16.msra.mxu1 %v3315_v31 }
0x1216   : > { %3374 = vmatprep.subr.bf16.mxu1 %v5441_v43 }
0x1218   : > { %4029 = vmatmul.mubr.msk.bf16.vlgmr.msra.gmra.mrb[108].mxu1 %vm1103_vm1, %v6195_v26 }
0x1219   : > { %3359 = vmatprep.mubr.bf16.mxu1 %v6054_v57  ;;  %3375 = vmatpush1.bf16.msra.mxu1 %v5446_v40 }
0x121a   : > { %3376 = vmatprep.subr.bf16.mxu1 %v5449_v59 }
0x121d   : > { %3377 = vmatpush1.bf16.msra.mxu1 %v5458_v38 }
0x121e   : > { %3378 = vmatprep.subr.bf16.mxu1 %v5462_v52 }
0x1220   : > { %4030 = vmatmul.mubr.msk.bf16.gmra.mrb[112].mxu1 %vm1103_vm1, %v6196_v32 }
0x1221   : > { %3379 = vmatpush1.bf16.msra.mxu1 %v5466_v41 }
0x1222   : > { %3380 = vmatprep.subr.bf16.mxu1 %v5470_v36 }
0x1225   : > { %3381 = vmatpush1.bf16.msra.mxu1 %v5478_v44 }
0x1226   : > { %3382 = vmatprep.subr.bf16.mxu1 %v5482_v45 }
0x1229   : > { %3383 = vmatpush1.bf16.msra.mxu1 %v5486_v61 }
0x122a   : > { %3384 = vmatprep.subr.bf16.mxu1 %v5490_v58 }
0x122d   : > { %3385 = vmatpush1.bf16.msra.mxu1 %v5494_v10 }
0x122e   : > { %3386 = vmatprep.subr.bf16.mxu1 %v5498_v12 }
0x1231   : > { %3387 = vmatpush1.bf16.msra.mxu1 %v5502_v39 }
0x1232   : > { %3388 = vmatprep.subr.bf16.mxu1 %v6166_v62 }
0x1235   : > { %3389 = vmatpush1.bf16.msra.mxu1 %v6167_v29 }
0x1236   : > { %3390 = vmatprep.subr.bf16.mxu1 %v6168_v28 }
0x1239   : > { %3391 = vmatpush1.bf16.msra.mxu1 %v6169_v14 }
0x123a   : > { %3392 = vmatprep.subr.bf16.mxu1 %v6170_v56 }
0x123d   : > { %3393 = vmatpush1.bf16.msra.mxu1 %v6171_v0 }
0x123e   : > { %3394 = vmatprep.subr.bf16.mxu1 %v6172_v24 }
0x1241   : > { %3395 = vmatpush1.bf16.msra.mxu1 %v6173_v53 }
0x1242   : > { %3396 = vmatprep.subr.bf16.mxu1 %v6174_v54 }
0x1245   : > { %3397 = vmatpush1.bf16.msra.mxu1 %v6175_v9 }
0x1246   : > { %3398 = vmatprep.subr.bf16.mxu1 %v6176_v50 }
0x1249   : > { %3399 = vmatpush1.bf16.msra.mxu1 %v6177_v15 }
0x124a   : > { %3400 = vmatprep.subr.bf16.mxu1 %v6178_v16 }
0x124d   : > { %3401 = vmatpush1.bf16.msra.mxu1 %v6179_v55 }
0x124e   : > { %3402 = vmatprep.subr.bf16.mxu1 %v6180_v48 }
0x1251   : > { %3403 = vmatpush1.bf16.msra.mxu1 %v6181_v47 }
0x1252   : > { %3404 = vmatprep.subr.bf16.mxu1 %v6182_v19 }
0x1255   : > { %3405 = vmatpush1.bf16.msra.mxu1 %v6183_v20 }
0x12eb   : > { %v3351_v57 = vpop.f32.mrb[108].mxu1 }
0x12ec   : > { %v3353_v49 = vpop.f32.mrb[109].mxu1 }
0x12ed   : > { %v3355_v34 = vpop.f32.mrb[110].mxu1 }
0x12ee   : > { %v3370_v7 = vpack.c.bf16 %v3355_v34, %v3351_v57  ;;  %v3357_v3 = vpop.f32.mrb[111].mxu1 }
0x12ef   : > { %v3371_v6 = vpack.c.bf16 %v3357_v3, %v3353_v49 }
0x12f1   : > { %3406 = vmatprep.mubr.bf16.mxu1 %v3371_v6 }
0x12f2   : > { %3407 = vmatmul.mubr.bf16.vlgmr.msra.gmra.mrb[116].mxu1 %v3370_v7 }
0x12f3   : > { %v3361_v46 = vpop.f32.mrb[112].mxu1 }
0x12f4   : > { %v3363_v2 = vpop.f32.mrb[113].mxu1 }
0x12f5   : > { %v3365_v1 = vpop.f32.mrb[114].mxu1 }
0x12f6   : > { %v3372_v17 = vpack.c.bf16 %v3365_v1, %v3361_v46  ;;  %v3367_v42 = vpop.f32.mrb[115].mxu1 }
0x12f7   : > { %v3373_v22 = vpack.c.bf16 %v3367_v42, %v3363_v2 }
0x12f9   : > { %3416 = vmatprep.mubr.bf16.mxu1 %v3373_v22 }
0x12fa   : > { %3417 = vmatmul.mubr.bf16.gmra.mrb[120].mxu1 %v3372_v17 }
0x13c5   : > { %v3408_v11 = vpop.f32.mrb[116].mxu1 }
0x13c6   : > { %v3409_v5 = vadd.f32 %v3408_v11, %v6163_v37  ;;  %v3410_v21 = vpop.f32.mrb[117].mxu1 }
0x13c7   : > { %v3411_v63 = vadd.f32 %v3410_v21, %v6163_v37  ;;  %v3412_v51 = vpop.f32.mrb[118].mxu1 }
0x13c8   : > { %v3413_v30 = vadd.f32 %v3412_v51, %v6164_v60  ;;  %v3414_v25 = vpop.f32.mrb[119].mxu1  ;;  %v3427_v31 = vmax.f32 %v3409_v5, 0.0 }
0x13c9   : > { %v3415_v27 = vadd.f32 %v3414_v25, %v6164_v60  ;;  %v3428_v26 = vmax.f32 %v3411_v63, 0.0 }
0x13ca   : > { %v3429_v33 = vmax.f32 %v3413_v30, 0.0 }
0x13cb   : > { %v3430_v32 = vmax.f32 %v3415_v27, 0.0 }
0x13cc   : > { %v3435_v57 = vpack.c.bf16 %v3429_v33, %v3427_v31  ;;  %v3578_v33 = vld [vmem:[%s5905_s10 + $0xe0] sm:$0xff] }
0x13cd   : > { %v3436_v49 = vpack.c.bf16 %v3430_v32, %v3428_v26  ;;  %v3418_v34 = vpop.f32.mrb[120].mxu1  ;;  %v3579_v26 = vld [vmem:[%s5905_s10 + $0xe8] sm:$0xff] }
0x13ce   : > { %v3419_v7 = vadd.f32 %v3418_v34, %v6100_v4  ;;  %v3420_v3 = vpop.f32.mrb[121].mxu1  ;;  %v4096_v32 = vpack.c.bf16 %v3579_v26, %v3578_v33 }
0x13cf   : > { %v3421_v6 = vadd.f32 %v3420_v3, %v6100_v4  ;;  %v3422_v46 = vpop.f32.mrb[122].mxu1  ;;  %3439 = vmatprep.subr.bf16.mxu0 %v3436_v49  ;;  %v3566_v4 = vld [vmem:[%s5905_s10 + $0x80] sm:$0xff]  ;;  %v3563_v49 = vld [vmem:[%s5905_s10 + $0x68] sm:$0xff]  ;;  %v3581_v3 = vld [vmem:[%s5905_s10 + $0xf8] sm:$0xff] }
0x13d0   : > { %v3423_v37 = vadd.f32 %v3422_v46, %v6101_v8  ;;  %v3424_v2 = vpop.f32.mrb[123].mxu1  ;;  %3440 = vmatpush1.bf16.msra.mxu0 %v3435_v57  ;;  %v3431_v1 = vmax.f32 %v3419_v7, 0.0  ;;  %v3562_v57 = vld [vmem:[%s5905_s10 + $0x60] sm:$0xff]  ;;  %v3580_v7 = vld [vmem:[%s5905_s10 + $0xf0] sm:$0xff] }
0x13d1   : > { %v3425_v60 = vadd.f32 %v3424_v2, %v6101_v8  ;;  %v3432_v42 = vmax.f32 %v3421_v6, 0.0  ;;  %v3567_v8 = vld [vmem:[%s5905_s10 + $0x88] sm:$0xff]  ;;  %v4098_v34 = vpack.c.bf16 %v3563_v49, %v3562_v57  ;;  %v4100_v6 = vpack.c.bf16 %v3581_v3, %v3580_v7  ;;  %v3564_v46 = vld [vmem:[%s5905_s10 + $0x70] sm:$0xff] }
0x13d2   : > { %v3433_v17 = vmax.f32 %v3423_v37, 0.0  ;;  %v3565_v37 = vld [vmem:[%s5905_s10 + $0x78] sm:$0xff] }
0x13d3   : > { %v3434_v22 = vmax.f32 %v3425_v60, 0.0  ;;  %v4102_v2 = vpack.c.bf16 %v3565_v37, %v3564_v46 }
0x13d4   : > { %v3437_v11 = vpack.c.bf16 %v3433_v17, %v3431_v1 }
0x13d5   : > { %v3438_v5 = vpack.c.bf16 %v3434_v22, %v3432_v42 }
0x13d7   : > { %3441 = vmatprep.subr.bf16.mxu0 %v3438_v5 }
0x13d8   : > { %3442 = vmatpush1.bf16.msra.mxu0 %v3437_v11 }
0x13d9   : > { %3482 = vmatprep.subr.bf16.mxu0 %v5441_v43  ;;  %v3550_v43 = vld [vmem:[%s5905_s10] sm:$0xff] }
0x13db   : > { %4031 = vmatmul.mubr.msk.bf16.vlgmr.msra.gmra.mrb[156].mxu0 %vm478_vm0, %v5590_v18  ;;  %v3555_v18 = vld [vmem:[%s5905_s10 + $0x28] sm:$0xff] }
0x13dc   : > { %3483 = vmatpush1.bf16.msra.mxu0 %v5446_v40  ;;  %v4072_v40 = vpack.c.bf16 %v3567_v8, %v3566_v4 }
0x13dd   : > { %3484 = vmatprep.subr.bf16.mxu0 %v5449_v59  ;;  %v3551_v59 = vld [vmem:[%s5905_s10 + $0x8] sm:$0xff] }
0x13de   : > { %4073 = vmatprep.subr.bf16.mxu1 %v4072_v40 }
0x13e0   : > { %3485 = vmatpush1.bf16.msra.mxu0 %v5458_v38  ;;  %v3568_v38 = vld [vmem:[%s5905_s10 + $0x90] sm:$0xff] }
0x13e1   : > { %3486 = vmatprep.subr.bf16.mxu0 %v5462_v52  ;;  %v3569_v52 = vld [vmem:[%s5905_s10 + $0x98] sm:$0xff] }
0x13e4   : > { %3487 = vmatpush1.bf16.msra.mxu0 %v5466_v41  ;;  %v4074_v41 = vpack.c.bf16 %v3551_v59, %v3550_v43 }
0x13e5   : > { %3488 = vmatprep.subr.bf16.mxu0 %v5470_v36  ;;  %v4076_v36 = vpack.c.bf16 %v3569_v52, %v3568_v38  ;;  %v4032_v38 = vld [vmem:[%s5906_s11] ss:$0 sm:$0xff] }
0x13e6   : > { %4075 = vmatpush3.bf16.msra.mxu1 %v4074_v41 }
0x13e7   : > { %4077 = vmatprep.subr.bf16.mxu1 %v4076_v36 }
0x13e8   : > { %3489 = vmatpush1.bf16.msra.mxu0 %v5478_v44  ;;  %v3552_v44 = vld [vmem:[%s5905_s10 + $0x10] sm:$0xff] }
0x13e9   : > { %3490 = vmatprep.subr.bf16.mxu0 %v5482_v45  ;;  %v3553_v45 = vld [vmem:[%s5905_s10 + $0x18] sm:$0xff] }
0x13ec   : > { %3491 = vmatpush1.bf16.msra.mxu0 %v5486_v61  ;;  %v3570_v61 = vld [vmem:[%s5905_s10 + $0xa0] sm:$0xff] }
0x13ed   : > { %3492 = vmatprep.subr.bf16.mxu0 %v5490_v58  ;;  %v3571_v58 = vld [vmem:[%s5905_s10 + $0xa8] sm:$0xff] }
0x13f0   : > { %3493 = vmatpush1.bf16.msra.mxu0 %v5494_v10  ;;  %v4078_v10 = vpack.c.bf16 %v3553_v45, %v3552_v44 }
0x13f1   : > { %3494 = vmatprep.subr.bf16.mxu0 %v5498_v12  ;;  %v4080_v12 = vpack.c.bf16 %v3571_v58, %v3570_v61 }
0x13f2   : > { %4079 = vmatpush3.bf16.msra.mxu1 %v4078_v10 }
0x13f3   : > { %4081 = vmatprep.subr.bf16.mxu1 %v4080_v12 }
0x13f4   : > { %3495 = vmatpush1.bf16.msra.mxu0 %v5502_v39  ;;  %v3554_v39 = vld [vmem:[%s5905_s10 + $0x20] sm:$0xff] }
0x13f5   : > { %3496 = vmatprep.subr.bf16.mxu0 %v6166_v62  ;;  %v3572_v62 = vld [vmem:[%s5905_s10 + $0xb0] sm:$0xff] }
0x13f8   : > { %3497 = vmatpush1.bf16.msra.mxu0 %v6167_v29  ;;  %v3573_v29 = vld [vmem:[%s5905_s10 + $0xb8] sm:$0xff] }
0x13f9   : > { %3498 = vmatprep.subr.bf16.mxu0 %v6168_v28  ;;  %v4082_v28 = vpack.c.bf16 %v3555_v18, %v3554_v39 }
0x13fb   : > { %4083 = vmatpush3.bf16.msra.mxu1 %v4082_v28 }
0x13fc   : > { %3499 = vmatpush1.bf16.msra.mxu0 %v6169_v14  ;;  %v4084_v14 = vpack.c.bf16 %v3573_v29, %v3572_v62 }
0x13fd   : > { %3500 = vmatprep.subr.bf16.mxu0 %v6170_v56  ;;  %v3556_v56 = vld [vmem:[%s5905_s10 + $0x30] sm:$0xff] }
0x13fe   : > { %4085 = vmatprep.subr.bf16.mxu1 %v4084_v14 }
0x1400   : > { %3501 = vmatpush1.bf16.msra.mxu0 %v6171_v0  ;;  %v3557_v0 = vld [vmem:[%s5905_s10 + $0x38] sm:$0xff] }
0x1401   : > { %3502 = vmatprep.subr.bf16.mxu0 %v6172_v24  ;;  %v3574_v24 = vld [vmem:[%s5905_s10 + $0xc0] sm:$0xff] }
0x1404   : > { %3503 = vmatpush1.bf16.msra.mxu0 %v6173_v53  ;;  %v3575_v53 = vld [vmem:[%s5905_s10 + $0xc8] sm:$0xff] }
0x1405   : > { %3504 = vmatprep.subr.bf16.mxu0 %v6174_v54  ;;  %v4086_v54 = vpack.c.bf16 %v3557_v0, %v3556_v56 }
0x1407   : > { %4087 = vmatpush3.bf16.msra.mxu1 %v4086_v54 }
0x1408   : > { %3505 = vmatpush1.bf16.msra.mxu0 %v6175_v9  ;;  %v4088_v9 = vpack.c.bf16 %v3575_v53, %v3574_v24 }
0x1409   : > { %3506 = vmatprep.subr.bf16.mxu0 %v6176_v50  ;;  %v3558_v50 = vld [vmem:[%s5905_s10 + $0x40] sm:$0xff] }
0x140a   : > { %4089 = vmatprep.subr.bf16.mxu1 %v4088_v9 }
0x140c   : > { %3507 = vmatpush1.bf16.msra.mxu0 %v6177_v15  ;;  %v3559_v15 = vld [vmem:[%s5905_s10 + $0x48] sm:$0xff] }
0x140d   : > { %3508 = vmatprep.subr.bf16.mxu0 %v6178_v16  ;;  %v3576_v16 = vld [vmem:[%s5905_s10 + $0xd0] sm:$0xff] }
0x1410   : > { %3509 = vmatpush1.bf16.msra.mxu0 %v6179_v55  ;;  %v3577_v55 = vld [vmem:[%s5905_s10 + $0xd8] sm:$0xff] }
0x1411   : > { %3510 = vmatprep.subr.bf16.mxu0 %v6180_v48  ;;  %v4090_v48 = vpack.c.bf16 %v3559_v15, %v3558_v50 }
0x1413   : > { %4091 = vmatpush3.bf16.msra.mxu1 %v4090_v48 }
0x1414   : > { %3511 = vmatpush1.bf16.msra.mxu0 %v6181_v47  ;;  %v4092_v47 = vpack.c.bf16 %v3577_v55, %v3576_v16 }
0x1415   : > { %3512 = vmatprep.subr.bf16.mxu0 %v6182_v19  ;;  %v3560_v19 = vld [vmem:[%s5905_s10 + $0x50] sm:$0xff] }
0x1416   : > { %4093 = vmatprep.subr.bf16.mxu1 %v4092_v47 }
0x1418   : > { %3513 = vmatpush1.bf16.msra.mxu0 %v6183_v20  ;;  %v3561_v20 = vld [vmem:[%s5905_s10 + $0x58] sm:$0xff] }
0x1419   : > { %v4094_v21 = vpack.c.bf16 %v3561_v20, %v3560_v19 }
0x141b   : > { %4095 = vmatpush3.bf16.msra.mxu1 %v4094_v21 }
0x141c   : > { %4097 = vmatprep.subr.bf16.mxu1 %v4096_v32 }
0x141f   : > { %4099 = vmatpush3.bf16.msra.mxu1 %v4098_v34 }
0x1420   : > { %4101 = vmatprep.subr.bf16.mxu1 %v4100_v6 }
0x1423   : > { %4103 = vmatpush3.bf16.msra.mxu1 %v4102_v2 }
0x14ae   : > { %v3473_v63 = vpop.f32.mrb[156].mxu0 }
0x14af   : > { %v3475_v51 = vpop.f32.mrb[157].mxu0  ;;  %v3480_v27 = vpack.c.bf16 %v3473_v63, %v3473_v63 }
0x14b0   : > { %v3481_v30 = vpack.c.bf16 %v3475_v51, %v3475_v51  ;;  %v3477_v25 = vpop.f32.mrb[158].mxu0 }
0x14b1   : > { %v3478_v31 = vpop.f32.mrb[159].mxu0 }
0x14b2   : > { %3514 = vmatprep.mubr.bf16.mxu0 %v3481_v30 }
0x14b3   : > { %3515 = vmatmul.mubr.bf16.vlgmr.msra.gmra.mrb[160].mxu0 %v3480_v27 }
0x1586   : > { %v3516_v60 = vpop.f32.mrb[160].mxu0 }
0x1587   : > { %v3517_v1 = vadd.f32 %v3516_v60, %v6184_v23  ;;  %v3518_v17 = vpop.f32.mrb[161].mxu0 }
0x1588   : > { %v3519_v42 = vadd.f32 %v3518_v17, %v6184_v23  ;;  %v3520_v22 = vpop.f32.mrb[162].mxu0 }
0x1589   : > { %v3537_v11 = vrot.slane %v3517_v1, 5  ;;  %v3521_v5 = vpop.f32.mrb[163].mxu0 }
0x158a   : > { %v3538_v4 = vrot.slane %v3519_v42, 5 }
0x158b   : > { %v3548_v8 = vsel %vm3547_vm4, %v5681_v35, %v3537_v11 }
0x158c   : > { %v3549_v43 = vsel %vm3547_vm4, %v5684_v13, %v3538_v4 }
0x158d   : > { %3653 = vmatprep.mubr.f32.mxu1 %v3549_v43 }
0x158e   : > { %3654 = vmatmul.mubr.f32.vlgmr.msra.gmra.mrb[124].mxu1 %v3548_v8 }
0x1661   : > { %v4069_v40 = vpop.f32.mrb[124].mxu1 }
0x1662   : > { %v4070_v59 = vpop.f32.mrb[125].mxu1 }
0x1663   : > { %v4071_v52 = vadd.f32 %v4070_v59, %v4069_v40 }
0x1665   : > { %v3656_v23 = vadd.f32 %v4071_v52, %v4032_v38 }
0x1667   : > { %v3660_v41 = vsel %vm3659_vm5, %v3656_v23, -inf }
0x1668   : > { %3661 = vmax.xlane.f32.xlu1 %v3660_v41 }
0x16f5   : > { %v3662_v36 = vpop.xlane.xlu1 %3661 }
0x16f6   : > { %v3663_v44 = vsub.f32 %v3656_v23, %v3662_v36 }
0x16f8   : > { %v3664_v35 = vmul.f32 1.442695, %v3663_v44 }
0x16fa   : > { %4315 = vpow2.f32 %v3664_v35 }
0x1704   : > { %v4316_v13 = vpop.eup %4315 }
0x1705   : > { %v3666_v45 = vsel %vm3659_vm5, %v4316_v13, 0.0 }
0x1706   : > { %3667 = vadd.xlane.f32.xlu0 %v3666_v45 }
0x1793   : > { %v3668_v61 = vpop.xlane.xlu0 %3667 }
0x1794   : > { %4317 = vrcp.f32 %v3668_v61 }
0x179e   : > { %v4318_v58 = vpop.eup %4317 }
0x179f   : > { %v3670_v10 = vmul.f32 %v4318_v58, %v4316_v13 }
0x17a1   : > { %3671 = vst.msk [vmem:[%s438_s28] sm:$0xf] %vm3659_vm5, %v3670_v10 }
0x17a2 PF: > { %s24_s23 = sadd.s32 1, %s4348_s23  }
0x17a3   : > { %p21_p5 = scmp.ge.s32.totalorder %s24_s23, 4  }
0x17a5   :  { %23 = sbr.rel (!%p21_p5) target bundleno = 3 (0x3), region = 104 }

</bundles_post_ra>
